<compile_context>
chip_gen: v7x
topology: tpu7x:2x2x1
jax: 0.10.0
libtpu: 0.0.40
codegen_flags: <defaults>
</compile_context>

<pallas_src>
import functools

import numpy as np
import jax
import jax.numpy as jnp
from jax import lax
from jax.experimental import pallas as pl
from jax.experimental.pallas import tpu as pltpu

LEAKY_SLOPE = 0.01   # nn.LeakyReLU() default
BN_EPS = 1e-5


def _leaky(x):
    return jnp.where(x >= 0, x, LEAKY_SLOPE * x)


# -----------------------------------------------------------------------------
# Fused kernel: for one (batch n, H-strip i) block
#   1) 1x1 conv + BN + LeakyReLU on the strip rows plus 1 halo row above/below
#      -> written into a ring-zeroed VMEM intermediate (pad=1 handled here)
#   2) 3x3 conv as 9 shifted matmuls accumulated in f32 + BN + LeakyReLU
#   3) residual add with a fresh read of the input strip, store output strip
# -----------------------------------------------------------------------------
def resblock_kernel(x_mid_ref, x_top_ref, x_bot_ref,
                    w1_ref, s1_ref, sh1_ref,
                    w2_ref, s2_ref, sh2_ref,
                    o_ref, y1p_ref):
    i = pl.program_id(1)
    n_strips = pl.num_programs(1)
    _, TH, W, Cin = o_ref.shape
    Cmid = w1_ref.shape[1]

    w1 = w1_ref[...]            # (Cin, Cmid) bf16
    s1 = s1_ref[...]            # (1, Cmid)   f32
    sh1 = sh1_ref[...]          # (1, Cmid)   f32

    def dbl1(x2d):              # (R, Cin) f32 -> (R, Cmid) bf16
        y = jnp.dot(x2d.astype(jnp.bfloat16), w1,
                    preferred_element_type=jnp.float32)
        return _leaky(y * s1 + sh1).astype(jnp.bfloat16)

    # ---- pad ring only (interior rows are fully overwritten below) ---------
    # W-border columns are never written by compute -> re-zero every step
    # (cheap, and correct per-core under v7x megacore scratch duplication).
    y1p_ref[:, 0:1, :] = jnp.zeros((TH + 2, 1, Cmid), jnp.bfloat16)
    y1p_ref[:, W + 1:W + 2, :] = jnp.zeros((TH + 2, 1, Cmid), jnp.bfloat16)

    # ---- DBL1 on the strip interior ----------------------------------------
    y1p_ref[1:TH + 1, 1:W + 1, :] = dbl1(
        x_mid_ref[...].reshape(TH * W, Cin)).reshape(TH, W, Cmid)

    # ---- halo rows: recompute DBL1 for the neighbouring row, or zero at the
    #      image border (== conv2's zero padding) -----------------------------
    @pl.when(i > 0)
    def _():
        y1p_ref[0:1, 1:W + 1, :] = dbl1(
            x_top_ref[...].reshape(W, Cin)).reshape(1, W, Cmid)

    @pl.when(i == 0)
    def _():
        y1p_ref[0:1, 1:W + 1, :] = jnp.zeros((1, W, Cmid), jnp.bfloat16)

    @pl.when(i < n_strips - 1)
    def _():
        y1p_ref[TH + 1:TH + 2, 1:W + 1, :] = dbl1(
            x_bot_ref[...].reshape(W, Cin)).reshape(1, W, Cmid)

    @pl.when(i == n_strips - 1)
    def _():
        y1p_ref[TH + 1:TH + 2, 1:W + 1, :] = jnp.zeros((1, W, Cmid),
                                                       jnp.bfloat16)

    # ---- DBL2: 3x3 conv as 9 shifted matmuls accumulated in f32 ------------
    # No im2col patch tensor; each tap is a static slice of the VMEM scratch.
    acc = None
    for kh in range(3):
        for kw in range(3):
            tap = y1p_ref[kh:kh + TH, kw:kw + W, :]       # (TH, W, Cmid) bf16
            part = jnp.dot(tap.reshape(TH * W, Cmid),     # (Cmid, Cin) weight
                           w2_ref[kh * 3 + kw],
                           preferred_element_type=jnp.float32)
            acc = part if acc is None else acc + part

    y2 = _leaky(acc * s2_ref[...] + sh2_ref[...])          # (TH*W, Cin) f32

    # Residual: re-read the (still VMEM-resident) input block here instead of
    # keeping an f32 copy live across the nine matmuls.
    out = y2 + x_mid_ref[...].reshape(TH * W, Cin)
    o_ref[...] = out.reshape(1, TH, W, Cin).astype(o_ref.dtype)


# -----------------------------------------------------------------------------
# VMEM-budget-driven tiling
# -----------------------------------------------------------------------------
def _vmem_bytes_per_step(tile_h, W, Cin, Cmid):
    f32, bf16 = 4, 2
    x_strip = tile_h * W * Cin * f32                 # input block
    halo_rows = 2 * W * Cin * f32                    # top + bottom halo rows
    out_strip = tile_h * W * Cin * f32               # output block
    y1p = (tile_h + 2) * (W + 2) * Cmid * bf16       # padded intermediate
    # transient compute buffers: f32 acc, f32 dbl1 pre-cast, bf16 cast of x
    temps = tile_h * W * (Cin * f32 + Cmid * f32 + Cin * bf16)
    weights = (Cin * Cmid + 9 * Cmid * Cin) * bf16 + 2 * (Cmid + Cin) * f32
    # pipelined activation blocks are double-buffered; weights single-buffered
    return 2 * (x_strip + halo_rows + out_strip) + y1p + temps + weights


def _vmem_limit_bytes():
    try:
        cap = pltpu.get_tpu_info().vmem_capacity_bytes   # 128 MiB v5e/v6e, 64 MiB v7x/TC
    except Exception:
        cap = 64 * 1024 * 1024                           # conservative default
    return int(cap * 3 // 4)


def _pick_tile_h(N, H, W, Cin, Cmid, budget_bytes, max_rows=256):
    """Largest divisor of H whose per-step footprint fits the VMEM budget,
    preferring a grid with >= 2 total steps so both TensorCores get work."""
    divisors = [d for d in range(1, min(H, max_rows) + 1) if H % d == 0]
    fitting = [d for d in divisors
               if _vmem_bytes_per_step(d, W, Cin, Cmid) <= budget_bytes]
    cands = fitting if fitting else divisors[:1]
    multi = [d for d in cands if N * (H // d) >= 2]
    return max(multi) if multi else max(cands)


def _const_spec(shape, single_buffer):
    """BlockSpec for a constant-index operand; single-buffered if supported."""
    idx = lambda n, i: (0,) * len(shape)
    if single_buffer and hasattr(pl, "Buffered"):
        try:
            return pl.BlockSpec(shape, idx, pipeline_mode=pl.Buffered(1))
        except TypeError:          # older BlockSpec signature
            pass
    return pl.BlockSpec(shape, idx)


# -----------------------------------------------------------------------------
# Wrappers
# -----------------------------------------------------------------------------
def resblock_pallas_nhwc(x_nhwc, params, tile_h=None, single_buffer_weights=True):
    N, H, W, Cin = x_nhwc.shape
    Cmid = params["w1"].shape[1]

    vmem_limit = _vmem_limit_bytes()
    if tile_h is None:
        tile_h = _pick_tile_h(N, H, W, Cin, Cmid,
                              budget_bytes=(vmem_limit * 4) // 5)
    assert H % tile_h == 0, "tile_h must divide H"
    n_strips = H // tile_h

    # Weights in bf16 for the MXU; w2 stored as (9, Cmid, Cin) -- one
    # (Cmid, Cin) slab per 3x3 tap, indexed statically in the kernel.
    w1b = params["w1"].astype(jnp.bfloat16)                          # (Cin, Cmid)
    w2b = params["w2"].reshape(9, Cmid, Cin).astype(jnp.bfloat16)    # (9, Cmid, Cin)

    row_top = lambda n, i: (n, jnp.maximum(i * tile_h - 1, 0), 0, 0)
    row_bot = lambda n, i: (n, jnp.minimum((i + 1) * tile_h, H - 1), 0, 0)

    out = pl.pallas_call(
        resblock_kernel,
        out_shape=jax.ShapeDtypeStruct((N, H, W, Cin), jnp.float32),
        grid_spec=pltpu.PrefetchScalarGridSpec(
            num_scalar_prefetch=0,
            grid=(N, n_strips),
            in_specs=[
                pl.BlockSpec((1, tile_h, W, Cin), lambda n, i: (n, i, 0, 0)),
                pl.BlockSpec((1, 1, W, Cin), row_top),
                pl.BlockSpec((1, 1, W, Cin), row_bot),
                _const_spec((Cin, Cmid), single_buffer_weights),
                _const_spec((1, Cmid), single_buffer_weights),
                _const_spec((1, Cmid), single_buffer_weights),
                _const_spec((9, Cmid, Cin), single_buffer_weights),
                _const_spec((1, Cin), single_buffer_weights),
                _const_spec((1, Cin), single_buffer_weights),
            ],
            out_specs=pl.BlockSpec((1, tile_h, W, Cin),
                                   lambda n, i: (n, i, 0, 0)),
            scratch_shapes=[
                pltpu.VMEM((tile_h + 2, W + 2, Cmid), jnp.bfloat16),
            ],
        ),
        compiler_params=pltpu.CompilerParams(
            dimension_semantics=("parallel", "parallel"),
            vmem_limit_bytes=vmem_limit),
    )(x_nhwc, x_nhwc, x_nhwc, w1b, params["s1"], params["sh1"],
      w2b, params["s2"], params["sh2"])
    return out


def resblock_pallas(x_nchw, params, tile_h=None, single_buffer_weights=True):
    # NCHW module boundary; channels-last callers should use
    # resblock_pallas_nhwc directly and skip these transposes.
    x_nhwc = jnp.transpose(x_nchw, (0, 2, 3, 1))
    out_nhwc = resblock_pallas_nhwc(x_nhwc, params, tile_h=tile_h,
                                    single_buffer_weights=single_buffer_weights)
    return jnp.transpose(out_nhwc, (0, 3, 1, 2))


# -----------------------------------------------------------------------------
# Parameter construction (deterministic, synthetic) with BN folded to
# per-channel (scale, shift):  scale = gamma/sqrt(var+eps),
#                              shift = beta + (conv_bias - mean)*scale
# -----------------------------------------------------------------------------
def init_params(key, in_channels, out_channels):
    ks = jax.random.split(key, 8)

    def bn_fold(gamma, beta, mean, var, conv_bias):
        scale = gamma / jnp.sqrt(var + BN_EPS)
        shift = beta + (conv_bias - mean) * scale
        return scale[None, :], shift[None, :]

    # DBL1: 1x1 conv in->out (weights stored (Cin, Cout)), bias, BN.
    w1 = jax.random.normal(ks[0], (in_channels, out_channels), jnp.float32) * 0.1
    b1 = jax.random.normal(ks[1], (out_channels,), jnp.float32) * 0.1
    g1 = 1.0 + 0.1 * jax.random.normal(ks[2], (out_channels,), jnp.float32)
    be1 = 0.1 * jax.random.normal(ks[3], (out_channels,), jnp.float32)
    m1 = 0.05 * jax.random.normal(ks[4], (out_channels,), jnp.float32)
    v1 = 1.0 + 0.1 * jax.random.uniform(ks[5], (out_channels,), jnp.float32)
    s1, sh1 = bn_fold(g1, be1, m1, v1, b1)

    # DBL2: 3x3 conv out->in, HWIO (3,3,Cmid,Cin), bias, BN.
    w2 = jax.random.normal(ks[6], (3, 3, out_channels, in_channels), jnp.float32) * 0.1
    b2 = jax.random.normal(ks[7], (in_channels,), jnp.float32) * 0.1
    g2 = 1.0 + 0.1 * jax.random.normal(ks[2], (in_channels,), jnp.float32)
    be2 = 0.1 * jax.random.normal(ks[3], (in_channels,), jnp.float32)
    m2 = 0.05 * jax.random.normal(ks[4], (in_channels,), jnp.float32)
    v2 = 1.0 + 0.1 * jax.random.uniform(ks[5], (in_channels,), jnp.float32)
    s2, sh2 = bn_fold(g2, be2, m2, v2, b2)

    return dict(w1=w1, s1=s1, sh1=sh1, w2=w2, s2=s2, sh2=sh2)


# -----------------------------------------------------------------------------
# Pure-JAX reference (NCHW, lax conv, f32) for correctness check
# -----------------------------------------------------------------------------
def resblock_ref(x_nchw, params):
    w1_oihw = params["w1"].T[:, :, None, None]                 # (Cout,Cin,1,1)
    w2_oihw = jnp.transpose(params["w2"], (3, 2, 0, 1))        # (Cin,Cmid,3,3)

    def dbl(x, w, pad, scale, shift):
        y = lax.conv_general_dilated(
            x, w, window_strides=(1, 1), padding=[(pad, pad), (pad, pad)],
            dimension_numbers=("NCHW", "OIHW", "NCHW"))
        y = y * scale[0][None, :, None, None] + shift[0][None, :, None, None]
        return jnp.where(y >= 0, y, LEAKY_SLOPE * y)

    y1 = dbl(x_nchw, w1_oihw, 0, params["s1"], params["sh1"])
    y2 = dbl(y1, w2_oihw, 1, params["s2"], params["sh2"])
    return x_nchw + y2


if __name__ == "__main__":
    key = jax.random.PRNGKey(0)
    kx, kp = jax.random.split(key)

    N, Cin, H, W = 2, 8, 16, 16
    Cout = 4  # Darknet ResBlock halves channels in conv1
    x = jax.random.normal(kx, (N, Cin, H, W), jnp.float32)
    params = init_params(kp, Cin, Cout)

    # tile_h=8 -> 2 H-strips per image so the halo paths are exercised.
    fwd = jax.jit(functools.partial(resblock_pallas, tile_h=8))
    try:
        out = jax.block_until_ready(fwd(x, params))
    except Exception:
        # Fallback for JAX builds that reject single-buffered pipeline_mode.
        fwd = jax.jit(functools.partial(resblock_pallas, tile_h=8,
                                        single_buffer_weights=False))
        out = jax.block_until_ready(fwd(x, params))

    ref = resblock_ref(x, params)
    # bf16 matmuls / bf16 intermediate -> slightly looser tolerance than f32.
    np.testing.assert_allclose(np.asarray(out), np.asarray(ref),
                               rtol=1e-2, atol=1e-2)

    print("KERNEL_OK")
</pallas_src>

<mosaic_0001>
module attributes {stable_mosaic.version = 11 : i64} {
  func.func @resblock_kernel(%arg0: i32, %arg1: i32, %arg2: memref<1x8x16x8xf32, #tpu.memory_space<vmem>>, %arg3: memref<1x1x16x8xf32, #tpu.memory_space<vmem>>, %arg4: memref<1x1x16x8xf32, #tpu.memory_space<vmem>>, %arg5: memref<8x4xbf16, #tpu.memory_space<vmem>>, %arg6: memref<1x4xf32, #tpu.memory_space<vmem>>, %arg7: memref<1x4xf32, #tpu.memory_space<vmem>>, %arg8: memref<9x4x8xbf16, #tpu.memory_space<vmem>>, %arg9: memref<1x8xf32, #tpu.memory_space<vmem>>, %arg10: memref<1x8xf32, #tpu.memory_space<vmem>>, %arg11: memref<1x8x16x8xf32, #tpu.memory_space<vmem>>, %arg12: memref<10x18x4xbf16, #tpu.memory_space<vmem>>) attributes {dimension_semantics = [#tpu.dimension_semantics<parallel>, #tpu.dimension_semantics<parallel>], iteration_bounds = array<i64: 2, 2>, scalar_prefetch = 0 : i64, scratch_operands = 1 : i64, tpu.core_type = #tpu.core_type<tc>, window_params = [{transform_indices = @transform_0, window_bounds = array<i64: 1, 8, 16, 8>}, {transform_indices = @transform_1, window_bounds = array<i64: 1, 1, 16, 8>}, {transform_indices = @transform_2, window_bounds = array<i64: 1, 1, 16, 8>}, {pipeline_mode = #tpu.pipeline_mode<synchronous>, transform_indices = @transform_3, window_bounds = array<i64: 8, 4>}, {pipeline_mode = #tpu.pipeline_mode<synchronous>, transform_indices = @transform_4, window_bounds = array<i64: 1, 4>}, {pipeline_mode = #tpu.pipeline_mode<synchronous>, transform_indices = @transform_5, window_bounds = array<i64: 1, 4>}, {pipeline_mode = #tpu.pipeline_mode<synchronous>, transform_indices = @transform_6, window_bounds = array<i64: 9, 4, 8>}, {pipeline_mode = #tpu.pipeline_mode<synchronous>, transform_indices = @transform_7, window_bounds = array<i64: 1, 8>}, {pipeline_mode = #tpu.pipeline_mode<synchronous>, transform_indices = @transform_8, window_bounds = array<i64: 1, 8>}, {transform_indices = @transform_9, window_bounds = array<i64: 1, 8, 16, 8>}]} {
    %c0 = arith.constant 0 : index
    %c0_0 = arith.constant 0 : index
    %0 = vector.load %arg5[%c0, %c0_0] : memref<8x4xbf16, #tpu.memory_space<vmem>>, vector<8x4xbf16>
    %c0_1 = arith.constant 0 : index
    %c0_2 = arith.constant 0 : index
    %1 = vector.load %arg6[%c0_1, %c0_2] : memref<1x4xf32, #tpu.memory_space<vmem>>, vector<1x4xf32>
    %c0_3 = arith.constant 0 : index
    %c0_4 = arith.constant 0 : index
    %2 = vector.load %arg7[%c0_3, %c0_4] : memref<1x4xf32, #tpu.memory_space<vmem>>, vector<1x4xf32>
    %cst = arith.constant 0.000000e+00 : bf16
    %3 = vector.broadcast %cst : bf16 to vector<10x1x4xbf16>
    %c0_5 = arith.constant 0 : index
    %c0_6 = arith.constant 0 : index
    %c0_7 = arith.constant 0 : index
    %4 = vector.load %arg12[%c0_5, %c0_6, %c0_7] : memref<10x18x4xbf16, #tpu.memory_space<vmem>>, vector<10x1x4xbf16>
    tpu.vector_store %arg12[%c0_5, %c0_6, %c0_7], %3 {strides = array<i32>} : memref<10x18x4xbf16, #tpu.memory_space<vmem>>, vector<10x1x4xbf16>,
    %cst_8 = arith.constant 0.000000e+00 : bf16
    %5 = vector.broadcast %cst_8 : bf16 to vector<10x1x4xbf16>
    %c0_9 = arith.constant 0 : index
    %c17 = arith.constant 17 : index
    %c0_10 = arith.constant 0 : index
    %6 = vector.load %arg12[%c0_9, %c17, %c0_10] : memref<10x18x4xbf16, #tpu.memory_space<vmem>>, vector<10x1x4xbf16>
    tpu.vector_store %arg12[%c0_9, %c17, %c0_10], %5 {strides = array<i32>} : memref<10x18x4xbf16, #tpu.memory_space<vmem>>, vector<10x1x4xbf16>,
    %c0_11 = arith.constant 0 : index
    %c0_12 = arith.constant 0 : index
    %c0_13 = arith.constant 0 : index
    %c0_14 = arith.constant 0 : index
    %7 = vector.load %arg2[%c0_11, %c0_12, %c0_13, %c0_14] : memref<1x8x16x8xf32, #tpu.memory_space<vmem>>, vector<1x8x16x8xf32>
    %8 = vector.shape_cast %7 : vector<1x8x16x8xf32> to vector<128x8xf32>
    %9 = arith.truncf %8 : vector<128x8xf32> to vector<128x8xbf16>
    %cst_15 = arith.constant dense<0.000000e+00> : vector<128x4xf32>
    %10 = tpu.matmul %9, %0, %cst_15 {dimension_numbers = #tpu.dot_dimension_numbers<[1], [0], [0], [1], [0, 0, 1, 1], [], []>} : vector<128x8xbf16>, vector<8x4xbf16>, vector<128x4xf32> -> vector<128x4xf32>
    %11 = vector.broadcast %1 : vector<1x4xf32> to vector<128x4xf32>
    %12 = arith.mulf %10, %11 : vector<128x4xf32>
    %13 = vector.broadcast %2 : vector<1x4xf32> to vector<128x4xf32>
    %14 = arith.addf %12, %13 : vector<128x4xf32>
    %cst_16 = arith.constant 0.000000e+00 : f32
    %15 = vector.broadcast %cst_16 : f32 to vector<128x4xf32>
    %16 = arith.cmpf oge, %14, %15 : vector<128x4xf32>
    %cst_17 = arith.constant 0.00999999977 : f32
    %17 = vector.broadcast %cst_17 : f32 to vector<128x4xf32>
    %18 = arith.mulf %17, %14 : vector<128x4xf32>
    %19 = arith.select %16, %14, %18 : vector<128x4xi1>, vector<128x4xf32>
    %20 = arith.truncf %19 : vector<128x4xf32> to vector<128x4xbf16>
    %21 = vector.shape_cast %20 : vector<128x4xbf16> to vector<8x16x4xbf16>
    %c1 = arith.constant 1 : index
    %c1_18 = arith.constant 1 : index
    %c0_19 = arith.constant 0 : index
    %22 = vector.load %arg12[%c1, %c1_18, %c0_19] : memref<10x18x4xbf16, #tpu.memory_space<vmem>>, vector<8x16x4xbf16>
    tpu.vector_store %arg12[%c1, %c1_18, %c0_19], %21 {strides = array<i32>} : memref<10x18x4xbf16, #tpu.memory_space<vmem>>, vector<8x16x4xbf16>,
    %c0_i32 = arith.constant 0 : i32
    %23 = arith.cmpi sgt, %arg1, %c0_i32 : i32
    %24 = arith.extui %23 : i1 to i32
    %c0_i32_20 = arith.constant 0 : i32
    %25 = arith.cmpi ne, %24, %c0_i32_20 : i32
    scf.if %25 {
      %c0_96 = arith.constant 0 : index
      %c0_97 = arith.constant 0 : index
      %c0_98 = arith.constant 0 : index
      %c0_99 = arith.constant 0 : index
      %104 = vector.load %arg3[%c0_96, %c0_97, %c0_98, %c0_99] : memref<1x1x16x8xf32, #tpu.memory_space<vmem>>, vector<1x1x16x8xf32>
      %105 = vector.shape_cast %104 : vector<1x1x16x8xf32> to vector<16x8xf32>
      %106 = arith.truncf %105 : vector<16x8xf32> to vector<16x8xbf16>
      %cst_100 = arith.constant dense<0.000000e+00> : vector<16x4xf32>
      %107 = tpu.matmul %106, %0, %cst_100 {dimension_numbers = #tpu.dot_dimension_numbers<[1], [0], [0], [1], [0, 0, 1, 1], [], []>} : vector<16x8xbf16>, vector<8x4xbf16>, vector<16x4xf32> -> vector<16x4xf32>
      %108 = vector.broadcast %1 : vector<1x4xf32> to vector<16x4xf32>
      %109 = arith.mulf %107, %108 : vector<16x4xf32>
      %110 = vector.broadcast %2 : vector<1x4xf32> to vector<16x4xf32>
      %111 = arith.addf %109, %110 : vector<16x4xf32>
      %cst_101 = arith.constant 0.000000e+00 : f32
      %112 = vector.broadcast %cst_101 : f32 to vector<16x4xf32>
      %113 = arith.cmpf oge, %111, %112 : vector<16x4xf32>
      %cst_102 = arith.constant 0.00999999977 : f32
      %114 = vector.broadcast %cst_102 : f32 to vector<16x4xf32>
      %115 = arith.mulf %114, %111 : vector<16x4xf32>
      %116 = arith.select %113, %111, %115 : vector<16x4xi1>, vector<16x4xf32>
      %117 = arith.truncf %116 : vector<16x4xf32> to vector<16x4xbf16>
      %118 = vector.shape_cast %117 : vector<16x4xbf16> to vector<1x16x4xbf16>
      %c0_103 = arith.constant 0 : index
      %c1_104 = arith.constant 1 : index
      %c0_105 = arith.constant 0 : index
      %119 = vector.load %arg12[%c0_103, %c1_104, %c0_105] : memref<10x18x4xbf16, #tpu.memory_space<vmem>>, vector<1x16x4xbf16>
      tpu.vector_store %arg12[%c0_103, %c1_104, %c0_105], %118 {strides = array<i32>} : memref<10x18x4xbf16, #tpu.memory_space<vmem>>, vector<1x16x4xbf16>,
    } else {
    }
    %c0_i32_21 = arith.constant 0 : i32
    %26 = arith.cmpi eq, %arg1, %c0_i32_21 : i32
    %27 = arith.extui %26 : i1 to i32
    %c0_i32_22 = arith.constant 0 : i32
    %28 = arith.cmpi ne, %27, %c0_i32_22 : i32
    scf.if %28 {
      %cst_96 = arith.constant 0.000000e+00 : bf16
      %104 = vector.broadcast %cst_96 : bf16 to vector<1x16x4xbf16>
      %c0_97 = arith.constant 0 : index
      %c1_98 = arith.constant 1 : index
      %c0_99 = arith.constant 0 : index
      %105 = vector.load %arg12[%c0_97, %c1_98, %c0_99] : memref<10x18x4xbf16, #tpu.memory_space<vmem>>, vector<1x16x4xbf16>
      tpu.vector_store %arg12[%c0_97, %c1_98, %c0_99], %104 {strides = array<i32>} : memref<10x18x4xbf16, #tpu.memory_space<vmem>>, vector<1x16x4xbf16>,
    } else {
    }
    %c1_i32 = arith.constant 1 : i32
    %29 = arith.cmpi slt, %arg1, %c1_i32 : i32
    %30 = arith.extui %29 : i1 to i32
    %c0_i32_23 = arith.constant 0 : i32
    %31 = arith.cmpi ne, %30, %c0_i32_23 : i32
    scf.if %31 {
      %c0_96 = arith.constant 0 : index
      %c0_97 = arith.constant 0 : index
      %c0_98 = arith.constant 0 : index
      %c0_99 = arith.constant 0 : index
      %104 = vector.load %arg4[%c0_96, %c0_97, %c0_98, %c0_99] : memref<1x1x16x8xf32, #tpu.memory_space<vmem>>, vector<1x1x16x8xf32>
      %105 = vector.shape_cast %104 : vector<1x1x16x8xf32> to vector<16x8xf32>
      %106 = arith.truncf %105 : vector<16x8xf32> to vector<16x8xbf16>
      %cst_100 = arith.constant dense<0.000000e+00> : vector<16x4xf32>
      %107 = tpu.matmul %106, %0, %cst_100 {dimension_numbers = #tpu.dot_dimension_numbers<[1], [0], [0], [1], [0, 0, 1, 1], [], []>} : vector<16x8xbf16>, vector<8x4xbf16>, vector<16x4xf32> -> vector<16x4xf32>
      %108 = vector.broadcast %1 : vector<1x4xf32> to vector<16x4xf32>
      %109 = arith.mulf %107, %108 : vector<16x4xf32>
      %110 = vector.broadcast %2 : vector<1x4xf32> to vector<16x4xf32>
      %111 = arith.addf %109, %110 : vector<16x4xf32>
      %cst_101 = arith.constant 0.000000e+00 : f32
      %112 = vector.broadcast %cst_101 : f32 to vector<16x4xf32>
      %113 = arith.cmpf oge, %111, %112 : vector<16x4xf32>
      %cst_102 = arith.constant 0.00999999977 : f32
      %114 = vector.broadcast %cst_102 : f32 to vector<16x4xf32>
      %115 = arith.mulf %114, %111 : vector<16x4xf32>
      %116 = arith.select %113, %111, %115 : vector<16x4xi1>, vector<16x4xf32>
      %117 = arith.truncf %116 : vector<16x4xf32> to vector<16x4xbf16>
      %118 = vector.shape_cast %117 : vector<16x4xbf16> to vector<1x16x4xbf16>
      %c9 = arith.constant 9 : index
      %c1_103 = arith.constant 1 : index
      %c0_104 = arith.constant 0 : index
      %119 = vector.load %arg12[%c9, %c1_103, %c0_104] : memref<10x18x4xbf16, #tpu.memory_space<vmem>>, vector<1x16x4xbf16>
      tpu.vector_store %arg12[%c9, %c1_103, %c0_104], %118 {strides = array<i32>} : memref<10x18x4xbf16, #tpu.memory_space<vmem>>, vector<1x16x4xbf16>,
    } else {
    }
    %c1_i32_24 = arith.constant 1 : i32
    %32 = arith.cmpi eq, %arg1, %c1_i32_24 : i32
    %33 = arith.extui %32 : i1 to i32
    %c0_i32_25 = arith.constant 0 : i32
    %34 = arith.cmpi ne, %33, %c0_i32_25 : i32
    scf.if %34 {
      %cst_96 = arith.constant 0.000000e+00 : bf16
      %104 = vector.broadcast %cst_96 : bf16 to vector<1x16x4xbf16>
      %c9 = arith.constant 9 : index
      %c1_97 = arith.constant 1 : index
      %c0_98 = arith.constant 0 : index
      %105 = vector.load %arg12[%c9, %c1_97, %c0_98] : memref<10x18x4xbf16, #tpu.memory_space<vmem>>, vector<1x16x4xbf16>
      tpu.vector_store %arg12[%c9, %c1_97, %c0_98], %104 {strides = array<i32>} : memref<10x18x4xbf16, #tpu.memory_space<vmem>>, vector<1x16x4xbf16>,
    } else {
    }
    %c0_26 = arith.constant 0 : index
    %c0_27 = arith.constant 0 : index
    %c0_28 = arith.constant 0 : index
    %35 = vector.load %arg12[%c0_26, %c0_27, %c0_28] : memref<10x18x4xbf16, #tpu.memory_space<vmem>>, vector<8x16x4xbf16>
    %36 = vector.shape_cast %35 : vector<8x16x4xbf16> to vector<128x4xbf16>
    %c0_29 = arith.constant 0 : index
    %c0_30 = arith.constant 0 : index
    %c0_31 = arith.constant 0 : index
    %37 = vector.load %arg8[%c0_29, %c0_30, %c0_31] : memref<9x4x8xbf16, #tpu.memory_space<vmem>>, vector<1x4x8xbf16>
    %38 = vector.shape_cast %37 : vector<1x4x8xbf16> to vector<4x8xbf16>
    %cst_32 = arith.constant dense<0.000000e+00> : vector<128x8xf32>
    %39 = tpu.matmul %36, %38, %cst_32 {dimension_numbers = #tpu.dot_dimension_numbers<[1], [0], [0], [1], [0, 0, 1, 1], [], []>} : vector<128x4xbf16>, vector<4x8xbf16>, vector<128x8xf32> -> vector<128x8xf32>
    %c0_33 = arith.constant 0 : index
    %c1_34 = arith.constant 1 : index
    %c0_35 = arith.constant 0 : index
    %40 = vector.load %arg12[%c0_33, %c1_34, %c0_35] : memref<10x18x4xbf16, #tpu.memory_space<vmem>>, vector<8x16x4xbf16>
    %41 = vector.shape_cast %40 : vector<8x16x4xbf16> to vector<128x4xbf16>
    %c1_36 = arith.constant 1 : index
    %c0_37 = arith.constant 0 : index
    %c0_38 = arith.constant 0 : index
    %42 = vector.load %arg8[%c1_36, %c0_37, %c0_38] : memref<9x4x8xbf16, #tpu.memory_space<vmem>>, vector<1x4x8xbf16>
    %43 = vector.shape_cast %42 : vector<1x4x8xbf16> to vector<4x8xbf16>
    %cst_39 = arith.constant dense<0.000000e+00> : vector<128x8xf32>
    %44 = tpu.matmul %41, %43, %cst_39 {dimension_numbers = #tpu.dot_dimension_numbers<[1], [0], [0], [1], [0, 0, 1, 1], [], []>} : vector<128x4xbf16>, vector<4x8xbf16>, vector<128x8xf32> -> vector<128x8xf32>
    %45 = arith.addf %39, %44 : vector<128x8xf32>
    %c0_40 = arith.constant 0 : index
    %c2 = arith.constant 2 : index
    %c0_41 = arith.constant 0 : index
    %46 = vector.load %arg12[%c0_40, %c2, %c0_41] : memref<10x18x4xbf16, #tpu.memory_space<vmem>>, vector<8x16x4xbf16>
    %47 = vector.shape_cast %46 : vector<8x16x4xbf16> to vector<128x4xbf16>
    %c2_42 = arith.constant 2 : index
    %c0_43 = arith.constant 0 : index
    %c0_44 = arith.constant 0 : index
    %48 = vector.load %arg8[%c2_42, %c0_43, %c0_44] : memref<9x4x8xbf16, #tpu.memory_space<vmem>>, vector<1x4x8xbf16>
    %49 = vector.shape_cast %48 : vector<1x4x8xbf16> to vector<4x8xbf16>
    %cst_45 = arith.constant dense<0.000000e+00> : vector<128x8xf32>
    %50 = tpu.matmul %47, %49, %cst_45 {dimension_numbers = #tpu.dot_dimension_numbers<[1], [0], [0], [1], [0, 0, 1, 1], [], []>} : vector<128x4xbf16>, vector<4x8xbf16>, vector<128x8xf32> -> vector<128x8xf32>
    %51 = arith.addf %45, %50 : vector<128x8xf32>
    %c1_46 = arith.constant 1 : index
    %c0_47 = arith.constant 0 : index
    %c0_48 = arith.constant 0 : index
    %52 = vector.load %arg12[%c1_46, %c0_47, %c0_48] : memref<10x18x4xbf16, #tpu.memory_space<vmem>>, vector<8x16x4xbf16>
    %53 = vector.shape_cast %52 : vector<8x16x4xbf16> to vector<128x4xbf16>
    %c3 = arith.constant 3 : index
    %c0_49 = arith.constant 0 : index
    %c0_50 = arith.constant 0 : index
    %54 = vector.load %arg8[%c3, %c0_49, %c0_50] : memref<9x4x8xbf16, #tpu.memory_space<vmem>>, vector<1x4x8xbf16>
    %55 = vector.shape_cast %54 : vector<1x4x8xbf16> to vector<4x8xbf16>
    %cst_51 = arith.constant dense<0.000000e+00> : vector<128x8xf32>
    %56 = tpu.matmul %53, %55, %cst_51 {dimension_numbers = #tpu.dot_dimension_numbers<[1], [0], [0], [1], [0, 0, 1, 1], [], []>} : vector<128x4xbf16>, vector<4x8xbf16>, vector<128x8xf32> -> vector<128x8xf32>
    %57 = arith.addf %51, %56 : vector<128x8xf32>
    %c1_52 = arith.constant 1 : index
    %c1_53 = arith.constant 1 : index
    %c0_54 = arith.constant 0 : index
    %58 = vector.load %arg12[%c1_52, %c1_53, %c0_54] : memref<10x18x4xbf16, #tpu.memory_space<vmem>>, vector<8x16x4xbf16>
    %59 = vector.shape_cast %58 : vector<8x16x4xbf16> to vector<128x4xbf16>
    %c4 = arith.constant 4 : index
    %c0_55 = arith.constant 0 : index
    %c0_56 = arith.constant 0 : index
    %60 = vector.load %arg8[%c4, %c0_55, %c0_56] : memref<9x4x8xbf16, #tpu.memory_space<vmem>>, vector<1x4x8xbf16>
    %61 = vector.shape_cast %60 : vector<1x4x8xbf16> to vector<4x8xbf16>
    %cst_57 = arith.constant dense<0.000000e+00> : vector<128x8xf32>
    %62 = tpu.matmul %59, %61, %cst_57 {dimension_numbers = #tpu.dot_dimension_numbers<[1], [0], [0], [1], [0, 0, 1, 1], [], []>} : vector<128x4xbf16>, vector<4x8xbf16>, vector<128x8xf32> -> vector<128x8xf32>
    %63 = arith.addf %57, %62 : vector<128x8xf32>
    %c1_58 = arith.constant 1 : index
    %c2_59 = arith.constant 2 : index
    %c0_60 = arith.constant 0 : index
    %64 = vector.load %arg12[%c1_58, %c2_59, %c0_60] : memref<10x18x4xbf16, #tpu.memory_space<vmem>>, vector<8x16x4xbf16>
    %65 = vector.shape_cast %64 : vector<8x16x4xbf16> to vector<128x4xbf16>
    %c5 = arith.constant 5 : index
    %c0_61 = arith.constant 0 : index
    %c0_62 = arith.constant 0 : index
    %66 = vector.load %arg8[%c5, %c0_61, %c0_62] : memref<9x4x8xbf16, #tpu.memory_space<vmem>>, vector<1x4x8xbf16>
    %67 = vector.shape_cast %66 : vector<1x4x8xbf16> to vector<4x8xbf16>
    %cst_63 = arith.constant dense<0.000000e+00> : vector<128x8xf32>
    %68 = tpu.matmul %65, %67, %cst_63 {dimension_numbers = #tpu.dot_dimension_numbers<[1], [0], [0], [1], [0, 0, 1, 1], [], []>} : vector<128x4xbf16>, vector<4x8xbf16>, vector<128x8xf32> -> vector<128x8xf32>
    %69 = arith.addf %63, %68 : vector<128x8xf32>
    %c2_64 = arith.constant 2 : index
    %c0_65 = arith.constant 0 : index
    %c0_66 = arith.constant 0 : index
    %70 = vector.load %arg12[%c2_64, %c0_65, %c0_66] : memref<10x18x4xbf16, #tpu.memory_space<vmem>>, vector<8x16x4xbf16>
    %71 = vector.shape_cast %70 : vector<8x16x4xbf16> to vector<128x4xbf16>
    %c6 = arith.constant 6 : index
    %c0_67 = arith.constant 0 : index
    %c0_68 = arith.constant 0 : index
    %72 = vector.load %arg8[%c6, %c0_67, %c0_68] : memref<9x4x8xbf16, #tpu.memory_space<vmem>>, vector<1x4x8xbf16>
    %73 = vector.shape_cast %72 : vector<1x4x8xbf16> to vector<4x8xbf16>
    %cst_69 = arith.constant dense<0.000000e+00> : vector<128x8xf32>
    %74 = tpu.matmul %71, %73, %cst_69 {dimension_numbers = #tpu.dot_dimension_numbers<[1], [0], [0], [1], [0, 0, 1, 1], [], []>} : vector<128x4xbf16>, vector<4x8xbf16>, vector<128x8xf32> -> vector<128x8xf32>
    %75 = arith.addf %69, %74 : vector<128x8xf32>
    %c2_70 = arith.constant 2 : index
    %c1_71 = arith.constant 1 : index
    %c0_72 = arith.constant 0 : index
    %76 = vector.load %arg12[%c2_70, %c1_71, %c0_72] : memref<10x18x4xbf16, #tpu.memory_space<vmem>>, vector<8x16x4xbf16>
    %77 = vector.shape_cast %76 : vector<8x16x4xbf16> to vector<128x4xbf16>
    %c7 = arith.constant 7 : index
    %c0_73 = arith.constant 0 : index
    %c0_74 = arith.constant 0 : index
    %78 = vector.load %arg8[%c7, %c0_73, %c0_74] : memref<9x4x8xbf16, #tpu.memory_space<vmem>>, vector<1x4x8xbf16>
    %79 = vector.shape_cast %78 : vector<1x4x8xbf16> to vector<4x8xbf16>
    %cst_75 = arith.constant dense<0.000000e+00> : vector<128x8xf32>
    %80 = tpu.matmul %77, %79, %cst_75 {dimension_numbers = #tpu.dot_dimension_numbers<[1], [0], [0], [1], [0, 0, 1, 1], [], []>} : vector<128x4xbf16>, vector<4x8xbf16>, vector<128x8xf32> -> vector<128x8xf32>
    %81 = arith.addf %75, %80 : vector<128x8xf32>
    %c2_76 = arith.constant 2 : index
    %c2_77 = arith.constant 2 : index
    %c0_78 = arith.constant 0 : index
    %82 = vector.load %arg12[%c2_76, %c2_77, %c0_78] : memref<10x18x4xbf16, #tpu.memory_space<vmem>>, vector<8x16x4xbf16>
    %83 = vector.shape_cast %82 : vector<8x16x4xbf16> to vector<128x4xbf16>
    %c8 = arith.constant 8 : index
    %c0_79 = arith.constant 0 : index
    %c0_80 = arith.constant 0 : index
    %84 = vector.load %arg8[%c8, %c0_79, %c0_80] : memref<9x4x8xbf16, #tpu.memory_space<vmem>>, vector<1x4x8xbf16>
    %85 = vector.shape_cast %84 : vector<1x4x8xbf16> to vector<4x8xbf16>
    %cst_81 = arith.constant dense<0.000000e+00> : vector<128x8xf32>
    %86 = tpu.matmul %83, %85, %cst_81 {dimension_numbers = #tpu.dot_dimension_numbers<[1], [0], [0], [1], [0, 0, 1, 1], [], []>} : vector<128x4xbf16>, vector<4x8xbf16>, vector<128x8xf32> -> vector<128x8xf32>
    %87 = arith.addf %81, %86 : vector<128x8xf32>
    %c0_82 = arith.constant 0 : index
    %c0_83 = arith.constant 0 : index
    %88 = vector.load %arg9[%c0_82, %c0_83] : memref<1x8xf32, #tpu.memory_space<vmem>>, vector<1x8xf32>
    %89 = vector.broadcast %88 : vector<1x8xf32> to vector<128x8xf32>
    %90 = arith.mulf %87, %89 : vector<128x8xf32>
    %c0_84 = arith.constant 0 : index
    %c0_85 = arith.constant 0 : index
    %91 = vector.load %arg10[%c0_84, %c0_85] : memref<1x8xf32, #tpu.memory_space<vmem>>, vector<1x8xf32>
    %92 = vector.broadcast %91 : vector<1x8xf32> to vector<128x8xf32>
    %93 = arith.addf %90, %92 : vector<128x8xf32>
    %cst_86 = arith.constant 0.000000e+00 : f32
    %94 = vector.broadcast %cst_86 : f32 to vector<128x8xf32>
    %95 = arith.cmpf oge, %93, %94 : vector<128x8xf32>
    %cst_87 = arith.constant 0.00999999977 : f32
    %96 = vector.broadcast %cst_87 : f32 to vector<128x8xf32>
    %97 = arith.mulf %96, %93 : vector<128x8xf32>
    %98 = arith.select %95, %93, %97 : vector<128x8xi1>, vector<128x8xf32>
    %c0_88 = arith.constant 0 : index
    %c0_89 = arith.constant 0 : index
    %c0_90 = arith.constant 0 : index
    %c0_91 = arith.constant 0 : index
    %99 = vector.load %arg2[%c0_88, %c0_89, %c0_90, %c0_91] : memref<1x8x16x8xf32, #tpu.memory_space<vmem>>, vector<1x8x16x8xf32>
    %100 = vector.shape_cast %99 : vector<1x8x16x8xf32> to vector<128x8xf32>
    %101 = arith.addf %98, %100 : vector<128x8xf32>
    %102 = vector.shape_cast %101 : vector<128x8xf32> to vector<1x8x16x8xf32>
    %c0_92 = arith.constant 0 : index
    %c0_93 = arith.constant 0 : index
    %c0_94 = arith.constant 0 : index
    %c0_95 = arith.constant 0 : index
    %103 = vector.load %arg11[%c0_92, %c0_93, %c0_94, %c0_95] : memref<1x8x16x8xf32, #tpu.memory_space<vmem>>, vector<1x8x16x8xf32>
    tpu.vector_store %arg11[%c0_92, %c0_93, %c0_94, %c0_95], %102 {strides = array<i32>} : memref<1x8x16x8xf32, #tpu.memory_space<vmem>>, vector<1x8x16x8xf32>,
    return
  }
  func.func @transform_0(%arg0: i32, %arg1: i32) -> (i32, i32, i32, i32) {
    %c0_i32 = arith.constant 0 : i32
    %c0_i32_0 = arith.constant 0 : i32
    %c0_i32_1 = arith.constant 0 : i32
    return %arg0, %arg1, %c0_i32, %c0_i32_0 : i32, i32, i32, i32
  }
  func.func @transform_1(%arg0: i32, %arg1: i32) -> (i32, i32, i32, i32) {
    %c8_i32 = arith.constant 8 : i32
    %0 = arith.muli %arg1, %c8_i32 : i32
    %c1_i32 = arith.constant 1 : i32
    %1 = arith.subi %0, %c1_i32 : i32
    %c0_i32 = arith.constant 0 : i32
    %2 = arith.maxsi %1, %c0_i32 : i32
    %c0_i32_0 = arith.constant 0 : i32
    %c0_i32_1 = arith.constant 0 : i32
    %c0_i32_2 = arith.constant 0 : i32
    return %arg0, %2, %c0_i32_0, %c0_i32_1 : i32, i32, i32, i32
  }
  func.func @transform_2(%arg0: i32, %arg1: i32) -> (i32, i32, i32, i32) {
    %c1_i32 = arith.constant 1 : i32
    %0 = arith.addi %arg1, %c1_i32 : i32
    %c8_i32 = arith.constant 8 : i32
    %1 = arith.muli %0, %c8_i32 : i32
    %c15_i32 = arith.constant 15 : i32
    %2 = arith.minsi %1, %c15_i32 : i32
    %c0_i32 = arith.constant 0 : i32
    %c0_i32_0 = arith.constant 0 : i32
    %c0_i32_1 = arith.constant 0 : i32
    return %arg0, %2, %c0_i32, %c0_i32_0 : i32, i32, i32, i32
  }
  func.func @transform_3(%arg0: i32, %arg1: i32) -> (i32, i32) {
    %c0_i32 = arith.constant 0 : i32
    %c0_i32_0 = arith.constant 0 : i32
    %c0_i32_1 = arith.constant 0 : i32
    return %c0_i32, %c0_i32_0 : i32, i32
  }
  func.func @transform_4(%arg0: i32, %arg1: i32) -> (i32, i32) {
    %c0_i32 = arith.constant 0 : i32
    %c0_i32_0 = arith.constant 0 : i32
    %c0_i32_1 = arith.constant 0 : i32
    return %c0_i32, %c0_i32_0 : i32, i32
  }
  func.func @transform_5(%arg0: i32, %arg1: i32) -> (i32, i32) {
    %c0_i32 = arith.constant 0 : i32
    %c0_i32_0 = arith.constant 0 : i32
    %c0_i32_1 = arith.constant 0 : i32
    return %c0_i32, %c0_i32_0 : i32, i32
  }
  func.func @transform_6(%arg0: i32, %arg1: i32) -> (i32, i32, i32) {
    %c0_i32 = arith.constant 0 : i32
    %c0_i32_0 = arith.constant 0 : i32
    %c0_i32_1 = arith.constant 0 : i32
    %c0_i32_2 = arith.constant 0 : i32
    return %c0_i32, %c0_i32_0, %c0_i32_1 : i32, i32, i32
  }
  func.func @transform_7(%arg0: i32, %arg1: i32) -> (i32, i32) {
    %c0_i32 = arith.constant 0 : i32
    %c0_i32_0 = arith.constant 0 : i32
    %c0_i32_1 = arith.constant 0 : i32
    return %c0_i32, %c0_i32_0 : i32, i32
  }
  func.func @transform_8(%arg0: i32, %arg1: i32) -> (i32, i32) {
    %c0_i32 = arith.constant 0 : i32
    %c0_i32_0 = arith.constant 0 : i32
    %c0_i32_1 = arith.constant 0 : i32
    return %c0_i32, %c0_i32_0 : i32, i32
  }
  func.func @transform_9(%arg0: i32, %arg1: i32) -> (i32, i32, i32, i32) {
    %c0_i32 = arith.constant 0 : i32
    %c0_i32_0 = arith.constant 0 : i32
    %c0_i32_1 = arith.constant 0 : i32
    return %arg0, %arg1, %c0_i32, %c0_i32_0 : i32, i32, i32, i32
  }
}

module attributes {stable_mosaic.version = 11 : i64} {
  func.func @resblock_kernel(%arg0: i32, %arg1: i32, %arg2: memref<1x8x16x8xf32, #tpu.memory_space<vmem>>, %arg3: memref<1x1x16x8xf32, #tpu.memory_space<vmem>>, %arg4: memref<1x1x16x8xf32, #tpu.memory_space<vmem>>, %arg5: memref<8x4xbf16, #tpu.memory_space<vmem>>, %arg6: memref<1x4xf32, #tpu.memory_space<vmem>>, %arg7: memref<1x4xf32, #tpu.memory_space<vmem>>, %arg8: memref<9x4x8xbf16, #tpu.memory_space<vmem>>, %arg9: memref<1x8xf32, #tpu.memory_space<vmem>>, %arg10: memref<1x8xf32, #tpu.memory_space<vmem>>, %arg11: memref<1x8x16x8xf32, #tpu.memory_space<vmem>>, %arg12: memref<10x18x4xbf16, #tpu.memory_space<vmem>>) attributes {dimension_semantics = [#tpu.dimension_semantics<parallel>, #tpu.dimension_semantics<parallel>], iteration_bounds = array<i64: 2, 2>, scalar_prefetch = 0 : i64, scratch_operands = 1 : i64, tpu.core_type = #tpu.core_type<tc>, window_params = [{transform_indices = @transform_0, window_bounds = array<i64: 1, 8, 16, 8>}, {transform_indices = @transform_1, window_bounds = array<i64: 1, 1, 16, 8>}, {transform_indices = @transform_2, window_bounds = array<i64: 1, 1, 16, 8>}, {pipeline_mode = #tpu.pipeline_mode<synchronous>, transform_indices = @transform_3, window_bounds = array<i64: 8, 4>}, {pipeline_mode = #tpu.pipeline_mode<synchronous>, transform_indices = @transform_4, window_bounds = array<i64: 1, 4>}, {pipeline_mode = #tpu.pipeline_mode<synchronous>, transform_indices = @transform_5, window_bounds = array<i64: 1, 4>}, {pipeline_mode = #tpu.pipeline_mode<synchronous>, transform_indices = @transform_6, window_bounds = array<i64: 9, 4, 8>}, {pipeline_mode = #tpu.pipeline_mode<synchronous>, transform_indices = @transform_7, window_bounds = array<i64: 1, 8>}, {pipeline_mode = #tpu.pipeline_mode<synchronous>, transform_indices = @transform_8, window_bounds = array<i64: 1, 8>}, {transform_indices = @transform_9, window_bounds = array<i64: 1, 8, 16, 8>}]} {
    %c0 = arith.constant 0 : index
    %c0_0 = arith.constant 0 : index
    %0 = vector.load %arg5[%c0, %c0_0] : memref<8x4xbf16, #tpu.memory_space<vmem>>, vector<8x4xbf16>
    %c0_1 = arith.constant 0 : index
    %c0_2 = arith.constant 0 : index
    %1 = vector.load %arg6[%c0_1, %c0_2] : memref<1x4xf32, #tpu.memory_space<vmem>>, vector<1x4xf32>
    %c0_3 = arith.constant 0 : index
    %c0_4 = arith.constant 0 : index
    %2 = vector.load %arg7[%c0_3, %c0_4] : memref<1x4xf32, #tpu.memory_space<vmem>>, vector<1x4xf32>
    %cst = arith.constant 0.000000e+00 : bf16
    %3 = vector.broadcast %cst : bf16 to vector<10x1x4xbf16>
    %c0_5 = arith.constant 0 : index
    %c0_6 = arith.constant 0 : index
    %c0_7 = arith.constant 0 : index
    %4 = vector.load %arg12[%c0_5, %c0_6, %c0_7] : memref<10x18x4xbf16, #tpu.memory_space<vmem>>, vector<10x1x4xbf16>
    tpu.vector_store %arg12[%c0_5, %c0_6, %c0_7], %3 {strides = array<i32>} : memref<10x18x4xbf16, #tpu.memory_space<vmem>>, vector<10x1x4xbf16>,
    %cst_8 = arith.constant 0.000000e+00 : bf16
    %5 = vector.broadcast %cst_8 : bf16 to vector<10x1x4xbf16>
    %c0_9 = arith.constant 0 : index
    %c17 = arith.constant 17 : index
    %c0_10 = arith.constant 0 : index
    %6 = vector.load %arg12[%c0_9, %c17, %c0_10] : memref<10x18x4xbf16, #tpu.memory_space<vmem>>, vector<10x1x4xbf16>
    tpu.vector_store %arg12[%c0_9, %c17, %c0_10], %5 {strides = array<i32>} : memref<10x18x4xbf16, #tpu.memory_space<vmem>>, vector<10x1x4xbf16>,
    %c0_11 = arith.constant 0 : index
    %c0_12 = arith.constant 0 : index
    %c0_13 = arith.constant 0 : index
    %c0_14 = arith.constant 0 : index
    %7 = vector.load %arg2[%c0_11, %c0_12, %c0_13, %c0_14] : memref<1x8x16x8xf32, #tpu.memory_space<vmem>>, vector<1x8x16x8xf32>
    %8 = vector.shape_cast %7 : vector<1x8x16x8xf32> to vector<128x8xf32>
    %9 = arith.truncf %8 : vector<128x8xf32> to vector<128x8xbf16>
    %cst_15 = arith.constant dense<0.000000e+00> : vector<128x4xf32>
    %10 = tpu.matmul %9, %0, %cst_15 {dimension_numbers = #tpu.dot_dimension_numbers<[1], [0], [0], [1], [0, 0, 1, 1], [], []>} : vector<128x8xbf16>, vector<8x4xbf16>, vector<128x4xf32> -> vector<128x4xf32>
    %11 = vector.broadcast %1 : vector<1x4xf32> to vector<128x4xf32>
    %12 = arith.mulf %10, %11 : vector<128x4xf32>
    %13 = vector.broadcast %2 : vector<1x4xf32> to vector<128x4xf32>
    %14 = arith.addf %12, %13 : vector<128x4xf32>
    %cst_16 = arith.constant 0.000000e+00 : f32
    %15 = vector.broadcast %cst_16 : f32 to vector<128x4xf32>
    %16 = arith.cmpf oge, %14, %15 : vector<128x4xf32>
    %cst_17 = arith.constant 0.00999999977 : f32
    %17 = vector.broadcast %cst_17 : f32 to vector<128x4xf32>
    %18 = arith.mulf %17, %14 : vector<128x4xf32>
    %19 = arith.select %16, %14, %18 : vector<128x4xi1>, vector<128x4xf32>
    %20 = arith.truncf %19 : vector<128x4xf32> to vector<128x4xbf16>
    %21 = vector.shape_cast %20 : vector<128x4xbf16> to vector<8x16x4xbf16>
    %c1 = arith.constant 1 : index
    %c1_18 = arith.constant 1 : index
    %c0_19 = arith.constant 0 : index
    %22 = vector.load %arg12[%c1, %c1_18, %c0_19] : memref<10x18x4xbf16, #tpu.memory_space<vmem>>, vector<8x16x4xbf16>
    tpu.vector_store %arg12[%c1, %c1_18, %c0_19], %21 {strides = array<i32>} : memref<10x18x4xbf16, #tpu.memory_space<vmem>>, vector<8x16x4xbf16>,
    %c0_i32 = arith.constant 0 : i32
    %23 = arith.cmpi sgt, %arg1, %c0_i32 : i32
    %24 = arith.extui %23 : i1 to i32
    %c0_i32_20 = arith.constant 0 : i32
    %25 = arith.cmpi ne, %24, %c0_i32_20 : i32
    scf.if %25 {
      %c0_96 = arith.constant 0 : index
      %c0_97 = arith.constant 0 : index
      %c0_98 = arith.constant 0 : index
      %c0_99 = arith.constant 0 : index
      %104 = vector.load %arg3[%c0_96, %c0_97, %c0_98, %c0_99] : memref<1x1x16x8xf32, #tpu.memory_space<vmem>>, vector<1x1x16x8xf32>
      %105 = vector.shape_cast %104 : vector<1x1x16x8xf32> to vector<16x8xf32>
      %106 = arith.truncf %105 : vector<16x8xf32> to vector<16x8xbf16>
      %cst_100 = arith.constant dense<0.000000e+00> : vector<16x4xf32>
      %107 = tpu.matmul %106, %0, %cst_100 {dimension_numbers = #tpu.dot_dimension_numbers<[1], [0], [0], [1], [0, 0, 1, 1], [], []>} : vector<16x8xbf16>, vector<8x4xbf16>, vector<16x4xf32> -> vector<16x4xf32>
      %108 = vector.broadcast %1 : vector<1x4xf32> to vector<16x4xf32>
      %109 = arith.mulf %107, %108 : vector<16x4xf32>
      %110 = vector.broadcast %2 : vector<1x4xf32> to vector<16x4xf32>
      %111 = arith.addf %109, %110 : vector<16x4xf32>
      %cst_101 = arith.constant 0.000000e+00 : f32
      %112 = vector.broadcast %cst_101 : f32 to vector<16x4xf32>
      %113 = arith.cmpf oge, %111, %112 : vector<16x4xf32>
      %cst_102 = arith.constant 0.00999999977 : f32
      %114 = vector.broadcast %cst_102 : f32 to vector<16x4xf32>
      %115 = arith.mulf %114, %111 : vector<16x4xf32>
      %116 = arith.select %113, %111, %115 : vector<16x4xi1>, vector<16x4xf32>
      %117 = arith.truncf %116 : vector<16x4xf32> to vector<16x4xbf16>
      %118 = vector.shape_cast %117 : vector<16x4xbf16> to vector<1x16x4xbf16>
      %c0_103 = arith.constant 0 : index
      %c1_104 = arith.constant 1 : index
      %c0_105 = arith.constant 0 : index
      %119 = vector.load %arg12[%c0_103, %c1_104, %c0_105] : memref<10x18x4xbf16, #tpu.memory_space<vmem>>, vector<1x16x4xbf16>
      tpu.vector_store %arg12[%c0_103, %c1_104, %c0_105], %118 {strides = array<i32>} : memref<10x18x4xbf16, #tpu.memory_space<vmem>>, vector<1x16x4xbf16>,
    } else {
    }
    %c0_i32_21 = arith.constant 0 : i32
    %26 = arith.cmpi eq, %arg1, %c0_i32_21 : i32
    %27 = arith.extui %26 : i1 to i32
    %c0_i32_22 = arith.constant 0 : i32
    %28 = arith.cmpi ne, %27, %c0_i32_22 : i32
    scf.if %28 {
      %cst_96 = arith.constant 0.000000e+00 : bf16
      %104 = vector.broadcast %cst_96 : bf16 to vector<1x16x4xbf16>
      %c0_97 = arith.constant 0 : index
      %c1_98 = arith.constant 1 : index
      %c0_99 = arith.constant 0 : index
      %105 = vector.load %arg12[%c0_97, %c1_98, %c0_99] : memref<10x18x4xbf16, #tpu.memory_space<vmem>>, vector<1x16x4xbf16>
      tpu.vector_store %arg12[%c0_97, %c1_98, %c0_99], %104 {strides = array<i32>} : memref<10x18x4xbf16, #tpu.memory_space<vmem>>, vector<1x16x4xbf16>,
    } else {
    }
    %c1_i32 = arith.constant 1 : i32
    %29 = arith.cmpi slt, %arg1, %c1_i32 : i32
    %30 = arith.extui %29 : i1 to i32
    %c0_i32_23 = arith.constant 0 : i32
    %31 = arith.cmpi ne, %30, %c0_i32_23 : i32
    scf.if %31 {
      %c0_96 = arith.constant 0 : index
      %c0_97 = arith.constant 0 : index
      %c0_98 = arith.constant 0 : index
      %c0_99 = arith.constant 0 : index
      %104 = vector.load %arg4[%c0_96, %c0_97, %c0_98, %c0_99] : memref<1x1x16x8xf32, #tpu.memory_space<vmem>>, vector<1x1x16x8xf32>
      %105 = vector.shape_cast %104 : vector<1x1x16x8xf32> to vector<16x8xf32>
      %106 = arith.truncf %105 : vector<16x8xf32> to vector<16x8xbf16>
      %cst_100 = arith.constant dense<0.000000e+00> : vector<16x4xf32>
      %107 = tpu.matmul %106, %0, %cst_100 {dimension_numbers = #tpu.dot_dimension_numbers<[1], [0], [0], [1], [0, 0, 1, 1], [], []>} : vector<16x8xbf16>, vector<8x4xbf16>, vector<16x4xf32> -> vector<16x4xf32>
      %108 = vector.broadcast %1 : vector<1x4xf32> to vector<16x4xf32>
      %109 = arith.mulf %107, %108 : vector<16x4xf32>
      %110 = vector.broadcast %2 : vector<1x4xf32> to vector<16x4xf32>
      %111 = arith.addf %109, %110 : vector<16x4xf32>
      %cst_101 = arith.constant 0.000000e+00 : f32
      %112 = vector.broadcast %cst_101 : f32 to vector<16x4xf32>
      %113 = arith.cmpf oge, %111, %112 : vector<16x4xf32>
      %cst_102 = arith.constant 0.00999999977 : f32
      %114 = vector.broadcast %cst_102 : f32 to vector<16x4xf32>
      %115 = arith.mulf %114, %111 : vector<16x4xf32>
      %116 = arith.select %113, %111, %115 : vector<16x4xi1>, vector<16x4xf32>
      %117 = arith.truncf %116 : vector<16x4xf32> to vector<16x4xbf16>
      %118 = vector.shape_cast %117 : vector<16x4xbf16> to vector<1x16x4xbf16>
      %c9 = arith.constant 9 : index
      %c1_103 = arith.constant 1 : index
      %c0_104 = arith.constant 0 : index
      %119 = vector.load %arg12[%c9, %c1_103, %c0_104] : memref<10x18x4xbf16, #tpu.memory_space<vmem>>, vector<1x16x4xbf16>
      tpu.vector_store %arg12[%c9, %c1_103, %c0_104], %118 {strides = array<i32>} : memref<10x18x4xbf16, #tpu.memory_space<vmem>>, vector<1x16x4xbf16>,
    } else {
    }
    %c1_i32_24 = arith.constant 1 : i32
    %32 = arith.cmpi eq, %arg1, %c1_i32_24 : i32
    %33 = arith.extui %32 : i1 to i32
    %c0_i32_25 = arith.constant 0 : i32
    %34 = arith.cmpi ne, %33, %c0_i32_25 : i32
    scf.if %34 {
      %cst_96 = arith.constant 0.000000e+00 : bf16
      %104 = vector.broadcast %cst_96 : bf16 to vector<1x16x4xbf16>
      %c9 = arith.constant 9 : index
      %c1_97 = arith.constant 1 : index
      %c0_98 = arith.constant 0 : index
      %105 = vector.load %arg12[%c9, %c1_97, %c0_98] : memref<10x18x4xbf16, #tpu.memory_space<vmem>>, vector<1x16x4xbf16>
      tpu.vector_store %arg12[%c9, %c1_97, %c0_98], %104 {strides = array<i32>} : memref<10x18x4xbf16, #tpu.memory_space<vmem>>, vector<1x16x4xbf16>,
    } else {
    }
    %c0_26 = arith.constant 0 : index
    %c0_27 = arith.constant 0 : index
    %c0_28 = arith.constant 0 : index
    %35 = vector.load %arg12[%c0_26, %c0_27, %c0_28] : memref<10x18x4xbf16, #tpu.memory_space<vmem>>, vector<8x16x4xbf16>
    %36 = vector.shape_cast %35 : vector<8x16x4xbf16> to vector<128x4xbf16>
    %c0_29 = arith.constant 0 : index
    %c0_30 = arith.constant 0 : index
    %c0_31 = arith.constant 0 : index
    %37 = vector.load %arg8[%c0_29, %c0_30, %c0_31] : memref<9x4x8xbf16, #tpu.memory_space<vmem>>, vector<1x4x8xbf16>
    %38 = vector.shape_cast %37 : vector<1x4x8xbf16> to vector<4x8xbf16>
    %cst_32 = arith.constant dense<0.000000e+00> : vector<128x8xf32>
    %39 = tpu.matmul %36, %38, %cst_32 {dimension_numbers = #tpu.dot_dimension_numbers<[1], [0], [0], [1], [0, 0, 1, 1], [], []>} : vector<128x4xbf16>, vector<4x8xbf16>, vector<128x8xf32> -> vector<128x8xf32>
    %c0_33 = arith.constant 0 : index
    %c1_34 = arith.constant 1 : index
    %c0_35 = arith.constant 0 : index
    %40 = vector.load %arg12[%c0_33, %c1_34, %c0_35] : memref<10x18x4xbf16, #tpu.memory_space<vmem>>, vector<8x16x4xbf16>
    %41 = vector.shape_cast %40 : vector<8x16x4xbf16> to vector<128x4xbf16>
    %c1_36 = arith.constant 1 : index
    %c0_37 = arith.constant 0 : index
    %c0_38 = arith.constant 0 : index
    %42 = vector.load %arg8[%c1_36, %c0_37, %c0_38] : memref<9x4x8xbf16, #tpu.memory_space<vmem>>, vector<1x4x8xbf16>
    %43 = vector.shape_cast %42 : vector<1x4x8xbf16> to vector<4x8xbf16>
    %cst_39 = arith.constant dense<0.000000e+00> : vector<128x8xf32>
    %44 = tpu.matmul %41, %43, %cst_39 {dimension_numbers = #tpu.dot_dimension_numbers<[1], [0], [0], [1], [0, 0, 1, 1], [], []>} : vector<128x4xbf16>, vector<4x8xbf16>, vector<128x8xf32> -> vector<128x8xf32>
    %45 = arith.addf %39, %44 : vector<128x8xf32>
    %c0_40 = arith.constant 0 : index
    %c2 = arith.constant 2 : index
    %c0_41 = arith.constant 0 : index
    %46 = vector.load %arg12[%c0_40, %c2, %c0_41] : memref<10x18x4xbf16, #tpu.memory_space<vmem>>, vector<8x16x4xbf16>
    %47 = vector.shape_cast %46 : vector<8x16x4xbf16> to vector<128x4xbf16>
    %c2_42 = arith.constant 2 : index
    %c0_43 = arith.constant 0 : index
    %c0_44 = arith.constant 0 : index
    %48 = vector.load %arg8[%c2_42, %c0_43, %c0_44] : memref<9x4x8xbf16, #tpu.memory_space<vmem>>, vector<1x4x8xbf16>
    %49 = vector.shape_cast %48 : vector<1x4x8xbf16> to vector<4x8xbf16>
    %cst_45 = arith.constant dense<0.000000e+00> : vector<128x8xf32>
    %50 = tpu.matmul %47, %49, %cst_45 {dimension_numbers = #tpu.dot_dimension_numbers<[1], [0], [0], [1], [0, 0, 1, 1], [], []>} : vector<128x4xbf16>, vector<4x8xbf16>, vector<128x8xf32> -> vector<128x8xf32>
    %51 = arith.addf %45, %50 : vector<128x8xf32>
    %c1_46 = arith.constant 1 : index
    %c0_47 = arith.constant 0 : index
    %c0_48 = arith.constant 0 : index
    %52 = vector.load %arg12[%c1_46, %c0_47, %c0_48] : memref<10x18x4xbf16, #tpu.memory_space<vmem>>, vector<8x16x4xbf16>
    %53 = vector.shape_cast %52 : vector<8x16x4xbf16> to vector<128x4xbf16>
    %c3 = arith.constant 3 : index
    %c0_49 = arith.constant 0 : index
    %c0_50 = arith.constant 0 : index
    %54 = vector.load %arg8[%c3, %c0_49, %c0_50] : memref<9x4x8xbf16, #tpu.memory_space<vmem>>, vector<1x4x8xbf16>
    %55 = vector.shape_cast %54 : vector<1x4x8xbf16> to vector<4x8xbf16>
    %cst_51 = arith.constant dense<0.000000e+00> : vector<128x8xf32>
    %56 = tpu.matmul %53, %55, %cst_51 {dimension_numbers = #tpu.dot_dimension_numbers<[1], [0], [0], [1], [0, 0, 1, 1], [], []>} : vector<128x4xbf16>, vector<4x8xbf16>, vector<128x8xf32> -> vector<128x8xf32>
    %57 = arith.addf %51, %56 : vector<128x8xf32>
    %c1_52 = arith.constant 1 : index
    %c1_53 = arith.constant 1 : index
    %c0_54 = arith.constant 0 : index
    %58 = vector.load %arg12[%c1_52, %c1_53, %c0_54] : memref<10x18x4xbf16, #tpu.memory_space<vmem>>, vector<8x16x4xbf16>
    %59 = vector.shape_cast %58 : vector<8x16x4xbf16> to vector<128x4xbf16>
    %c4 = arith.constant 4 : index
    %c0_55 = arith.constant 0 : index
    %c0_56 = arith.constant 0 : index
    %60 = vector.load %arg8[%c4, %c0_55, %c0_56] : memref<9x4x8xbf16, #tpu.memory_space<vmem>>, vector<1x4x8xbf16>
    %61 = vector.shape_cast %60 : vector<1x4x8xbf16> to vector<4x8xbf16>
    %cst_57 = arith.constant dense<0.000000e+00> : vector<128x8xf32>
    %62 = tpu.matmul %59, %61, %cst_57 {dimension_numbers = #tpu.dot_dimension_numbers<[1], [0], [0], [1], [0, 0, 1, 1], [], []>} : vector<128x4xbf16>, vector<4x8xbf16>, vector<128x8xf32> -> vector<128x8xf32>
    %63 = arith.addf %57, %62 : vector<128x8xf32>
    %c1_58 = arith.constant 1 : index
    %c2_59 = arith.constant 2 : index
    %c0_60 = arith.constant 0 : index
    %64 = vector.load %arg12[%c1_58, %c2_59, %c0_60] : memref<10x18x4xbf16, #tpu.memory_space<vmem>>, vector<8x16x4xbf16>
    %65 = vector.shape_cast %64 : vector<8x16x4xbf16> to vector<128x4xbf16>
    %c5 = arith.constant 5 : index
    %c0_61 = arith.constant 0 : index
    %c0_62 = arith.constant 0 : index
    %66 = vector.load %arg8[%c5, %c0_61, %c0_62] : memref<9x4x8xbf16, #tpu.memory_space<vmem>>, vector<1x4x8xbf16>
    %67 = vector.shape_cast %66 : vector<1x4x8xbf16> to vector<4x8xbf16>
    %cst_63 = arith.constant dense<0.000000e+00> : vector<128x8xf32>
    %68 = tpu.matmul %65, %67, %cst_63 {dimension_numbers = #tpu.dot_dimension_numbers<[1], [0], [0], [1], [0, 0, 1, 1], [], []>} : vector<128x4xbf16>, vector<4x8xbf16>, vector<128x8xf32> -> vector<128x8xf32>
    %69 = arith.addf %63, %68 : vector<128x8xf32>
    %c2_64 = arith.constant 2 : index
    %c0_65 = arith.constant 0 : index
    %c0_66 = arith.constant 0 : index
    %70 = vector.load %arg12[%c2_64, %c0_65, %c0_66] : memref<10x18x4xbf16, #tpu.memory_space<vmem>>, vector<8x16x4xbf16>
    %71 = vector.shape_cast %70 : vector<8x16x4xbf16> to vector<128x4xbf16>
    %c6 = arith.constant 6 : index
    %c0_67 = arith.constant 0 : index
    %c0_68 = arith.constant 0 : index
    %72 = vector.load %arg8[%c6, %c0_67, %c0_68] : memref<9x4x8xbf16, #tpu.memory_space<vmem>>, vector<1x4x8xbf16>
    %73 = vector.shape_cast %72 : vector<1x4x8xbf16> to vector<4x8xbf16>
    %cst_69 = arith.constant dense<0.000000e+00> : vector<128x8xf32>
    %74 = tpu.matmul %71, %73, %cst_69 {dimension_numbers = #tpu.dot_dimension_numbers<[1], [0], [0], [1], [0, 0, 1, 1], [], []>} : vector<128x4xbf16>, vector<4x8xbf16>, vector<128x8xf32> -> vector<128x8xf32>
    %75 = arith.addf %69, %74 : vector<128x8xf32>
    %c2_70 = arith.constant 2 : index
    %c1_71 = arith.constant 1 : index
    %c0_72 = arith.constant 0 : index
    %76 = vector.load %arg12[%c2_70, %c1_71, %c0_72] : memref<10x18x4xbf16, #tpu.memory_space<vmem>>, vector<8x16x4xbf16>
    %77 = vector.shape_cast %76 : vector<8x16x4xbf16> to vector<128x4xbf16>
    %c7 = arith.constant 7 : index
    %c0_73 = arith.constant 0 : index
    %c0_74 = arith.constant 0 : index
    %78 = vector.load %arg8[%c7, %c0_73, %c0_74] : memref<9x4x8xbf16, #tpu.memory_space<vmem>>, vector<1x4x8xbf16>
    %79 = vector.shape_cast %78 : vector<1x4x8xbf16> to vector<4x8xbf16>
    %cst_75 = arith.constant dense<0.000000e+00> : vector<128x8xf32>
    %80 = tpu.matmul %77, %79, %cst_75 {dimension_numbers = #tpu.dot_dimension_numbers<[1], [0], [0], [1], [0, 0, 1, 1], [], []>} : vector<128x4xbf16>, vector<4x8xbf16>, vector<128x8xf32> -> vector<128x8xf32>
    %81 = arith.addf %75, %80 : vector<128x8xf32>
    %c2_76 = arith.constant 2 : index
    %c2_77 = arith.constant 2 : index
    %c0_78 = arith.constant 0 : index
    %82 = vector.load %arg12[%c2_76, %c2_77, %c0_78] : memref<10x18x4xbf16, #tpu.memory_space<vmem>>, vector<8x16x4xbf16>
    %83 = vector.shape_cast %82 : vector<8x16x4xbf16> to vector<128x4xbf16>
    %c8 = arith.constant 8 : index
    %c0_79 = arith.constant 0 : index
    %c0_80 = arith.constant 0 : index
    %84 = vector.load %arg8[%c8, %c0_79, %c0_80] : memref<9x4x8xbf16, #tpu.memory_space<vmem>>, vector<1x4x8xbf16>
    %85 = vector.shape_cast %84 : vector<1x4x8xbf16> to vector<4x8xbf16>
    %cst_81 = arith.constant dense<0.000000e+00> : vector<128x8xf32>
    %86 = tpu.matmul %83, %85, %cst_81 {dimension_numbers = #tpu.dot_dimension_numbers<[1], [0], [0], [1], [0, 0, 1, 1], [], []>} : vector<128x4xbf16>, vector<4x8xbf16>, vector<128x8xf32> -> vector<128x8xf32>
    %87 = arith.addf %81, %86 : vector<128x8xf32>
    %c0_82 = arith.constant 0 : index
    %c0_83 = arith.constant 0 : index
    %88 = vector.load %arg9[%c0_82, %c0_83] : memref<1x8xf32, #tpu.memory_space<vmem>>, vector<1x8xf32>
    %89 = vector.broadcast %88 : vector<1x8xf32> to vector<128x8xf32>
    %90 = arith.mulf %87, %89 : vector<128x8xf32>
    %c0_84 = arith.constant 0 : index
    %c0_85 = arith.constant 0 : index
    %91 = vector.load %arg10[%c0_84, %c0_85] : memref<1x8xf32, #tpu.memory_space<vmem>>, vector<1x8xf32>
    %92 = vector.broadcast %91 : vector<1x8xf32> to vector<128x8xf32>
    %93 = arith.addf %90, %92 : vector<128x8xf32>
    %cst_86 = arith.constant 0.000000e+00 : f32
    %94 = vector.broadcast %cst_86 : f32 to vector<128x8xf32>
    %95 = arith.cmpf oge, %93, %94 : vector<128x8xf32>
    %cst_87 = arith.constant 0.00999999977 : f32
    %96 = vector.broadcast %cst_87 : f32 to vector<128x8xf32>
    %97 = arith.mulf %96, %93 : vector<128x8xf32>
    %98 = arith.select %95, %93, %97 : vector<128x8xi1>, vector<128x8xf32>
    %c0_88 = arith.constant 0 : index
    %c0_89 = arith.constant 0 : index
    %c0_90 = arith.constant 0 : index
    %c0_91 = arith.constant 0 : index
    %99 = vector.load %arg2[%c0_88, %c0_89, %c0_90, %c0_91] : memref<1x8x16x8xf32, #tpu.memory_space<vmem>>, vector<1x8x16x8xf32>
    %100 = vector.shape_cast %99 : vector<1x8x16x8xf32> to vector<128x8xf32>
    %101 = arith.addf %98, %100 : vector<128x8xf32>
    %102 = vector.shape_cast %101 : vector<128x8xf32> to vector<1x8x16x8xf32>
    %c0_92 = arith.constant 0 : index
    %c0_93 = arith.constant 0 : index
    %c0_94 = arith.constant 0 : index
    %c0_95 = arith.constant 0 : index
    %103 = vector.load %arg11[%c0_92, %c0_93, %c0_94, %c0_95] : memref<1x8x16x8xf32, #tpu.memory_space<vmem>>, vector<1x8x16x8xf32>
    tpu.vector_store %arg11[%c0_92, %c0_93, %c0_94, %c0_95], %102 {strides = array<i32>} : memref<1x8x16x8xf32, #tpu.memory_space<vmem>>, vector<1x8x16x8xf32>,
    return
  }
  func.func @transform_0(%arg0: i32, %arg1: i32) -> (i32, i32, i32, i32) {
    %c0_i32 = arith.constant 0 : i32
    %c0_i32_0 = arith.constant 0 : i32
    %c0_i32_1 = arith.constant 0 : i32
    return %arg0, %arg1, %c0_i32, %c0_i32_0 : i32, i32, i32, i32
  }
  func.func @transform_1(%arg0: i32, %arg1: i32) -> (i32, i32, i32, i32) {
    %c8_i32 = arith.constant 8 : i32
    %0 = arith.muli %arg1, %c8_i32 : i32
    %c1_i32 = arith.constant 1 : i32
    %1 = arith.subi %0, %c1_i32 : i32
    %c0_i32 = arith.constant 0 : i32
    %2 = arith.maxsi %1, %c0_i32 : i32
    %c0_i32_0 = arith.constant 0 : i32
    %c0_i32_1 = arith.constant 0 : i32
    %c0_i32_2 = arith.constant 0 : i32
    return %arg0, %2, %c0_i32_0, %c0_i32_1 : i32, i32, i32, i32
  }
  func.func @transform_2(%arg0: i32, %arg1: i32) -> (i32, i32, i32, i32) {
    %c1_i32 = arith.constant 1 : i32
    %0 = arith.addi %arg1, %c1_i32 : i32
    %c8_i32 = arith.constant 8 : i32
    %1 = arith.muli %0, %c8_i32 : i32
    %c15_i32 = arith.constant 15 : i32
    %2 = arith.minsi %1, %c15_i32 : i32
    %c0_i32 = arith.constant 0 : i32
    %c0_i32_0 = arith.constant 0 : i32
    %c0_i32_1 = arith.constant 0 : i32
    return %arg0, %2, %c0_i32, %c0_i32_0 : i32, i32, i32, i32
  }
  func.func @transform_3(%arg0: i32, %arg1: i32) -> (i32, i32) {
    %c0_i32 = arith.constant 0 : i32
    %c0_i32_0 = arith.constant 0 : i32
    %c0_i32_1 = arith.constant 0 : i32
    return %c0_i32, %c0_i32_0 : i32, i32
  }
  func.func @transform_4(%arg0: i32, %arg1: i32) -> (i32, i32) {
    %c0_i32 = arith.constant 0 : i32
    %c0_i32_0 = arith.constant 0 : i32
    %c0_i32_1 = arith.constant 0 : i32
    return %c0_i32, %c0_i32_0 : i32, i32
  }
  func.func @transform_5(%arg0: i32, %arg1: i32) -> (i32, i32) {
    %c0_i32 = arith.constant 0 : i32
    %c0_i32_0 = arith.constant 0 : i32
    %c0_i32_1 = arith.constant 0 : i32
    return %c0_i32, %c0_i32_0 : i32, i32
  }
  func.func @transform_6(%arg0: i32, %arg1: i32) -> (i32, i32, i32) {
    %c0_i32 = arith.constant 0 : i32
    %c0_i32_0 = arith.constant 0 : i32
    %c0_i32_1 = arith.constant 0 : i32
    %c0_i32_2 = arith.constant 0 : i32
    return %c0_i32, %c0_i32_0, %c0_i32_1 : i32, i32, i32
  }
  func.func @transform_7(%arg0: i32, %arg1: i32) -> (i32, i32) {
    %c0_i32 = arith.constant 0 : i32
    %c0_i32_0 = arith.constant 0 : i32
    %c0_i32_1 = arith.constant 0 : i32
    return %c0_i32, %c0_i32_0 : i32, i32
  }
  func.func @transform_8(%arg0: i32, %arg1: i32) -> (i32, i32) {
    %c0_i32 = arith.constant 0 : i32
    %c0_i32_0 = arith.constant 0 : i32
    %c0_i32_1 = arith.constant 0 : i32
    return %c0_i32, %c0_i32_0 : i32, i32
  }
  func.func @transform_9(%arg0: i32, %arg1: i32) -> (i32, i32, i32, i32) {
    %c0_i32 = arith.constant 0 : i32
    %c0_i32_0 = arith.constant 0 : i32
    %c0_i32_1 = arith.constant 0 : i32
    return %arg0, %arg1, %c0_i32, %c0_i32_0 : i32, i32, i32, i32
  }
}

</mosaic_0001>

<bundles_post_ra>
// kernel: resblock_pallas.1
= control target key start
LH: loop header
LB: loop body
LE: loop exit
PB: predicated region body
PF: predicated region fallthrough
CT: control target
= control target key end

     0   :  { %s4908_s30 = smov 0   ;;  %s4910_s10 = smov 0   ;;  %s6121_s0 = inlined_call_operand.vmem [shape: f32[2,16,16,8], index: 0, kind: input, shape index: {}, may-alias: {0,1,2}]   ;;  %s6122_s1 = inlined_call_operand.vmem [shape: f32[2,16,16,8], index: 1, kind: input, shape index: {}, may-alias: {0,1,2}]   ;;  %s6123_s2 = inlined_call_operand.vmem [shape: f32[2,16,16,8], index: 2, kind: input, shape index: {}, may-alias: {0,1,2}]   ;;  %s6124_s3 = inlined_call_operand.vmem [shape: bf16[8,4], index: 3, kind: input, shape index: {}]   ;;  %s6125_s4 = inlined_call_operand.vmem [shape: f32[1,4], index: 4, kind: input, shape index: {}]   ;;  %s6126_s5 = inlined_call_operand.vmem [shape: f32[1,4], index: 5, kind: input, shape index: {}]   ;;  %s6127_s6 = inlined_call_operand.vmem [shape: bf16[9,4,8], index: 6, kind: input, shape index: {}]   ;;  %s6128_s7 = inlined_call_operand.vmem [shape: f32[1,8], index: 7, kind: input, shape index: {}]   ;;  %s6129_s8 = inlined_call_operand.vmem [shape: f32[1,8], index: 8, kind: input, shape index: {}]   ;;  %s6130_s9 = inlined_call_operand.vmem [shape: f32[2,16,16,8], index: 9, kind: output, shape index: {}]  }
   0x1   :  { %s4912_s11 = smov 0   ;;  %s4914_s12 = smov 0  }
   0x2   :  { %s4916_s13 = smov 0  }
   0x3 LB: > { %s28_s14 = sadd.s32 1, %s4842_s11  ;;  %s31_s15 = sadd.s32 1, %s4846_s12  ;;  %s4850_s13 = sphi %s4916_s13, %s19_s13   ;;  %s4846_s12 = sphi %s4914_s12, %s6164_s12   ;;  %s4842_s11 = sphi %s4912_s11, %s6163_s11   ;;  %s4838_s10 = sphi %s4910_s10, %s6162_s10   ;;  %s4834_s30 = sphi %s4908_s30, %s6161_s30  }
   0x4   : > { %p29_p0 = scmp.ge.s32.totalorder %s28_s14, 2  ;;  %p4041_p1 = scmp.ge.s32.totalorder %s4850_s13, 1 }
   0x5   : > { %p373_p2 = scmp.lt.s32.totalorder %s4850_s13, 5 }
   0x6   : > { %s6166_s14 = smov (%p29_p0, %s28_s14), 0  ;;  %s6168_s15 = smov (!%p29_p0, %s31_s15), %s4846_s12 }
   0x7   : > { %p374_p3 = pnand %p4041_p1, %p373_p2  ;;  %p33_p4 = scmp.ge.s32.totalorder %s6168_s15, 2 }
   0x9   : > { %s6170_s15 = smov (%p33_p4, %s6168_s15), 0  ;;  %377 = sbr.rel (%p374_p3) target bundleno = 1185 (0x4a1), region = 56 }
  0x10   : > { %v502_v0 = vld [vmem:[%s6124_s3] sm:$0xf]  ;;  %vm619_vm0 = vcmask 1043456   ;;  %s4944_s18 = sshll.u32 %s4834_s30, 3  ;;  %p446_p5 = scmp.lt.s32.totalorder %s4838_s10, 1  ;;  %vm505_vm1 = vcmask 24576  }
  0x11   : > { %4729 = vmatprep.subr.msk.bf16.mxu0 %vm619_vm0, %v502_v0  ;;  %4730 = vmatprep.subr.msk.bf16.mxu1 %vm619_vm0, %v502_v0  ;;  %v4946_v1 = vsel %vm619_vm0, %v502_v0, 0  ;;  %p448_p6 = scmp.lt.s32.totalorder %s4944_s18, 15  ;;  %s4950_s19 = sadd.s32 4294967295, %s4944_s18  ;;  %vm506_vm2 = vsmask.f32 256  ;;  %vm594_vm6 = vcmask 64512  }
  0x12   : > { %4406 = vmatpush3.bf16.msra.mxu0 %v4946_v1  ;;  %4598 = vmatpush3.bf16.msra.mxu1 %v4946_v1  ;;  %s6172_s10 = smov (!%p446_p5, %s4838_s10), 1  ;;  %vm4957_vm3 = vmand %vm505_vm1, %vm506_vm2  ;;  %v508_v3 = vld [vmem:[#allocation2] sm:$0x1]  ;;  %v514_v4 = vld [vmem:[#allocation2 + $0x18] sm:$0x1]  ;;  %p458_p7 = scmp.gt.s32.totalorder %s4950_s19, 0 }
  0x13   : > { %s449_s20 = scalar_select %p448_p6, %s4944_s18, 15  ;;  %v509_v5 = vsel %vm4957_vm3, 0, %v508_v3  ;;  %v515_v6 = vsel %vm4957_vm3, 0, %v514_v4  ;;  %v535_v7 = vld [vmem:[#allocation2 + $0x6c] sm:$0x1]  ;;  %vm1023_vm7 = vcmask 27648  }
  0x14   : > { %s4961_s21 = sshll.u32 %s6172_s10, 5  ;;  %p4048_p8 = scmp.lt.s32.totalorder %s4950_s19, 15  ;;  %510 = vst [vmem:[#allocation2] sm:$0x1] %v509_v5  ;;  %516 = vst [vmem:[#allocation2 + $0x18] sm:$0x1] %v515_v6 }
  0x15   : > { %s4043_s22 = sshll.u32 %s449_s20, 1  ;;  %v536_v8 = vsel %vm4957_vm3, 0, %v535_v7  ;;  %vm538_vm4 = vsmask.f32 7938  ;;  %s4290_s24 = sadd.s32 8, %s4944_s18 }
  0x16   : > { %s452_s23 = sadd.s32 %s4961_s21, %s4043_s22  ;;  %537 = vst [vmem:[#allocation2 + $0x6c] sm:$0x1] %v536_v8  ;;  %vm4975_vm5 = vmand %vm505_vm1, %vm538_vm4  ;;  %v540_v10 = vld [vmem:[#allocation2 + $0x8] sm:$0x1]  ;;  %v567_v11 = vld [vmem:[#allocation2 + $0x74] sm:$0x1] }
  0x17   : > { %s4045_s25 = sshll.u32 %s452_s23, 3  ;;  %p4979_p9 = scmp.lt.s32.totalorder %s4290_s24, 15  ;;  %v541_v12 = vsel %vm4975_vm5, 0, %v540_v10  ;;  %v568_v13 = vsel %vm4975_vm5, 0, %v567_v11  ;;  %v526_v38 = vld [vmem:[#allocation2 + $0x48] sm:$0x1]  ;;  %vm5111_vm14 = vmand %vm1023_vm7, %vm538_vm4 }
  0x18   : > { %s4990_s29 = scalar_lea.vmem %s6121_s0, %s4045_s25  ;;  %s4995_s17 = scalar_lea.vmem %s6130_s9, %s4045_s25  ;;  %542 = vst [vmem:[#allocation2 + $0x8] sm:$0x1] %v541_v12  ;;  %569 = vst [vmem:[#allocation2 + $0x74] sm:$0x1] %v568_v13  ;;  %v527_v39 = vsel %vm4957_vm3, 0, %v526_v38 }
  0x19   : > { %s459_s18 = scalar_select %p458_p7, %s4950_s19, 0  ;;  %v570_v14 = vld [vmem:[%s4990_s29] sm:$0xff]  ;;  %v571_v15 = vld [vmem:[%s4990_s29 + $0x8] sm:$0xff]  ;;  %v572_v19 = vld [vmem:[%s4990_s29 + $0x10] sm:$0xff]  ;;  %528 = vst [vmem:[#allocation2 + $0x48] sm:$0x1] %v527_v39 }
  0x1a   : > { %v578_v16 = vld [vmem:[%s4990_s29 + $0x40] sm:$0xff]  ;;  %s6174_s24 = smov (!%p4979_p9, %s4290_s24), 15  ;;  %v586_v17 = vpack.c.bf16 %v571_v15, %v570_v14  ;;  %v579_v18 = vld [vmem:[%s4990_s29 + $0x48] sm:$0xff]  ;;  %v573_v20 = vld [vmem:[%s4990_s29 + $0x18] sm:$0xff]  ;;  %vm860_vm13 = vsmask.f32 4368 }
  0x1b   : > { %s6176_s18 = smov (!%p4048_p8, %s459_s18), 15  ;;  %v590_v21 = vpack.c.bf16 %v579_v18, %v578_v16  ;;  %v587_v22 = vpack.c.bf16 %v573_v20, %v572_v19  ;;  %v580_v23 = vld [vmem:[%s4990_s29 + $0x50] sm:$0xff]  ;;  %v581_v24 = vld [vmem:[%s4990_s29 + $0x58] sm:$0xff]  ;;  %v574_v25 = vld [vmem:[%s4990_s29 + $0x20] sm:$0xff]  ;;  %s6178_s24 = smov (!%p4979_p9, %s6174_s24), 15 }
  0x1c   : > { %4407 = vmatprep.mubr.msk.bf16.mxu0 %vm594_vm6, %v586_v17  ;;  %v591_v26 = vpack.c.bf16 %v581_v24, %v580_v23  ;;  %v575_v27 = vld [vmem:[%s4990_s29 + $0x28] sm:$0xff]  ;;  %v582_v28 = vld [vmem:[%s4990_s29 + $0x60] sm:$0xff]  ;;  %s4053_s19 = sshll.u32 %s6176_s18, 1  ;;  %s4060_s22 = sshll.u32 %s6178_s24, 1  ;;  %v576_v32 = vld [vmem:[%s4990_s29 + $0x30] sm:$0xff] }
  0x1d   : > { %v583_v29 = vld [vmem:[%s4990_s29 + $0x68] sm:$0xff]  ;;  %4415 = vmatprep.mubr.msk.bf16.mxu1 %vm594_vm6, %v590_v21  ;;  %4408 = vmatmul.mubr.msk.bf16.vlgmr.msra.gmra.mrb[0].mxu0 %vm594_vm6, %v587_v22  ;;  %v588_v30 = vpack.c.bf16 %v575_v27, %v574_v25  ;;  %s466_s20 = sadd.s32 %s4053_s19, %s4961_s21  ;;  %v577_v33 = vld [vmem:[%s4990_s29 + $0x38] sm:$0xff]  ;;  %s483_s25 = sadd.s32 %s4060_s22, %s4961_s21  ;;  %v584_v34 = vld [vmem:[%s4990_s29 + $0x70] sm:$0xff] }
  0x1e   : > { %v592_v31 = vpack.c.bf16 %v583_v29, %v582_v28  ;;  %4416 = vmatmul.mubr.msk.bf16.vlgmr.msra.gmra.mrb[0].mxu1 %vm594_vm6, %v591_v26  ;;  %s4055_s23 = sshll.u32 %s466_s20, 3  ;;  %v585_v35 = vld [vmem:[%s4990_s29 + $0x78] sm:$0xff]  ;;  %s4062_s10 = sshll.u32 %s483_s25, 3  ;;  %v589_v36 = vpack.c.bf16 %v577_v33, %v576_v32  ;;  %v511_v40 = vld [vmem:[#allocation2 + $0xc] sm:$0x1]  ;;  %vm5136_vm0 = vmor %vm506_vm2, %vm860_vm13 }
  0x1f   : > { %4411 = vmatprep.mubr.msk.bf16.mxu0 %vm594_vm6, %v588_v30  ;;  %s5033_s28 = scalar_lea.vmem %s6122_s1, %s4055_s23  ;;  %s5038_s18 = scalar_lea.vmem %s6123_s2, %s4062_s10  ;;  %v593_v37 = vpack.c.bf16 %v585_v35, %v584_v34  ;;  %v523_v41 = vld [vmem:[#allocation2 + $0x3c] sm:$0x1]  ;;  %v512_v42 = vsel %vm4957_vm3, 0, %v511_v40  ;;  %v546_v44 = vld [vmem:[#allocation2 + $0x20] sm:$0x1] }
  0x20   : > { %4419 = vmatprep.mubr.msk.bf16.mxu1 %vm594_vm6, %v592_v31  ;;  %v524_v43 = vsel %vm4957_vm3, 0, %v523_v41  ;;  %513 = vst [vmem:[#allocation2 + $0xc] sm:$0x1] %v512_v42  ;;  %v547_v45 = vsel %vm4975_vm5, 0, %v546_v44  ;;  %v558_v46 = vld [vmem:[#allocation2 + $0x50] sm:$0x1] }
  0x21   : > { %525 = vst [vmem:[#allocation2 + $0x3c] sm:$0x1] %v524_v43  ;;  %548 = vst [vmem:[#allocation2 + $0x20] sm:$0x1] %v547_v45  ;;  %v559_v47 = vsel %vm4975_vm5, 0, %v558_v46  ;;  %p4093_p10 = scmp.le.s32.totalorder %s4834_s30, 0 }
  0x22   : > { %560 = vst [vmem:[#allocation2 + $0x50] sm:$0x1] %v559_v47  ;;  %v543_v48 = vld [vmem:[#allocation2 + $0x14] sm:$0x1]  ;;  %v555_v50 = vld [vmem:[#allocation2 + $0x44] sm:$0x1] }
  0x23   : > { %v544_v49 = vsel %vm4975_vm5, 0, %v543_v48  ;;  %v556_v51 = vsel %vm4975_vm5, 0, %v555_v50  ;;  %v520_v52 = vld [vmem:[#allocation2 + $0x30] sm:$0x1]  ;;  %v532_v53 = vld [vmem:[#allocation2 + $0x60] sm:$0x1] }
  0x24   : > { %545 = vst [vmem:[#allocation2 + $0x14] sm:$0x1] %v544_v49  ;;  %557 = vst [vmem:[#allocation2 + $0x44] sm:$0x1] %v556_v51  ;;  %v521_v54 = vsel %vm4957_vm3, 0, %v520_v52  ;;  %v533_v55 = vsel %vm4957_vm3, 0, %v532_v53 }
  0x25   : > { %4412 = vmatmul.mubr.msk.bf16.gmra.mrb[4].mxu0 %vm594_vm6, %v589_v36  ;;  %v517_v56 = vld [vmem:[#allocation2 + $0x24] sm:$0x1]  ;;  %522 = vst [vmem:[#allocation2 + $0x30] sm:$0x1] %v521_v54  ;;  %534 = vst [vmem:[#allocation2 + $0x60] sm:$0x1] %v533_v55 }
  0x26   : > { %4420 = vmatmul.mubr.msk.bf16.gmra.mrb[4].mxu1 %vm594_vm6, %v593_v37  ;;  %v518_v57 = vsel %vm4957_vm3, 0, %v517_v56  ;;  %v529_v58 = vld [vmem:[#allocation2 + $0x54] sm:$0x1]  ;;  %v552_v60 = vld [vmem:[#allocation2 + $0x38] sm:$0x1] }
  0x27   : > { %519 = vst [vmem:[#allocation2 + $0x24] sm:$0x1] %v518_v57  ;;  %v530_v59 = vsel %vm4957_vm3, 0, %v529_v58  ;;  %v553_v61 = vsel %vm4975_vm5, 0, %v552_v60  ;;  %v564_v62 = vld [vmem:[#allocation2 + $0x68] sm:$0x1] }
  0x28   : > { %531 = vst [vmem:[#allocation2 + $0x54] sm:$0x1] %v530_v59  ;;  %554 = vst [vmem:[#allocation2 + $0x38] sm:$0x1] %v553_v61  ;;  %v565_v63 = vsel %vm4975_vm5, 0, %v564_v62 }
  0x29   : > { %566 = vst [vmem:[#allocation2 + $0x68] sm:$0x1] %v565_v63  ;;  %v549_v0 = vld [vmem:[#allocation2 + $0x2c] sm:$0x1]  ;;  %v561_v3 = vld [vmem:[#allocation2 + $0x5c] sm:$0x1] }
  0x2a   : > { %v550_v4 = vsel %vm4975_vm5, 0, %v549_v0  ;;  %v562_v5 = vsel %vm4975_vm5, 0, %v561_v3  ;;  %v5075_v6 = vld [vmem:[%s6125_s4] ss:$0 sm:$0xff]  ;;  %v1033_v50 = vld [vmem:[#allocation2 + $0x18] sm:$0xf] }
  0x2b   : > { %551 = vst [vmem:[#allocation2 + $0x2c] sm:$0x1] %v550_v4  ;;  %563 = vst [vmem:[#allocation2 + $0x5c] sm:$0x1] %v562_v5  ;;  %v5080_v7 = vld [vmem:[%s6126_s5] ss:$0 sm:$0xff] }
  0x2c   : > { %v1061_v57 = vld [vmem:[#allocation2 + $0x48] sm:$0xf] }
  0xf0   : > { %v4409_v8 = vpop.f32.mrb[0].mxu0 }
  0xf1   : > { %v728_v10 = vmul.f32 %v4409_v8, %v5075_v6  ;;  %v4417_v11 = vpop.f32.mrb[0].mxu1  ;;  %v657_v12 = vpop.f32.mrb[1].mxu0  ;;  %v1025_v8 = vld [vmem:[#allocation2 + $0xc] sm:$0xf] }
  0xf2   : > { %v736_v9 = vmul.f32 %v4417_v11, %v5075_v6  ;;  %v726_v13 = vmul.f32 %v5075_v6, %v657_v12  ;;  %v689_v14 = vpop.f32.mrb[1].mxu1  ;;  %v4410_v15 = vpop.f32.mrb[2].mxu0 }
  0xf3   : > { %v750_v16 = vadd.f32 %v5080_v7, %v728_v10  ;;  %v734_v17 = vmul.f32 %v5075_v6, %v689_v14  ;;  %v729_v18 = vmul.f32 %v4410_v15, %v5075_v6  ;;  %v4418_v19 = vpop.f32.mrb[2].mxu1  ;;  %v660_v20 = vpop.f32.mrb[3].mxu0  ;;  %v1054_v15 = vld [vmem:[#allocation2 + $0x3c] sm:$0xf] }
  0xf4   : > { %v758_v21 = vadd.f32 %v5080_v7, %v736_v9  ;;  %v748_v22 = vadd.f32 %v5080_v7, %v726_v13  ;;  %v737_v23 = vmul.f32 %v4418_v19, %v5075_v6  ;;  %v5091_v24 = vpop.f32.mrb[3].mxu1  ;;  %v727_v46 = vmul.f32 %v5075_v6, %v660_v20 }
  0xf5   : > { %vm766_vm8 = vcmp.ge.f32.partialorder %v750_v16, 0.0  ;;  %v782_v25 = vmul.f32 0.01, %v750_v16  ;;  %v756_v26 = vadd.f32 %v5080_v7, %v734_v17  ;;  %v751_v27 = vadd.f32 %v5080_v7, %v729_v18 }
  0xf6   : > { %vm774_vm9 = vcmp.ge.f32.partialorder %v758_v21, 0.0  ;;  %v790_v28 = vmul.f32 0.01, %v758_v21  ;;  %vm764_vm10 = vcmp.ge.f32.partialorder %v748_v22, 0.0  ;;  %v780_v29 = vmul.f32 0.01, %v748_v22 }
  0xf7   : > { %v798_v30 = vsel %vm766_vm8, %v750_v16, %v782_v25  ;;  %vm772_vm11 = vcmp.ge.f32.partialorder %v756_v26, 0.0  ;;  %v788_v31 = vmul.f32 0.01, %v756_v26  ;;  %vm767_vm12 = vcmp.ge.f32.partialorder %v751_v27, 0.0 }
  0xf8   : > { %v4293_v32 = vpack.c.bf16 %v798_v30, %v798_v30  ;;  %v806_v33 = vsel %vm774_vm9, %v758_v21, %v790_v28  ;;  %v796_v34 = vsel %vm764_vm10, %v748_v22, %v780_v29  ;;  %v783_v35 = vmul.f32 0.01, %v751_v27  ;;  %v4413_v36 = vpop.f32.mrb[4].mxu0 }
  0xf9   : > { %v4301_v37 = vpack.c.bf16 %v806_v33, %v806_v33  ;;  %v4291_v38 = vpack.c.bf16 %v796_v34, %v796_v34  ;;  %v804_v39 = vsel %vm772_vm11, %v756_v26, %v788_v31  ;;  %v759_v40 = vadd.f32 %v5080_v7, %v737_v23  ;;  %v4421_v41 = vpop.f32.mrb[4].mxu1  ;;  %v5096_v42 = vpop.f32.mrb[5].mxu0  ;;  %v1037_v23 = vld [vmem:[#allocation2 + $0x20] sm:$0x1] }
  0xfa   : > { %v880_v43 = vshrl.u32 %v4293_v32, 16  ;;  %v4299_v44 = vpack.c.bf16 %v804_v39, %v804_v39  ;;  %v799_v45 = vsel %vm767_vm12, %v751_v27, %v783_v35  ;;  %v5099_v47 = vpop.f32.mrb[5].mxu1  ;;  %v5101_v48 = vpop.f32.mrb[6].mxu0  ;;  %v883_v49 = vshll.u32 %v4293_v32, 16 }
  0xfb   : > { %v948_v51 = vshrl.u32 %v4301_v37, 16  ;;  %v951_v52 = vshll.u32 %v4301_v37, 16  ;;  %v863_v53 = vshrl.u32 %v4291_v38, 16  ;;  %v5103_v54 = vpop.f32.mrb[6].mxu1  ;;  %v5105_v55 = vpop.f32.mrb[7].mxu0  ;;  %v866_v58 = vshll.u32 %v4291_v38, 16 }
  0xfc   : > { %v882_v56 = vrot.slane %v880_v43, 7  ;;  %v931_v59 = vshrl.u32 %v4299_v44, 16  ;;  %v4294_v60 = vpack.c.bf16 %v799_v45, %v799_v45  ;;  %v5107_v61 = vpop.f32.mrb[7].mxu1  ;;  %v934_v3 = vshll.u32 %v4299_v44, 16 }
  0xfd   : > { %v5115_v63 = vrot.slane %v948_v51, 7  ;;  %v5117_v0 = vrot.slane %v863_v53, 7  ;;  %v791_v4 = vmul.f32 0.01, %v759_v40  ;;  %vm775_vm15 = vcmp.ge.f32.partialorder %v759_v40, 0.0 }
  0xfe   : > { %v885_v5 = vor.u32 %v883_v49, %v882_v56  ;;  %v5119_v10 = vrot.slane %v931_v59, 7  ;;  %v888_v11 = vshrl.u32 %v4294_v60, 16  ;;  %v886_v12 = vrot.slane %v882_v56, 4 }
  0xff   : > { %v953_v9 = vor.u32 %v951_v52, %v5115_v63  ;;  %v954_v13 = vrot.slane %v5115_v63, 4  ;;  %v868_v14 = vor.u32 %v866_v58, %v5117_v0  ;;  %v869_v17 = vrot.slane %v5117_v0, 4 }
 0x100   : > { %v1034_v16 = vsel %vm5111_vm14, %v885_v5, %v1033_v50  ;;  %v936_v18 = vor.u32 %v934_v3, %v5119_v10  ;;  %v890_v19 = vrot.slane %v888_v11, 7  ;;  %v891_v22 = vshll.u32 %v4294_v60, 16 }
 0x101   : > { %1035 = vst [vmem:[#allocation2 + $0x18] sm:$0xf] %v1034_v16  ;;  %v1062_v20 = vsel %vm5111_vm14, %v953_v9, %v1061_v57  ;;  %v1026_v21 = vsel %vm5111_vm14, %v868_v14, %v1025_v8  ;;  %v807_v25 = vsel %vm775_vm15, %v759_v40, %v791_v4  ;;  %v749_v30 = vadd.f32 %v5080_v7, %v727_v46  ;;  %v1065_v46 = vld [vmem:[#allocation2 + $0x50] sm:$0x1] }
 0x102   : > { %1063 = vst [vmem:[#allocation2 + $0x48] sm:$0xf] %v1062_v20  ;;  %1027 = vst [vmem:[#allocation2 + $0xc] sm:$0xf] %v1026_v21  ;;  %v1055_v26 = vsel %vm5111_vm14, %v936_v18, %v1054_v15  ;;  %v895_v28 = vrot.slane %v890_v19, 4  ;;  %v4302_v29 = vpack.c.bf16 %v807_v25, %v807_v25  ;;  %v893_v31 = vor.u32 %v891_v22, %v890_v19 }
 0x103   : > { %1056 = vst [vmem:[#allocation2 + $0x3c] sm:$0xf] %v1055_v26  ;;  %v735_v32 = vmul.f32 %v5075_v6, %v5091_v24  ;;  %v732_v33 = vmul.f32 %v4413_v36, %v5075_v6  ;;  %v740_v34 = vmul.f32 %v4421_v41, %v5075_v6  ;;  %vm765_vm1 = vcmp.ge.f32.partialorder %v749_v30, 0.0 }
 0x104   : > { %v1038_v35 = vsel %vm4957_vm3, %v895_v28, %v1037_v23  ;;  %v956_v37 = vshrl.u32 %v4302_v29, 16  ;;  %v959_v38 = vshll.u32 %v4302_v29, 16  ;;  %v894_v39 = vsel %vm5136_vm0, %v886_v12, %v893_v31 }
 0x105   : > { %1039 = vst [vmem:[#allocation2 + $0x20] sm:$0x1] %v1038_v35  ;;  %v781_v40 = vmul.f32 0.01, %v749_v30  ;;  %v757_v43 = vadd.f32 %v5080_v7, %v735_v32  ;;  %v754_v44 = vadd.f32 %v5080_v7, %v732_v33  ;;  %1036 = vst.msk [vmem:[#allocation2 + $0x1c] sm:$0xf] %vm1023_vm7, %v894_v39  ;;  %v762_v36 = vadd.f32 %v5080_v7, %v740_v34 }
 0x106   : > { %v958_v24 = vrot.slane %v956_v37, 7  ;;  %v730_v41 = vmul.f32 %v5075_v6, %v5096_v42  ;;  %v738_v45 = vmul.f32 %v5075_v6, %v5099_v47  ;;  %v937_v14 = vrot.slane %v5119_v10, 4  ;;  %v1047_v34 = vld [vmem:[#allocation2 + $0x30] sm:$0xf] }
 0x107   : > { %v797_v49 = vsel %vm765_vm1, %v749_v30, %v781_v40  ;;  %vm773_vm2 = vcmp.ge.f32.partialorder %v757_v43, 0.0  ;;  %v789_v50 = vmul.f32 0.01, %v757_v43  ;;  %vm770_vm4 = vcmp.ge.f32.partialorder %v754_v44, 0.0  ;;  %v1058_v30 = vld [vmem:[#allocation2 + $0x44] sm:$0x1] }
 0x108   : > { %v961_v51 = vor.u32 %v959_v38, %v958_v24  ;;  %v963_v52 = vrot.slane %v958_v24, 4  ;;  %v4292_v53 = vpack.c.bf16 %v797_v49, %v797_v49  ;;  %v786_v56 = vmul.f32 0.01, %v754_v44  ;;  %v1075_v38 = vld [vmem:[#allocation2 + $0x60] sm:$0xf] }
 0x109   : > { %v805_v57 = vsel %vm773_vm2, %v757_v43, %v789_v50  ;;  %vm778_vm5 = vcmp.ge.f32.partialorder %v762_v36, 0.0  ;;  %v794_v58 = vmul.f32 0.01, %v762_v36  ;;  %v752_v59 = vadd.f32 %v5080_v7, %v730_v41  ;;  %v1040_v49 = vld [vmem:[#allocation2 + $0x24] sm:$0xf] }
 0x10a   : > { %v962_v42 = vsel %vm5136_vm0, %v954_v13, %v961_v51  ;;  %v1066_v47 = vsel %vm4957_vm3, %v963_v52, %v1065_v46  ;;  %v871_v60 = vshrl.u32 %v4292_v53, 16  ;;  %v874_v63 = vshll.u32 %v4292_v53, 16  ;;  %v1030_v13 = vld [vmem:[#allocation2 + $0x14] sm:$0x1] }
 0x10b   : > { %1064 = vst.msk [vmem:[#allocation2 + $0x4c] sm:$0xf] %vm1023_vm7, %v962_v42  ;;  %1067 = vst [vmem:[#allocation2 + $0x50] sm:$0x1] %v1066_v47  ;;  %v4300_v3 = vpack.c.bf16 %v805_v57, %v805_v57  ;;  %v802_v4 = vsel %vm770_vm4, %v754_v44, %v786_v56  ;;  %v810_v5 = vsel %vm778_vm5, %v762_v36, %v794_v58  ;;  %vm768_vm8 = vcmp.ge.f32.partialorder %v752_v59, 0.0 }
 0x10c   : > { %v873_v8 = vrot.slane %v871_v60, 7  ;;  %v4297_v11 = vpack.c.bf16 %v802_v4, %v802_v4  ;;  %v4305_v12 = vpack.c.bf16 %v810_v5, %v810_v5  ;;  %v784_v9 = vmul.f32 0.01, %v752_v59 }
 0x10d   : > { %v939_v15 = vshrl.u32 %v4300_v3, 16  ;;  %v942_v16 = vshll.u32 %v4300_v3, 16  ;;  %v760_v18 = vadd.f32 %v5080_v7, %v738_v45  ;;  %v733_v22 = vmul.f32 %v5101_v48, %v5075_v6 }
 0x10e   : > { %v876_v19 = vor.u32 %v874_v63, %v873_v8  ;;  %v878_v20 = vrot.slane %v873_v8, 4  ;;  %v914_v21 = vshrl.u32 %v4297_v11, 16  ;;  %v917_v25 = vshll.u32 %v4297_v11, 16  ;;  %v1068_v11 = vld [vmem:[#allocation2 + $0x54] sm:$0xf] }
 0x10f   : > { %v941_v23 = vrot.slane %v939_v15, 7  ;;  %v982_v26 = vshrl.u32 %v4305_v12, 16  ;;  %v800_v28 = vsel %vm768_vm8, %v752_v59, %v784_v9  ;;  %v985_v37 = vshll.u32 %v4305_v12, 16 }
 0x110   : > { %v877_v10 = vsel %vm5136_vm0, %v869_v17, %v876_v19  ;;  %v1031_v29 = vsel %vm4957_vm3, %v878_v20, %v1030_v13  ;;  %v5175_v31 = vrot.slane %v914_v21, 7  ;;  %v4295_v32 = vpack.c.bf16 %v800_v28, %v800_v28 }
 0x111   : > { %1029 = vst.msk [vmem:[#allocation2 + $0x10] sm:$0xf] %vm1023_vm7, %v877_v10  ;;  %1032 = vst [vmem:[#allocation2 + $0x14] sm:$0x1] %v1031_v29  ;;  %v944_v48 = vor.u32 %v942_v16, %v941_v23  ;;  %v946_v33 = vrot.slane %v941_v23, 4  ;;  %v5178_v35 = vrot.slane %v982_v26, 7  ;;  %v755_v45 = vadd.f32 %v5080_v7, %v733_v22 }
 0x112   : > { %v919_v0 = vor.u32 %v917_v25, %v5175_v31  ;;  %v897_v17 = vshrl.u32 %v4295_v32, 16  ;;  %vm776_vm9 = vcmp.ge.f32.partialorder %v760_v18, 0.0  ;;  %v900_v44 = vshll.u32 %v4295_v32, 16  ;;  %v1051_v23 = vld [vmem:[#allocation2 + $0x38] sm:$0x1] }
 0x113   : > { %v945_v39 = vsel %vm5136_vm0, %v937_v14, %v944_v48  ;;  %v1059_v40 = vsel %vm4957_vm3, %v946_v33, %v1058_v30  ;;  %v987_v43 = vor.u32 %v985_v37, %v5178_v35  ;;  %v792_v41 = vmul.f32 0.01, %v760_v18 }
 0x114   : > { %1057 = vst.msk [vmem:[#allocation2 + $0x40] sm:$0xf] %vm1023_vm7, %v945_v39  ;;  %1060 = vst [vmem:[#allocation2 + $0x44] sm:$0x1] %v1059_v40  ;;  %v1048_v24 = vsel %vm5111_vm14, %v919_v0, %v1047_v34  ;;  %v5189_v36 = vrot.slane %v897_v17, 7  ;;  %v741_v50 = vmul.f32 %v5103_v54, %v5075_v6  ;;  %v731_v51 = vmul.f32 %v5075_v6, %v5105_v55 }
 0x115   : > { %1049 = vst [vmem:[#allocation2 + $0x30] sm:$0xf] %v1048_v24  ;;  %v1076_v46 = vsel %vm5111_vm14, %v987_v43, %v1075_v38  ;;  %v739_v52 = vmul.f32 %v5075_v6, %v5107_v61  ;;  %v808_v56 = vsel %vm776_vm9, %v760_v18, %v792_v41  ;;  %vm771_vm10 = vcmp.ge.f32.partialorder %v755_v45, 0.0  ;;  %v1079_v38 = vld [vmem:[#allocation2 + $0x68] sm:$0x1] }
 0x116   : > { %1077 = vst [vmem:[#allocation2 + $0x60] sm:$0xf] %v1076_v46  ;;  %v902_v53 = vor.u32 %v900_v44, %v5189_v36  ;;  %v4303_v57 = vpack.c.bf16 %v808_v56, %v808_v56  ;;  %v787_v58 = vmul.f32 0.01, %v755_v45  ;;  %v763_v59 = vadd.f32 %v5080_v7, %v741_v50  ;;  %v1044_v17 = vld [vmem:[#allocation2 + $0x2c] sm:$0x1] }
 0x117   : > { %v753_v42 = vadd.f32 %v5080_v7, %v731_v51  ;;  %v761_v55 = vadd.f32 %v5080_v7, %v739_v52  ;;  %v920_v21 = vrot.slane %v5175_v31, 4  ;;  %v988_v28 = vrot.slane %v5178_v35, 4  ;;  %v1072_v50 = vld [vmem:[#allocation2 + $0x5c] sm:$0x1] }
 0x118   : > { %v1041_v54 = vsel %vm5111_vm14, %v902_v53, %v1040_v49  ;;  %v965_v47 = vshrl.u32 %v4303_v57, 16  ;;  %v803_v61 = vsel %vm771_vm10, %v755_v45, %v787_v58  ;;  %vm779_vm11 = vcmp.ge.f32.partialorder %v763_v59, 0.0  ;;  %v1086_v58 = vld [vmem:[%s5033_s28] sm:$0xff] (!%p4093_p10) }
 0x119   : > { %1042 = vst [vmem:[#allocation2 + $0x24] sm:$0xf] %v1041_v54  ;;  %v4298_v60 = vpack.c.bf16 %v803_v61, %v803_v61  ;;  %v795_v63 = vmul.f32 0.01, %v763_v59  ;;  %vm769_vm12 = vcmp.ge.f32.partialorder %v753_v42, 0.0  ;;  %v968_v5 = vshll.u32 %v4303_v57, 16 }
 0x11a   : > { %v785_v3 = vmul.f32 0.01, %v753_v42  ;;  %v967_v4 = vrot.slane %v965_v47, 7  ;;  %vm777_vm13 = vcmp.ge.f32.partialorder %v761_v55, 0.0  ;;  %v793_v8 = vmul.f32 0.01, %v761_v55 }
 0x11b   : > { %v922_v12 = vshrl.u32 %v4298_v60, 16  ;;  %v811_v9 = vsel %vm779_vm11, %v763_v59, %v795_v63  ;;  %v925_v19 = vshll.u32 %v4298_v60, 16  ;;  %v903_v37 = vrot.slane %v5189_v36, 4  ;;  %v1087_v59 = vld [vmem:[%s5033_s28 + $0x8] sm:$0xff] (!%p4093_p10) }
 0x11c   : > { %v801_v14 = vsel %vm769_vm12, %v753_v42, %v785_v3  ;;  %v970_v13 = vor.u32 %v968_v5, %v967_v4  ;;  %v4306_v15 = vpack.c.bf16 %v811_v9, %v811_v9  ;;  %v809_v20 = vsel %vm777_vm13, %v761_v55, %v793_v8 }
 0x11d   : > { %v4296_v16 = vpack.c.bf16 %v801_v14, %v801_v14  ;;  %v924_v18 = vrot.slane %v922_v12, 7  ;;  %v4304_v30 = vpack.c.bf16 %v809_v20, %v809_v20  ;;  %v971_v51 = vrot.slane %v967_v4, 4  ;;  %v1169_v20 = vld [vmem:[#allocation2] sm:$0xf] (!%p4093_p10) }
 0x11e   : > { %v1069_v22 = vsel %vm5111_vm14, %v970_v13, %v1068_v11  ;;  %v990_v25 = vshrl.u32 %v4306_v15, 16  ;;  %v993_v48 = vshll.u32 %v4306_v15, 16  ;;  %v4852_v42 = vmov (!%p4093_p10), 0.0  }
 0x11f   : > { %v905_v26 = vshrl.u32 %v4296_v16, 16  ;;  %1070 = vst [vmem:[#allocation2 + $0x54] sm:$0xf] %v1069_v22  ;;  %v927_v10 = vor.u32 %v925_v19, %v924_v18  ;;  %v929_v29 = vrot.slane %v924_v18, 4  ;;  %v908_v34 = vshll.u32 %v4296_v16, 16  ;;  %4423 = vmatprep.subr.bf16.mxu0 (!%p4093_p10), %v4852_v42 }
 0x120   : > { %v992_v32 = vrot.slane %v990_v25, 7  ;;  %v973_v39 = vshrl.u32 %v4304_v30, 16  ;;  %v976_v41 = vshll.u32 %v4304_v30, 16  ;;  %vm4853_vm15 = vmmov (!%p4093_p10), 0   ;;  %4424 = vmatpush3.bf16.msra.mxu0 (!%p4093_p10), %v4946_v1  ;;  %v1173_v25 = vld [vmem:[#allocation2 + $0x8] sm:$0x1] (!%p4093_p10) }
 0x121   : > { %v907_v33 = vrot.slane %v905_v26, 7  ;;  %v928_v31 = vsel %vm5136_vm0, %v920_v21, %v927_v10  ;;  %v1052_v0 = vsel %vm4957_vm3, %v929_v29, %v1051_v23  ;;  %1085 = sbr.rel (%p4093_p10) target bundleno = 522 (0x20a), region = 60  ;;  %4425 = vmatprep.mubr.msk.bf16.mxu0 (!%p4093_p10), %vm4853_vm15, %v4852_v42  ;;  %v1088_v54 = vpack.c.bf16 (!%p4093_p10), %v1087_v59, %v1086_v58 }
 0x122   : > { %1050 = vst.msk [vmem:[#allocation2 + $0x34] sm:$0xf] %vm1023_vm7, %v928_v31  ;;  %1053 = vst [vmem:[#allocation2 + $0x38] sm:$0x1] %v1052_v0  ;;  %v995_v35 = vor.u32 %v993_v48, %v992_v32  ;;  %v997_v40 = vrot.slane %v992_v32, 4  ;;  %v975_v24 = vrot.slane %v973_v39, 7 }
 0x123   : > { %v910_v43 = vor.u32 %v908_v34, %v907_v33  ;;  %v912_v44 = vrot.slane %v907_v33, 4  ;;  %4426 = vmatmul.mubr.msk.bf16.vlgmr.msra.gmra.mrb[0].mxu0 (!%p4093_p10), %vm594_vm6, %v1088_v54 }
 0x124   : > { %v996_v36 = vsel %vm5136_vm0, %v988_v28, %v995_v35  ;;  %v1080_v45 = vsel %vm4957_vm3, %v997_v40, %v1079_v38  ;;  %v978_v52 = vor.u32 %v976_v41, %v975_v24  ;;  %v980_v53 = vrot.slane %v975_v24, 4 }
 0x125   : > { %v911_v46 = vsel %vm5136_vm0, %v903_v37, %v910_v43  ;;  %v1045_v49 = vsel %vm4957_vm3, %v912_v44, %v1044_v17  ;;  %1078 = vst.msk [vmem:[#allocation2 + $0x64] sm:$0xf] %vm1023_vm7, %v996_v36  ;;  %1081 = vst [vmem:[#allocation2 + $0x68] sm:$0x1] %v1080_v45 }
 0x126   : > { %1043 = vst.msk [vmem:[#allocation2 + $0x28] sm:$0xf] %vm1023_vm7, %v911_v46  ;;  %1046 = vst [vmem:[#allocation2 + $0x2c] sm:$0x1] %v1045_v49  ;;  %v979_v56 = vsel %vm5136_vm0, %v971_v51, %v978_v52  ;;  %v1073_v57 = vsel %vm4957_vm3, %v980_v53, %v1072_v50 }
 0x127   : > { %1071 = vst.msk [vmem:[#allocation2 + $0x58] sm:$0xf] %vm1023_vm7, %v979_v56  ;;  %1074 = vst [vmem:[#allocation2 + $0x5c] sm:$0x1] %v1073_v57 }
 0x1f6   : > { %v1126_v55 = vpop.f32.mrb[0].mxu0 }
 0x1f7   : > { %v1133_v47 = vmul.f32 %v5075_v6, %v1126_v55  ;;  %v4427_v61 = vpop.f32.mrb[1].mxu0 }
 0x1f8   : > { %v1129_v60 = vpop.f32.mrb[2].mxu0 }
 0x1f9   : > { %v1135_v63 = vadd.f32 %v5080_v7, %v1133_v47  ;;  %v1134_v3 = vmul.f32 %v5075_v6, %v1129_v60  ;;  %v4428_v4 = vpop.f32.mrb[3].mxu0 }
 0x1fb   : > { %vm1137_vm1 = vcmp.ge.f32.partialorder %v1135_v63, 0.0  ;;  %v1139_v5 = vmul.f32 0.01, %v1135_v63  ;;  %v1136_v8 = vadd.f32 %v5080_v7, %v1134_v3 }
 0x1fd   : > { %v1141_v11 = vsel %vm1137_vm1, %v1135_v63, %v1139_v5  ;;  %vm1138_vm2 = vcmp.ge.f32.partialorder %v1136_v8, 0.0  ;;  %v1140_v12 = vmul.f32 0.01, %v1136_v8 }
 0x1fe   : > { %v4307_v9 = vpack.c.bf16 %v1141_v11, %v1141_v11 }
 0x1ff   : > { %v1142_v14 = vsel %vm1138_vm2, %v1136_v8, %v1140_v12 }
 0x200   : > { %v1150_v13 = vshrl.u32 %v4307_v9, 16  ;;  %v4308_v15 = vpack.c.bf16 %v1142_v14, %v1142_v14  ;;  %v1153_v18 = vshll.u32 %v4307_v9, 16 }
 0x202   : > { %v1152_v16 = vrot.slane %v1150_v13, 7  ;;  %v1158_v19 = vshrl.u32 %v4308_v15, 16  ;;  %v1161_v23 = vshll.u32 %v4308_v15, 16 }
 0x204   : > { %v1155_v21 = vor.u32 %v1153_v18, %v1152_v16  ;;  %v1160_v22 = vrot.slane %v1158_v19, 7  ;;  %v1156_v26 = vrot.slane %v1152_v16, 4 }
 0x206   : > { %v1170_v28 = vsel %vm5111_vm14, %v1155_v21, %v1169_v20  ;;  %v1163_v10 = vor.u32 %v1161_v23, %v1160_v22  ;;  %v1165_v29 = vrot.slane %v1160_v22, 4 }
 0x207   : > { %1171 = vst [vmem:[#allocation2] sm:$0xf] %v1170_v28 }
 0x208   : > { %v1164_v30 = vsel %vm5136_vm0, %v1156_v26, %v1163_v10  ;;  %v1174_v32 = vsel %vm4957_vm3, %v1165_v29, %v1173_v25 }
 0x209   : > { %1172 = vst.msk [vmem:[#allocation2 + $0x4] sm:$0xf] %vm1023_vm7, %v1164_v30  ;;  %1175 = vst [vmem:[#allocation2 + $0x8] sm:$0x1] %v1174_v32 }
 0x20a PF: > { %p4097_p11 = scmp.ne.s32.totalorder %s4834_s30, 0 }
 0x20b   : > { %v4854_v37 = vmov (!%p4097_p11), 0  }
 0x20c   : > { %1179 = sbr.rel (%p4097_p11) target bundleno = 531 (0x213), region = 64  ;;  %1183 = vst.msk [vmem:[#allocation2 + $0x4] sm:$0xf] (!%p4097_p11), %vm1023_vm7, %v4854_v37 }
 0x20e   : > { %v1180_v48 = vld [vmem:[#allocation2] sm:$0xf] (!%p4097_p11) }
 0x20f   : > { %v1181_v34 = vsel (!%p4097_p11), %vm5111_vm14, 0, %v1180_v48 }
 0x210   : > { %v1184_v33 = vld [vmem:[#allocation2 + $0x8] sm:$0x1] (!%p4097_p11)  ;;  %1182 = vst [vmem:[#allocation2] sm:$0xf] (!%p4097_p11), %v1181_v34 }
 0x211   : > { %v1185_v31 = vsel (!%p4097_p11), %vm4957_vm3, 0, %v1184_v33 }
 0x212   : > { %1186 = vst [vmem:[#allocation2 + $0x8] sm:$0x1] (!%p4097_p11), %v1185_v31 }
 0x213 PF: > { %p4098_p12 = scmp.ge.s32.totalorder %s4834_s30, 1 }
 0x214   : > { %v1191_v0 = vld [vmem:[%s5038_s18] sm:$0xff] (!%p4098_p12)  ;;  %v1192_v38 = vld [vmem:[%s5038_s18 + $0x8] sm:$0xff] (!%p4098_p12)  ;;  %v4855_v17 = vmov (!%p4098_p12), 0.0   ;;  %vm4856_vm4 = vmmov (!%p4098_p12), 0  }
 0x215   : > { %1190 = sbr.rel (%p4098_p12) target bundleno = 768 (0x300), region = 68  ;;  %4429 = vmatprep.subr.bf16.mxu0 (!%p4098_p12), %v4855_v17  ;;  %4431 = vmatprep.mubr.msk.bf16.mxu0 (!%p4098_p12), %vm4856_vm4, %v4855_v17  ;;  %v1193_v39 = vpack.c.bf16 (!%p4098_p12), %v1192_v38, %v1191_v0  ;;  %v1275_v59 = vld [vmem:[#allocation2 + $0x6c] sm:$0xf] (!%p4098_p12) }
 0x216   : > { %4430 = vmatpush3.bf16.msra.mxu0 (!%p4098_p12), %v4946_v1 }
 0x219   : > { %4432 = vmatmul.mubr.msk.bf16.vlgmr.msra.gmra.mrb[0].mxu0 (!%p4098_p12), %vm594_vm6, %v1193_v39 }
 0x2ec   : > { %v1231_v35 = vpop.f32.mrb[0].mxu0 }
 0x2ed   : > { %v1238_v40 = vmul.f32 %v5075_v6, %v1231_v35  ;;  %v4433_v43 = vpop.f32.mrb[1].mxu0 }
 0x2ee   : > { %v1234_v44 = vpop.f32.mrb[2].mxu0 }
 0x2ef   : > { %v1240_v24 = vadd.f32 %v5080_v7, %v1238_v40  ;;  %v1239_v41 = vmul.f32 %v5075_v6, %v1234_v44  ;;  %v4434_v36 = vpop.f32.mrb[3].mxu0  ;;  %v1279_v6 = vld [vmem:[#allocation2 + $0x74] sm:$0x1] }
 0x2f1   : > { %vm1242_vm5 = vcmp.ge.f32.partialorder %v1240_v24, 0.0  ;;  %v1244_v45 = vmul.f32 0.01, %v1240_v24  ;;  %v1241_v46 = vadd.f32 %v5080_v7, %v1239_v41 }
 0x2f3   : > { %v1246_v49 = vsel %vm1242_vm5, %v1240_v24, %v1244_v45  ;;  %vm1243_vm8 = vcmp.ge.f32.partialorder %v1241_v46, 0.0  ;;  %v1245_v50 = vmul.f32 0.01, %v1241_v46 }
 0x2f4   : > { %v4309_v1 = vpack.c.bf16 %v1246_v49, %v1246_v49 }
 0x2f5   : > { %v1247_v51 = vsel %vm1243_vm8, %v1241_v46, %v1245_v50 }
 0x2f6   : > { %v1255_v52 = vshrl.u32 %v4309_v1, 16  ;;  %v4310_v53 = vpack.c.bf16 %v1247_v51, %v1247_v51  ;;  %v1258_v57 = vshll.u32 %v4309_v1, 16 }
 0x2f8   : > { %v1257_v56 = vrot.slane %v1255_v52, 7  ;;  %v1263_v58 = vshrl.u32 %v4310_v53, 16  ;;  %v1266_v55 = vshll.u32 %v4310_v53, 16 }
 0x2fa   : > { %v1260_v42 = vor.u32 %v1258_v57, %v1257_v56  ;;  %v1265_v54 = vrot.slane %v1263_v58, 7  ;;  %v1261_v47 = vrot.slane %v1257_v56, 4 }
 0x2fc   : > { %v1276_v61 = vsel %vm5111_vm14, %v1260_v42, %v1275_v59  ;;  %v1268_v7 = vor.u32 %v1266_v55, %v1265_v54  ;;  %v1270_v60 = vrot.slane %v1265_v54, 4 }
 0x2fd   : > { %1277 = vst [vmem:[#allocation2 + $0x6c] sm:$0xf] %v1276_v61 }
 0x2fe   : > { %v1269_v63 = vsel %vm5136_vm0, %v1261_v47, %v1268_v7  ;;  %v1280_v3 = vsel %vm4957_vm3, %v1270_v60, %v1279_v6 }
 0x2ff   : > { %1278 = vst.msk [vmem:[#allocation2 + $0x70] sm:$0xf] %vm1023_vm7, %v1269_v63  ;;  %1281 = vst [vmem:[#allocation2 + $0x74] sm:$0x1] %v1280_v3 }
 0x300 PF: > { %p4102_p13 = scmp.ne.s32.totalorder %s4834_s30, 1 }
 0x301   : > { %v4857_v11 = vmov (!%p4102_p13), 0  }
 0x302   : > { %1285 = sbr.rel (%p4102_p13) target bundleno = 777 (0x309), region = 72  ;;  %1290 = vst.msk [vmem:[#allocation2 + $0x70] sm:$0xf] (!%p4102_p13), %vm1023_vm7, %v4857_v11 }
 0x304   : > { %v1287_v4 = vld [vmem:[#allocation2 + $0x6c] sm:$0xf] (!%p4102_p13) }
 0x305   : > { %v1288_v8 = vsel (!%p4102_p13), %vm5111_vm14, 0, %v1287_v4 }
 0x306   : > { %v1291_v5 = vld [vmem:[#allocation2 + $0x74] sm:$0x1] (!%p4102_p13)  ;;  %1289 = vst [vmem:[#allocation2 + $0x6c] sm:$0xf] (!%p4102_p13), %v1288_v8 }
 0x307   : > { %v1292_v27 = vsel (!%p4102_p13), %vm4957_vm3, 0, %v1291_v5 }
 0x308   : > { %1293 = vst [vmem:[#allocation2 + $0x74] sm:$0x1] (!%p4102_p13), %v1292_v27 }
 0x309 PF: > { %v4103_v12 = vld [vmem:[%s6127_s6 + $0x2] sm:$0x3]  ;;  %vm1565_vm0 = vcmask 1041408   ;;  %v4178_v9 = vld [vmem:[%s6127_s6 + $0x8] sm:$0x3]  ;;  %vm1540_vm9 = vcmask 31744  }
 0x30a   : > { %4731 = vmatprep.subr.msk.bf16.mxu1 %vm1565_vm0, %v4103_v12  ;;  %4735 = vmatprep.subr.msk.bf16.mxu0 %vm1565_vm0, %v4178_v9  ;;  %v1567_v62 = vsel %vm1565_vm0, %v4103_v12, 0  ;;  %v5286_v2 = vsel %vm1565_vm0, %v4178_v9, 0  ;;  %v5288_v14 = vld [vmem:[#allocation2] sm:$0xf]  ;;  %v5290_v13 = vld [vmem:[#allocation2 + $0x4] sm:$0xf] }
 0x30b   : > { %4436 = vmatpush3.bf16.msra.mxu1 %v1567_v62  ;;  %4508 = vmatpush3.bf16.msra.mxu0 %v5286_v2  ;;  %v5293_v15 = vld [vmem:[#allocation2 + $0x8] sm:$0x1]  ;;  %vm1319_vm3 = vsmask.f32 3328  ;;  %vm1320_vm7 = vsmask.f32 7440 }
 0x30c   : > { %v1323_v16 = vshrl.u32 %v5288_v14, 16  ;;  %v1326_v18 = vshll.u32 %v5288_v14, 16  ;;  %v1332_v19 = vshll.u32 %v5290_v13, 16  ;;  %v1336_v20 = vshrl.u32 %v5290_v13, 16  ;;  %v1310_v21 = vld [vmem:[%s6127_s6] sm:$0x3]  ;;  %vm5322_vm14 = vmor %vm1319_vm3, %vm1320_vm7 }
 0x30d   : > { %v1342_v22 = vshll.u32 %v5293_v15, 16  ;;  %4732 = vmatprep.subr.msk.bf16.mxu1 %vm1565_vm0, %v1310_v21  ;;  %v2277_v23 = vld [vmem:[#allocation2 + $0xc] sm:$0xf]  ;;  %v5304_v25 = vld [vmem:[#allocation2 + $0x10] sm:$0xf]  ;;  %v1731_v9 = vsel %vm1565_vm0, %v1310_v21, 0 }
 0x30e   : > { %v1325_v26 = vrot.slane %v1323_v16, 4  ;;  %v1328_v28 = vrot.slane %v1326_v18, 5  ;;  %v1334_v10 = vrot.slane %v1332_v19, 5  ;;  %v1338_v29 = vrot.slane %v1336_v20, 4  ;;  %v5306_v30 = vld [vmem:[#allocation2 + $0x14] sm:$0x1] }
 0x30f   : > { %v1344_v32 = vrot.slane %v1342_v22, 5  ;;  %v2302_v48 = vshrl.u32 %v2277_v23, 16  ;;  %v2305_v33 = vshll.u32 %v2277_v23, 16  ;;  %v2311_v34 = vshll.u32 %v5304_v25, 16  ;;  %v5312_v37 = vld [vmem:[%s6127_s6 + $0xa] sm:$0x3] }
 0x310   : > { %v1329_v31 = vor.u32 %v1328_v28, %v1325_v26  ;;  %v1339_v0 = vor.u32 %v1338_v29, %v1334_v10  ;;  %v2315_v38 = vshrl.u32 %v5304_v25, 16  ;;  %v2321_v17 = vshll.u32 %v5306_v30, 16  ;;  %4737 = vmatprep.subr.msk.bf16.mxu0 %vm1565_vm0, %v5312_v37  ;;  %v5318_v39 = vld [vmem:[#allocation2 + $0xc] sm:$0xf]  ;;  %v5326_v24 = vld [vmem:[#allocation2 + $0x10] sm:$0xf] }
 0x311   : > { %v2304_v40 = vrot.slane %v2302_v48, 4  ;;  %v2307_v43 = vrot.slane %v2305_v33, 5  ;;  %v2313_v44 = vrot.slane %v2311_v34, 5  ;;  %v5328_v50 = vld [vmem:[#allocation2 + $0x14] sm:$0x1]  ;;  %v1347_v1 = vshrl.u32 %v5318_v39, 16 }
 0x312   : > { %v1330_v41 = vrot.slane %v1329_v31, 4  ;;  %v1340_v36 = vrot.slane %v1339_v0, 4  ;;  %v2317_v45 = vrot.slane %v2315_v38, 4  ;;  %v2323_v49 = vrot.slane %v2321_v17, 5  ;;  %v2280_v7 = vld [vmem:[#allocation2 + $0x18] sm:$0xf] }
 0x313   : > { %v2308_v46 = vor.u32 %v2307_v43, %v2304_v40  ;;  %v1350_v51 = vshll.u32 %v5318_v39, 16  ;;  %v1356_v57 = vshll.u32 %v5326_v24, 16  ;;  %v1349_v42 = vrot.slane %v1347_v1, 4  ;;  %v5344_v5 = vld [vmem:[#allocation2 + $0x1c] sm:$0xf] }
 0x314   : > { %v1335_v52 = vsel %vm5322_vm14, %v1330_v41, %v1334_v10  ;;  %v1345_v53 = vsel %vm5322_vm14, %v1340_v36, %v1344_v32  ;;  %v2318_v56 = vor.u32 %v2317_v45, %v2313_v44  ;;  %v1360_v47 = vshrl.u32 %v5326_v24, 16  ;;  %v5346_v8 = vld [vmem:[#allocation2 + $0x20] sm:$0x1]  ;;  %v5358_v32 = vld [vmem:[#allocation2 + $0x18] sm:$0xf] }
 0x315   : > { %v4104_v58 = vcombine.low %v1335_v52, %v1345_v53  ;;  %v2309_v59 = vrot.slane %v2308_v46, 4  ;;  %v1352_v54 = vrot.slane %v1350_v51, 5  ;;  %v1358_v6 = vrot.slane %v1356_v57, 5  ;;  %v5360_v0 = vld [vmem:[#allocation2 + $0x1c] sm:$0xf] }
 0x316   : > { %v2319_v55 = vrot.slane %v2318_v56, 4  ;;  %v1366_v61 = vshll.u32 %v5328_v50, 16  ;;  %v2693_v63 = vrot.slane %v5304_v25, 5  ;;  %v2696_v3 = vrot.slane %v5306_v30, 5  ;;  %v6018_v35 = vld [vmem:[%s6128_s7] ss:$0 sm:$0xff] }
 0x317   : > { %4437 = vmatprep.mubr.msk.bf16.mxu1 %vm1540_vm9, %v4104_v58  ;;  %v2314_v60 = vsel %vm5322_vm14, %v2309_v59, %v2313_v44  ;;  %v1353_v4 = vor.u32 %v1352_v54, %v1349_v42  ;;  %v1362_v27 = vrot.slane %v1360_v47, 4  ;;  %v2326_v18 = vshrl.u32 %v2280_v7, 16  ;;  %v5369_v44 = vld [vmem:[#allocation2 + $0x20] sm:$0x1]  ;;  %v5378_v59 = vld [vmem:[#allocation2 + $0x28] sm:$0xf] }
 0x318   : > { %v2324_v11 = vsel %vm5322_vm14, %v2319_v55, %v2323_v49  ;;  %v1368_v12 = vrot.slane %v1366_v61, 5  ;;  %v2329_v19 = vshll.u32 %v2280_v7, 16  ;;  %v2335_v22 = vshll.u32 %v5344_v5, 16  ;;  %v2283_v49 = vld [vmem:[#allocation2 + $0x24] sm:$0xf] }
 0x319   : > { %v4179_v62 = vcombine.low %v2314_v60, %v2324_v11  ;;  %v1354_v16 = vrot.slane %v1353_v4, 4  ;;  %v1363_v20 = vor.u32 %v1362_v27, %v1358_v6  ;;  %v2339_v23 = vshrl.u32 %v5344_v5, 16  ;;  %v5387_v11 = vld [vmem:[#allocation2 + $0x24] sm:$0xf] }
 0x31a   : > { %v2345_v26 = vshll.u32 %v5346_v8, 16  ;;  %v2328_v10 = vrot.slane %v2326_v18, 4  ;;  %v2331_v29 = vrot.slane %v2329_v19, 5  ;;  %v2700_v21 = vrot.slane %v5344_v5, 5  ;;  %v5390_v18 = vld [vmem:[#allocation2 + $0x28] sm:$0xf] }
 0x31b   : > { %4509 = vmatprep.mubr.msk.bf16.mxu0 %vm1540_vm9, %v4179_v62  ;;  %v1359_v28 = vsel %vm5322_vm14, %v1354_v16, %v1358_v6  ;;  %v1364_v48 = vrot.slane %v1363_v20, 4  ;;  %v2337_v33 = vrot.slane %v2335_v22, 5  ;;  %v2341_v34 = vrot.slane %v2339_v23, 4  ;;  %v5383_v6 = vld [vmem:[#allocation2 + $0x2c] sm:$0x1] }
 0x31c   : > { %v2347_v31 = vrot.slane %v2345_v26, 5  ;;  %v2332_v38 = vor.u32 %v2331_v29, %v2328_v10  ;;  %v5364_v17 = vrot.slane %v2700_v21, 4  ;;  %v2703_v40 = vrot.slane %v5346_v8, 5  ;;  %v5397_v23 = vld [vmem:[%s6127_s6 + $0xc] sm:$0x3] }
 0x31d   : > { %v2798_v43 = vsel %vm1565_vm0, %v5312_v37, 0  ;;  %v1369_v41 = vsel %vm5322_vm14, %v1364_v48, %v1368_v12  ;;  %v2342_v36 = vor.u32 %v2341_v34, %v2337_v33  ;;  %v1371_v45 = vshrl.u32 %v5358_v32, 16 }
 0x31e   : > { %v1374_v46 = vshll.u32 %v5358_v32, 16  ;;  %v4105_v1 = vcombine.low %v1359_v28, %v1369_v41  ;;  %v2333_v51 = vrot.slane %v2332_v38, 4  ;;  %v1380_v52 = vshll.u32 %v5360_v0, 16  ;;  %v5404_v38 = vld [vmem:[#allocation2 + $0x2c] sm:$0x1] }
 0x31f   : > { %v1384_v53 = vshrl.u32 %v5360_v0, 16  ;;  %v2343_v56 = vrot.slane %v2342_v36, 4  ;;  %v1373_v57 = vrot.slane %v1371_v45, 4  ;;  %v1390_v58 = vshll.u32 %v5369_v44, 16  ;;  %v2286_v41 = vld [vmem:[#allocation2 + $0x30] sm:$0xf] }
 0x320   : > { %v1376_v37 = vrot.slane %v1374_v46, 5  ;;  %4438 = vmatmul.mubr.msk.bf16.vlgmr.msra.gmra.mrb[0].mxu1 %vm1540_vm9, %v4105_v1  ;;  %v2338_v42 = vsel %vm5322_vm14, %v2333_v51, %v2337_v33  ;;  %v1382_v54 = vrot.slane %v1380_v52, 5  ;;  %v2350_v47 = vshrl.u32 %v2283_v49, 16 }
 0x321   : > { %v1386_v55 = vrot.slane %v1384_v53, 4  ;;  %4454 = vmatpush3.bf16.msra.mxu1 %v1731_v9  ;;  %v2348_v61 = vsel %vm5322_vm14, %v2343_v56, %v2347_v31  ;;  %v1392_v60 = vrot.slane %v1390_v58, 5  ;;  %v2353_v4 = vshll.u32 %v2283_v49, 16  ;;  %v5412_v53 = vld [vmem:[#allocation2 + $0x34] sm:$0xf] }
 0x322   : > { %v1377_v7 = vor.u32 %v1376_v37, %v1373_v57  ;;  %v4180_v27 = vcombine.low %v2338_v42, %v2348_v61  ;;  %v2352_v62 = vrot.slane %v2350_v47, 4  ;;  %v2359_v16 = vshll.u32 %v5378_v59, 16  ;;  %v5415_v58 = vld [vmem:[#allocation2 + $0x38] sm:$0x1] }
 0x323   : > { %v1387_v12 = vor.u32 %v1386_v55, %v1382_v54  ;;  %v2355_v20 = vrot.slane %v2353_v4, 5  ;;  %v2363_v22 = vshrl.u32 %v5378_v59, 16  ;;  %v2369_v9 = vshll.u32 %v5383_v6, 16 }
 0x324   : > { %v1378_v19 = vrot.slane %v1377_v7, 4  ;;  %4510 = vmatmul.mubr.msk.bf16.vlgmr.msra.gmra.mrb[0].mxu0 %vm1540_vm9, %v4180_v27  ;;  %v2361_v28 = vrot.slane %v2359_v16, 5  ;;  %v1395_v10 = vshrl.u32 %v5387_v11, 16  ;;  %v1398_v29 = vshll.u32 %v5387_v11, 16  ;;  %v5420_v7 = vld [vmem:[#allocation2 + $0x30] sm:$0xf] }
 0x325   : > { %v1388_v26 = vrot.slane %v1387_v12, 4  ;;  %4526 = vmatpush3.bf16.msra.mxu0 %v2798_v43  ;;  %v2356_v33 = vor.u32 %v2355_v20, %v2352_v62  ;;  %v2365_v34 = vrot.slane %v2363_v22, 4  ;;  %v2371_v31 = vrot.slane %v2369_v9, 5  ;;  %v5426_v62 = vld [vmem:[%s6127_s6 + $0x4] sm:$0x3] }
 0x326   : > { %v1383_v48 = vsel %vm5322_vm14, %v1378_v19, %v1382_v54  ;;  %v1397_v45 = vrot.slane %v1395_v10, 4  ;;  %v1400_v46 = vrot.slane %v1398_v29, 5  ;;  %v1404_v49 = vshll.u32 %v5390_v18, 16  ;;  %4738 = vmatprep.subr.msk.bf16.mxu0 %vm1565_vm0, %v5397_v23  ;;  %v5431_v9 = vld [vmem:[#allocation2 + $0x34] sm:$0xf]  ;;  %4733 = vmatprep.subr.msk.bf16.mxu1 %vm1565_vm0, %v5426_v62 }
 0x327   : > { %v1393_v36 = vsel %vm5322_vm14, %v1388_v26, %v1392_v60  ;;  %v2357_v1 = vrot.slane %v2356_v33, 4  ;;  %v2366_v51 = vor.u32 %v2365_v34, %v2361_v28  ;;  %v1408_v52 = vshrl.u32 %v5390_v18, 16 }
 0x328   : > { %v4106_v43 = vcombine.low %v1383_v48, %v1393_v36  ;;  %v1401_v56 = vor.u32 %v1400_v46, %v1397_v45  ;;  %v1406_v57 = vrot.slane %v1404_v49, 5  ;;  %v1414_v37 = vshll.u32 %v5404_v38, 16  ;;  %v5440_v36 = vld [vmem:[#allocation2 + $0x38] sm:$0x1] }
 0x329   : > { %v2374_v42 = vshrl.u32 %v2286_v41, 16  ;;  %v2362_v54 = vsel %vm5322_vm14, %v2357_v1, %v2361_v28  ;;  %v2367_v55 = vrot.slane %v2366_v51, 4  ;;  %v1410_v47 = vrot.slane %v1408_v52, 4 }
 0x32a   : > { %4441 = vmatprep.mubr.msk.bf16.mxu1 %vm1540_vm9, %v4106_v43  ;;  %v2377_v61 = vshll.u32 %v2286_v41, 16  ;;  %v1402_v60 = vrot.slane %v1401_v56, 4  ;;  %v1416_v4 = vrot.slane %v1414_v37, 5  ;;  %v2383_v12 = vshll.u32 %v5412_v53, 16  ;;  %v2659_v56 = vld [vmem:[#allocation2 + $0xc] sm:$0xe] }
 0x32b   : > { %v2376_v27 = vrot.slane %v2374_v42, 4  ;;  %v2372_v16 = vsel %vm5322_vm14, %v2367_v55, %v2371_v31  ;;  %v1411_v19 = vor.u32 %v1410_v47, %v1406_v57  ;;  %v2387_v22 = vshrl.u32 %v5412_v53, 16  ;;  %v5447_v55 = vld [vmem:[#allocation2 + $0x3c] sm:$0xf] }
 0x32c   : > { %v2379_v20 = vrot.slane %v2377_v61, 5  ;;  %v4181_v26 = vcombine.low %v2362_v54, %v2372_v16  ;;  %v1407_v28 = vsel %vm5322_vm14, %v1402_v60, %v1406_v57  ;;  %v2385_v10 = vrot.slane %v2383_v12, 5  ;;  %v5453_v16 = vld [vmem:[#allocation2 + $0x40] sm:$0xf] }
 0x32d   : > { %v2393_v29 = vshll.u32 %v5415_v58, 16  ;;  %v1412_v48 = vrot.slane %v1411_v19, 4  ;;  %v2389_v34 = vrot.slane %v2387_v22, 4  ;;  %v1419_v31 = vshrl.u32 %v5420_v7, 16  ;;  %v5455_v19 = vld [vmem:[#allocation2 + $0x44] sm:$0x1] }
 0x32e   : > { %v2380_v33 = vor.u32 %v2379_v20, %v2376_v27  ;;  %4513 = vmatprep.mubr.msk.bf16.mxu0 %vm1540_vm9, %v4181_v26  ;;  %v1422_v45 = vshll.u32 %v5420_v7, 16  ;;  %v1428_v46 = vshll.u32 %v5431_v9, 16  ;;  %v1432_v49 = vshrl.u32 %v5431_v9, 16 }
 0x32f   : > { %v2395_v41 = vrot.slane %v2393_v29, 5  ;;  %v1417_v43 = vsel %vm5322_vm14, %v1412_v48, %v1416_v4  ;;  %v2390_v51 = vor.u32 %v2389_v34, %v2385_v10  ;;  %v1421_v52 = vrot.slane %v1419_v31, 4  ;;  %v2660_v29 = vld [vmem:[#allocation2 + $0x18] sm:$0xe] }
 0x330   : > { %v2381_v1 = vrot.slane %v2380_v33, 4  ;;  %v4107_v57 = vcombine.low %v1407_v28, %v1417_v43  ;;  %v1424_v37 = vrot.slane %v1422_v45, 5  ;;  %v1430_v42 = vrot.slane %v1428_v46, 5 }
 0x331   : > { %v1434_v54 = vrot.slane %v1432_v49, 4  ;;  %v2391_v61 = vrot.slane %v2390_v51, 4  ;;  %v1438_v60 = vshll.u32 %v5440_v36, 16  ;;  %vm1854_vm10 = vcmask 1042432  }
 0x332   : > { %v2386_v47 = vsel %vm5322_vm14, %v2381_v1, %v2385_v10  ;;  %4442 = vmatmul.mubr.msk.bf16.gmra.mrb[4].mxu1 %vm1540_vm9, %v4107_v57  ;;  %v1425_v4 = vor.u32 %v1424_v37, %v1421_v52  ;;  %vm1855_vm11 = vcmask 1046532   ;;  %v4195_v12 = vrot.slane %v2659_v56, 9  ;;  %v5478_v1 = vld [vmem:[#allocation2 + $0x4c] sm:$0xf]  ;;  %v5487_v37 = vld [vmem:[#allocation2 + $0x50] sm:$0x1] }
 0x333   : > { %v1435_v27 = vor.u32 %v1434_v54, %v1430_v42  ;;  %v2396_v20 = vsel %vm5322_vm14, %v2391_v61, %v2395_v41  ;;  %v1440_v22 = vrot.slane %v1438_v60, 5  ;;  %vm5459_vm12 = vmor %vm1854_vm10, %vm1855_vm11  ;;  %v2695_v28 = vrot.slane %v2693_v63, 4  ;;  %v5470_v41 = vld [vmem:[#allocation2 + $0x48] sm:$0xf] }
 0x334   : > { %v1443_v10 = vshrl.u32 %v5447_v55, 16  ;;  %v4182_v48 = vcombine.low %v2386_v47, %v2396_v20  ;;  %v1426_v33 = vrot.slane %v1425_v4, 4  ;;  %v2694_v31 = vsel %vm5459_vm12, %v4195_v12, %v2693_v63 }
 0x335   : > { %v1436_v34 = vrot.slane %v1435_v27, 4  ;;  %v2697_v45 = vsel %vm5459_vm12, %v2695_v28, %v2696_v3  ;;  %v1446_v49 = vshll.u32 %v5447_v55, 16  ;;  %v1452_v43 = vshll.u32 %v5453_v16, 16 }
 0x336   : > { %v1445_v46 = vrot.slane %v1443_v10, 4  ;;  %4514 = vmatmul.mubr.msk.bf16.gmra.mrb[4].mxu0 %vm1540_vm9, %v4182_v48  ;;  %v1431_v25 = vsel %vm5322_vm14, %v1426_v33, %v1430_v42  ;;  %v4204_v51 = vcombine.low %v2694_v31, %v2697_v45  ;;  %v1456_v30 = vshrl.u32 %v5453_v16, 16  ;;  %v5506_v48 = vld [vmem:[#allocation2 + $0x54] sm:$0xf]  ;;  %v5508_v33 = vld [vmem:[#allocation2 + $0x58] sm:$0xf] }
 0x337   : > { %v1441_v63 = vsel %vm5322_vm14, %v1436_v34, %v1440_v22  ;;  %v1448_v3 = vrot.slane %v1446_v49, 5  ;;  %v1454_v56 = vrot.slane %v1452_v43, 5  ;;  %v1462_v57 = vshll.u32 %v5455_v19, 16 }
 0x338   : > { %v4108_v52 = vcombine.low %v1431_v25, %v1441_v63  ;;  %4527 = vmatprep.mubr.msk.bf16.mxu0 %vm1540_vm9, %v4204_v51  ;;  %v1458_v54 = vrot.slane %v1456_v30, 4  ;;  %v4196_v47 = vrot.slane %v2660_v29, 9  ;;  %v2704_v42 = vsel %vm5459_vm12, %v5364_v17, %v2703_v40  ;;  %v2661_v40 = vld [vmem:[#allocation2 + $0x24] sm:$0xe]  ;;  %v5517_v25 = vld [vmem:[%s6127_s6 + $0xe] sm:$0x3] }
 0x339   : > { %v2997_v61 = vsel %vm1565_vm0, %v5397_v23, 0  ;;  %v1449_v60 = vor.u32 %v1448_v3, %v1445_v46  ;;  %v1464_v4 = vrot.slane %v1462_v57, 5  ;;  %v1467_v27 = vshrl.u32 %v5470_v41, 16  ;;  %v5523_v3 = vld [vmem:[#allocation2 + $0x5c] sm:$0x1] }
 0x33a   : > { %4445 = vmatprep.mubr.msk.bf16.mxu1 %vm1540_vm9, %v4108_v52  ;;  %v1470_v12 = vshll.u32 %v5470_v41, 16  ;;  %v1459_v20 = vor.u32 %v1458_v54, %v1454_v56  ;;  %v2701_v8 = vsel %vm5459_vm12, %v4196_v47, %v2700_v21  ;;  %v1476_v22 = vshll.u32 %v5478_v1, 16  ;;  %v2662_v47 = vld [vmem:[#allocation2 + $0x30] sm:$0xe] }
 0x33b   : > { %v1480_v17 = vshrl.u32 %v5478_v1, 16  ;;  %v1450_v23 = vrot.slane %v1449_v60, 4  ;;  %v4205_v28 = vcombine.low %v2701_v8, %v2704_v42  ;;  %v1469_v10 = vrot.slane %v1467_v27, 4 }
 0x33c   : > { %v1472_v29 = vrot.slane %v1470_v12, 5  ;;  %v1460_v34 = vrot.slane %v1459_v20, 4  ;;  %v1478_v31 = vrot.slane %v1476_v22, 5  ;;  %v1486_v5 = vshll.u32 %v5487_v37, 16  ;;  %v5530_v12 = vld [vmem:[#allocation2 + $0x40] sm:$0xf] }
 0x33d   : > { %v1482_v45 = vrot.slane %v1480_v17, 4  ;;  %v1455_v21 = vsel %vm5322_vm14, %v1450_v23, %v1454_v56  ;;  %v4197_v49 = vrot.slane %v2661_v40, 9  ;;  %v2707_v43 = vrot.slane %v5378_v59, 5 }
 0x33e   : > { %v1473_v46 = vor.u32 %v1472_v29, %v1469_v10  ;;  %v1465_v63 = vsel %vm5322_vm14, %v1460_v34, %v1464_v4  ;;  %4528 = vmatmul.mubr.msk.bf16.vlgmr.msra.gmra.mrb[0].mxu0 %vm1540_vm9, %v4205_v28  ;;  %v1488_v30 = vrot.slane %v1486_v5, 5  ;;  %v2710_v52 = vrot.slane %v5383_v6, 5  ;;  %v5543_v28 = vld [vmem:[#allocation2 + $0x44] sm:$0x1]  ;;  %v2663_v10 = vld [vmem:[#allocation2 + $0x3c] sm:$0xe] }
 0x33f   : > { %v1483_v51 = vor.u32 %v1482_v45, %v1478_v31  ;;  %v4109_v56 = vcombine.low %v1455_v21, %v1465_v63  ;;  %4544 = vmatpush3.bf16.msra.mxu0 %v2997_v61  ;;  %v2708_v59 = vsel %vm5459_vm12, %v4197_v49, %v2707_v43  ;;  %v2709_v54 = vrot.slane %v2707_v43, 4 }
 0x340   : > { %v1474_v57 = vrot.slane %v1473_v46, 4  ;;  %v1491_v60 = vshrl.u32 %v5506_v48, 16  ;;  %v1494_v4 = vshll.u32 %v5506_v48, 16  ;;  %v1500_v27 = vshll.u32 %v5508_v33, 16  ;;  %4739 = vmatprep.subr.msk.bf16.mxu0 %vm1565_vm0, %v5517_v25 }
 0x341   : > { %v1484_v42 = vrot.slane %v1483_v51, 4  ;;  %4446 = vmatmul.mubr.msk.bf16.gmra.mrb[8].mxu1 %vm1540_vm9, %v4109_v56  ;;  %v2711_v61 = vsel %vm5459_vm12, %v2709_v54, %v2710_v52  ;;  %v1504_v20 = vshrl.u32 %v5508_v33, 16  ;;  %v1510_v8 = vshll.u32 %v5523_v3, 16 }
 0x342   : > { %v1479_v6 = vsel %vm5322_vm14, %v1474_v57, %v1478_v31  ;;  %v4206_v17 = vcombine.low %v2708_v59, %v2711_v61  ;;  %v1493_v40 = vrot.slane %v1491_v60, 4  ;;  %v1496_v23 = vrot.slane %v1494_v4, 5  ;;  %v5561_v60 = vld [vmem:[#allocation2 + $0x50] sm:$0x1]  ;;  %v2664_v4 = vld [vmem:[#allocation2 + $0x48] sm:$0xe] }
 0x343   : > { %v1489_v22 = vsel %vm5322_vm14, %v1484_v42, %v1488_v30  ;;  %v1502_v34 = vrot.slane %v1500_v27, 5  ;;  %v1506_v45 = vrot.slane %v1504_v20, 4  ;;  %v1512_v31 = vrot.slane %v1510_v8, 5  ;;  %v5559_v42 = vld [vmem:[#allocation2 + $0x4c] sm:$0xf] }
 0x344   : > { %v4110_v29 = vcombine.low %v1479_v6, %v1489_v22  ;;  %4531 = vmatprep.mubr.msk.bf16.mxu0 %vm1540_vm9, %v4206_v17  ;;  %v1497_v5 = vor.u32 %v1496_v23, %v1493_v40  ;;  %v4198_v21 = vrot.slane %v2662_v47, 9  ;;  %v2714_v46 = vrot.slane %v5412_v53, 5  ;;  %v5569_v8 = vld [vmem:[#allocation2 + $0x58] sm:$0xf]  ;;  %v2665_v22 = vld [vmem:[#allocation2 + $0x54] sm:$0xe] }
 0x345   : > { %v2717_v49 = vrot.slane %v5415_v58, 5  ;;  %v1507_v43 = vor.u32 %v1506_v45, %v1502_v34  ;;  %v4199_v63 = vrot.slane %v2663_v10, 9  ;;  %v2721_v51 = vrot.slane %v5530_v12, 5  ;;  %v5571_v23 = vld [vmem:[#allocation2 + $0x5c] sm:$0x1] }
 0x346   : > { %4449 = vmatprep.mubr.msk.bf16.mxu1 %vm1540_vm9, %v4110_v29  ;;  %v2724_v30 = vrot.slane %v5543_v28, 5  ;;  %v1498_v52 = vrot.slane %v1497_v5, 4  ;;  %v2715_v56 = vsel %vm5459_vm12, %v4198_v21, %v2714_v46  ;;  %v2716_v57 = vrot.slane %v2714_v46, 4  ;;  %6148 = vst [vmem:[#allocation3_spill] sm:$0xff] %v5571_v23  ;;  %v5576_v45 = vld [vmem:[#allocation2 + $0x64] sm:$0xf] }
 0x347   : > { %v1508_v59 = vrot.slane %v1507_v43, 4  ;;  %v2722_v54 = vsel %vm5459_vm12, %v4199_v63, %v2721_v51  ;;  %v2723_v53 = vrot.slane %v2721_v51, 4  ;;  %v4120_v61 = vcombine.low %v5288_v14, %v5290_v13  ;;  %6149 = vst [vmem:[#allocation4_spill] sm:$0xff] %v5576_v45  ;;  %v5581_v5 = vld [vmem:[#allocation2 + $0x68] sm:$0x1] }
 0x348   : > { %v1503_v58 = vsel %vm5322_vm14, %v1498_v52, %v1502_v34  ;;  %v2718_v47 = vsel %vm5459_vm12, %v2716_v57, %v2717_v49  ;;  %v4200_v10 = vrot.slane %v2664_v4, 9  ;;  %v2728_v29 = vrot.slane %v5559_v42, 5  ;;  %6150 = vst [vmem:[#allocation5_spill] sm:$0xff] %v5581_v5  ;;  %v2666_v21 = vld [vmem:[#allocation2 + $0x60] sm:$0xe] }
 0x349   : > { %v1513_v27 = vsel %vm5322_vm14, %v1508_v59, %v1512_v31  ;;  %v4207_v6 = vcombine.low %v2715_v56, %v2718_v47  ;;  %v2725_v20 = vsel %vm5459_vm12, %v2723_v53, %v2724_v30  ;;  %v2731_v34 = vrot.slane %v5561_v60, 5  ;;  %v1831_v59 = vld [vmem:[#allocation2 + $0xc] sm:$0xe] }
 0x34a   : > { %v4111_v17 = vcombine.low %v1503_v58, %v1513_v27  ;;  %v4208_v40 = vcombine.low %v2722_v54, %v2725_v20  ;;  %v4201_v14 = vrot.slane %v2665_v22, 9  ;;  %v2735_v31 = vrot.slane %v5569_v8, 5  ;;  %v1832_v54 = vld [vmem:[#allocation2 + $0x18] sm:$0xe]  ;;  %v1833_v22 = vld [vmem:[#allocation2 + $0x24] sm:$0xe] }
 0x34b   : > { %4532 = vmatmul.mubr.msk.bf16.gmra.mrb[4].mxu0 %vm1540_vm9, %v4207_v6  ;;  %v2729_v46 = vsel %vm5459_vm12, %v4200_v10, %v2728_v29  ;;  %v2730_v49 = vrot.slane %v2728_v29, 4  ;;  %v2738_v43 = vrot.slane %v5571_v23, 5  ;;  %v1866_v30 = vrot.slane %v5326_v24, 5  ;;  %v1834_v29 = vld [vmem:[#allocation2 + $0x30] sm:$0xe] }
 0x34c   : > { %4450 = vmatmul.mubr.msk.bf16.gmra.mrb[12].mxu1 %vm1540_vm9, %v4111_v17  ;;  %4535 = vmatprep.mubr.msk.bf16.mxu0 %vm1540_vm9, %v4208_v40  ;;  %v2736_v63 = vsel %vm5459_vm12, %v4201_v14, %v2735_v31  ;;  %v2737_v51 = vrot.slane %v2735_v31, 4  ;;  %v4121_v52 = vcombine.low %v5318_v39, %v5326_v24  ;;  %v2742_v57 = vrot.slane %v5576_v45, 5  ;;  %v5607_v17 = vld [vmem:[%s6127_s6 + $0x6] sm:$0x3]  ;;  %v5849_v23 = vld [vmem:[#allocation2 + $0x70] sm:$0xf] }
 0x34d   : > { %4455 = vmatprep.mubr.msk.bf16.mxu1 %vm1540_vm9, %v4120_v61  ;;  %v2732_v56 = vsel %vm5459_vm12, %v2730_v49, %v2731_v34  ;;  %v4202_v47 = vrot.slane %v2666_v21, 9  ;;  %v2745_v4 = vrot.slane %v5581_v5, 5  ;;  %v1869_v27 = vrot.slane %v5328_v50, 5 }
 0x34e   : > { %v4209_v53 = vcombine.low %v2729_v46, %v2732_v56  ;;  %v2739_v58 = vsel %vm5459_vm12, %v2737_v51, %v2738_v43  ;;  %v4122_v6 = vcombine.low %v5358_v32, %v5360_v0  ;;  %v2744_v24 = vrot.slane %v2742_v57, 4 }
 0x34f   : > { %v4210_v39 = vcombine.low %v2736_v63, %v2739_v58  ;;  %v1964_v61 = vsel %vm1565_vm0, %v5426_v62, 0  ;;  %v4137_v20 = vrot.slane %v1831_v59, 9  ;;  %v1868_v40 = vrot.slane %v1866_v30, 4  ;;  %v1835_v58 = vld [vmem:[#allocation2 + $0x3c] sm:$0xe] }
 0x350   : > { %v4138_v10 = vrot.slane %v1832_v54, 9  ;;  %v2743_v50 = vsel %vm5459_vm12, %v4202_v47, %v2742_v57  ;;  %v2746_v32 = vsel %vm5459_vm12, %v2744_v24, %v2745_v4  ;;  %v1873_v14 = vrot.slane %v5360_v0, 5 }
 0x351   : > { %v5617_v62 = vsel %vm5459_vm12, %v4137_v20, %v1866_v30  ;;  %v5622_v34 = vsel %vm5459_vm12, %v1868_v40, %v1869_v27  ;;  %v1876_v31 = vrot.slane %v5369_v44, 5  ;;  %v4139_v21 = vrot.slane %v1833_v22, 9  ;;  %v4794_v40 = vld [vmem:[#allocation2 + $0x24] sm:$0xff]  }
 0x352   : > { %v4123_v46 = vcombine.low %v5387_v11, %v5390_v18  ;;  %v1880_v43 = vrot.slane %v5390_v18, 5  ;;  %v1883_v63 = vrot.slane %v5404_v38, 5  ;;  %v4211_v51 = vcombine.low %v2743_v50, %v2746_v32  ;;  %v1830_v38 = vld [vmem:[#allocation2] sm:$0xe] }
 0x353   : > { %4536 = vmatmul.mubr.msk.bf16.gmra.mrb[8].mxu0 %vm1540_vm9, %v4209_v53  ;;  %v5636_v0 = vsel %vm5459_vm12, %v4138_v10, %v1873_v14  ;;  %v1875_v44 = vrot.slane %v1873_v14, 4  ;;  %v4140_v30 = vrot.slane %v1834_v29, 9  ;;  %v1887_v57 = vrot.slane %v5431_v9, 5  ;;  %v3112_v10 = vld [vmem:[#allocation2 + $0x18] sm:$0xf] }
 0x354   : > { %4456 = vmatmul.mubr.msk.bf16.vlgmr.msra.gmra.mrb[0].mxu1 %vm1540_vm9, %v4121_v52  ;;  %4539 = vmatprep.mubr.msk.bf16.mxu0 %vm1540_vm9, %v4210_v39  ;;  %v4792_v52 = vld [vmem:[#allocation2 + $0x18] sm:$0xff]   ;;  %v5640_v11 = vsel %vm5459_vm12, %v4139_v21, %v1880_v43  ;;  %v1882_v56 = vrot.slane %v1880_v43, 4  ;;  %v1890_v59 = vrot.slane %v5440_v36, 5  ;;  %v4124_v18 = vcombine.low %v5420_v7, %v5431_v9 }
 0x355   : > { %4472 = vmatpush3.bf16.msra.mxu1 %v1964_v61  ;;  %4459 = vmatprep.mubr.msk.bf16.mxu1 %vm1540_vm9, %v4122_v6  ;;  %v1859_v54 = vrot.slane %v5290_v13, 5  ;;  %v5649_v53 = vsel %vm5459_vm12, %v1875_v44, %v1876_v31  ;;  %v5659_v36 = vsel %vm5459_vm12, %v4140_v30, %v1887_v57  ;;  %v1889_v7 = vrot.slane %v1887_v57, 4  ;;  %v5682_v14 = vld [vmem:[#allocation2 + $0x1c] sm:$0xf]  ;;  %v1836_v31 = vld [vmem:[#allocation2 + $0x48] sm:$0xe] }
 0x356   : > { %4734 = vmatprep.subr.msk.bf16.mxu1 %vm1565_vm0, %v5607_v17  ;;  %v5655_v4 = vsel %vm5459_vm12, %v1882_v56, %v1883_v63  ;;  %v4141_v27 = vrot.slane %v1835_v58, 9  ;;  %v4136_v6 = vrot.slane %v1830_v38, 9  ;;  %v1894_v24 = vrot.slane %v5453_v16, 5  ;;  %v5704_v44 = vld [vmem:[%s6127_s6 + $0x10] sm:$0x3] }
 0x357   : > { %v5668_v9 = vsel %vm5459_vm12, %v1889_v7, %v1890_v59  ;;  %v1897_v61 = vrot.slane %v5455_v19, 5  ;;  %v1862_v20 = vrot.slane %v5293_v15, 5  ;;  %v1861_v22 = vrot.slane %v1859_v54, 4  ;;  %v4796_v19 = vld [vmem:[#allocation2 + $0x30] sm:$0xff]   ;;  %v3115_v57 = vld [vmem:[#allocation2 + $0x24] sm:$0xf] }
 0x358   : > { %v5678_v50 = vsel %vm5459_vm12, %v4141_v27, %v1894_v24  ;;  %v1896_v32 = vrot.slane %v1894_v24, 4  ;;  %v4125_v29 = vcombine.low %v5447_v55, %v5453_v16  ;;  %v3379_v21 = vsel %vm1565_vm0, %v5517_v25, 0  ;;  %v5711_v59 = vld [vmem:[#allocation2 + $0x28] sm:$0xf]  ;;  %v1837_v27 = vld [vmem:[#allocation2 + $0x54] sm:$0xe] }
 0x359   : > { %v4126_v15 = vcombine.low %v5470_v41, %v5478_v1  ;;  %v1863_v55 = vsel %vm5459_vm12, %v1861_v22, %v1862_v20  ;;  %v3137_v16 = vshrl.u32 %v3112_v10, 16  ;;  %v3140_v63 = vshll.u32 %v3112_v10, 16  ;;  %v4799_v10 = vld [vmem:[#allocation2 + $0x48] sm:$0xff]  }
 0x35a   : > { %v5692_v43 = vsel %vm5459_vm12, %v1896_v32, %v1897_v61  ;;  %v3146_v41 = vshll.u32 %v5682_v14, 16  ;;  %v3150_v25 = vshrl.u32 %v5682_v14, 16  ;;  %v4142_v30 = vrot.slane %v1836_v31, 9 }
 0x35b   : > { %4540 = vmatmul.mubr.msk.bf16.gmra.mrb[12].mxu0 %vm1540_vm9, %v4211_v51  ;;  %v1904_v56 = vrot.slane %v5487_v37, 5  ;;  %v3139_v7 = vrot.slane %v3137_v16, 4  ;;  %v3118_v37 = vld [vmem:[#allocation2 + $0x30] sm:$0xf]  ;;  %v3142_v24 = vrot.slane %v3140_v63, 5  ;;  %v3161_v32 = vshrl.u32 %v3115_v57, 16 }
 0x35c   : > { %4460 = vmatmul.mubr.msk.bf16.gmra.mrb[4].mxu1 %vm1540_vm9, %v4123_v46  ;;  %4545 = vmatprep.mubr.msk.bf16.mxu0 %vm1540_vm9, %v4792_v52  ;;  %v1860_v46 = vsel %vm5459_vm12, %v4136_v6, %v1859_v54  ;;  %v1901_v52 = vrot.slane %v5478_v1, 5  ;;  %v2431_v54 = vshll.u32 %v5559_v42, 16  ;;  %v4127_v1 = vcombine.low %v5506_v48, %v5508_v33  ;;  %v4798_v6 = vld [vmem:[#allocation2 + $0x3c] sm:$0xff]   ;;  %v3124_v51 = vld [vmem:[#allocation2 + $0x48] sm:$0xf] }
 0x35d   : > { %4463 = vmatprep.mubr.msk.bf16.mxu1 %vm1540_vm9, %v4124_v18  ;;  %v4145_v58 = vcombine.low %v1860_v46, %v1863_v55  ;;  %v5722_v61 = vrot.slane %v3146_v41, 5  ;;  %v3152_v20 = vrot.slane %v3150_v25, 4  ;;  %v5730_v48 = vld [vmem:[#allocation2 + $0x20] sm:$0x1]  ;;  %v3170_v31 = vshll.u32 %v5711_v59, 16 }
 0x35e   : > { %v5715_v18 = vsel %vm5459_vm12, %v4142_v30, %v1901_v52  ;;  %v1903_v38 = vrot.slane %v1901_v52, 4  ;;  %v3188_v46 = vshll.u32 %v3118_v37, 16  ;;  %v4143_v55 = vrot.slane %v1837_v27, 9  ;;  %v5751_v27 = vld [vmem:[#allocation2 + $0x2c] sm:$0x1] }
 0x35f   : > { %v1908_v41 = vrot.slane %v5508_v33, 5  ;;  %v1911_v25 = vrot.slane %v5523_v3, 5  ;;  %v2435_v30 = vshrl.u32 %v5559_v42, 16  ;;  %v3143_v52 = vor.u32 %v3142_v24, %v3139_v7  ;;  %v4800_v42 = vld [vmem:[#allocation2 + $0x54] sm:$0xff]  }
 0x360   : > { %v5726_v22 = vsel %vm5459_vm12, %v1903_v38, %v1904_v56  ;;  %v3153_v56 = vor.u32 %v3152_v20, %v5722_v61  ;;  %v3163_v38 = vrot.slane %v3161_v32, 4  ;;  %v5753_v7 = vrot.slane %v3170_v31, 5  ;;  %v5757_v32 = vld [vmem:[#allocation2 + $0x38] sm:$0x1] }
 0x361   : > { %v5748_v33 = vsel %vm5459_vm12, %v4143_v55, %v1908_v41  ;;  %v1910_v3 = vrot.slane %v1908_v41, 4  ;;  %v3190_v20 = vrot.slane %v3188_v46, 5 }
 0x362   : > { %v3154_v46 = vrot.slane %v3153_v56, 4 }
 0x363   : > { %4546 = vmatmul.mubr.msk.bf16.vlgmr.msra.gmra.mrb[0].mxu0 %vm1540_vm9, %v4794_v40  ;;  %v5728_v40 = vld [vmem:[#allocation2 + $0x34] sm:$0xf]  ;;  %v5763_v41 = vsel %vm5459_vm12, %v1910_v3, %v1911_v25  ;;  %v5776_v3 = vld [vmem:[#allocation2 + $0x4c] sm:$0xf] }
 0x364   : > { %4464 = vmatmul.mubr.msk.bf16.gmra.mrb[8].mxu1 %vm1540_vm9, %v4125_v29  ;;  %4562 = vmatpush3.bf16.msra.mxu0 %v3379_v21  ;;  %v3164_v29 = vshll.u32 %v3115_v57, 16  ;;  %v3194_v16 = vshll.u32 %v5728_v40, 16  ;;  %v3198_v63 = vshrl.u32 %v5728_v40, 16  ;;  %v3156_v57 = vshll.u32 %v5730_v48, 16 }
 0x365   : > { %4467 = vmatprep.mubr.msk.bf16.mxu1 %vm1540_vm9, %v4126_v15  ;;  %4549 = vmatprep.mubr.msk.bf16.mxu0 %vm1540_vm9, %v4796_v19  ;;  %v3174_v15 = vshrl.u32 %v5711_v59, 16  ;;  %v3185_v19 = vshrl.u32 %v3118_v37, 16  ;;  %v3144_v21 = vrot.slane %v3143_v52, 4  ;;  %v3204_v52 = vshll.u32 %v5757_v32, 16 }
 0x366   : > { %4740 = vmatprep.subr.msk.bf16.mxu0 %vm1565_vm0, %v5704_v44  ;;  %v3166_v37 = vrot.slane %v3164_v29, 5  ;;  %v5759_v29 = vrot.slane %v3194_v16, 5  ;;  %v3200_v55 = vrot.slane %v3198_v63, 4  ;;  %v3158_v16 = vrot.slane %v3156_v57, 5 }
 0x367   : > { %v3187_v24 = vrot.slane %v3185_v19, 4  ;;  %v5769_v19 = vld [vmem:[#allocation2 + $0x40] sm:$0xf]  ;;  %v3180_v63 = vshll.u32 %v5751_v27, 16  ;;  %v3233_v57 = vshrl.u32 %v3124_v51, 16 }
 0x368   : > { %v3167_v39 = vor.u32 %v3166_v37, %v3163_v38  ;;  %v3201_v31 = vor.u32 %v3200_v55, %v5759_v29  ;;  %v3218_v49 = vshll.u32 %v5769_v19, 16  ;;  %v3222_v56 = vshrl.u32 %v5769_v19, 16 }
 0x369   : > { %v3236_v38 = vshll.u32 %v3124_v51, 16  ;;  %v6151_v37 = vcombine.low %v5617_v62, %v5622_v34  ;;  %v6152_v51 = vcombine.low %v5636_v0, %v5649_v53  ;;  %v4802_v62 = vld [vmem:[#allocation2 + $0x6c] sm:$0xff]   ;;  %v5806_v0 = vld [vmem:[#allocation2 + $0x44] sm:$0x1] }
 0x36a   : > { %v3168_v34 = vrot.slane %v3167_v39, 4  ;;  %v3224_v53 = vrot.slane %v3222_v56, 4  ;;  %v3235_v39 = vrot.slane %v3233_v57, 4  ;;  %v3130_v57 = vld [vmem:[#allocation2 + $0x60] sm:$0xf] }
 0x36b   : > { %4550 = vmatmul.mubr.msk.bf16.gmra.mrb[4].mxu0 %vm1540_vm9, %v4798_v6  ;;  %v3176_v6 = vrot.slane %v3174_v15, 4  ;;  %v3121_v15 = vld [vmem:[#allocation2 + $0x3c] sm:$0xf] }
 0x36c   : > { %4468 = vmatmul.mubr.msk.bf16.gmra.mrb[12].mxu1 %vm1540_vm9, %v4127_v1  ;;  %4553 = vmatprep.mubr.msk.bf16.mxu0 %vm1540_vm9, %v4799_v10  ;;  %v5755_v1 = vrot.slane %v2431_v54, 5  ;;  %v4801_v10 = vld [vmem:[#allocation2 + $0x60] sm:$0xff]   ;;  %v2162_v54 = vsel %vm1565_vm0, %v5607_v17, 0  ;;  %v3209_v13 = vshrl.u32 %v3121_v15, 16  ;;  %v3212_v47 = vshll.u32 %v3121_v15, 16 }
 0x36d   : > { %4473 = vmatprep.mubr.msk.bf16.mxu1 %vm1540_vm9, %v4145_v58  ;;  %v5765_v58 = vrot.slane %v2435_v30, 4  ;;  %v3177_v25 = vor.u32 %v3176_v6, %v5753_v7  ;;  %v3191_v30 = vor.u32 %v3190_v20, %v3187_v24  ;;  %v3149_v17 = vsel %vm5322_vm14, %v3144_v21, %v5722_v61  ;;  %v3127_v61 = vld [vmem:[#allocation2 + $0x54] sm:$0xf] }
 0x36e   : > { %v3159_v6 = vsel %vm5322_vm14, %v3154_v46, %v3158_v16  ;;  %v3182_v24 = vrot.slane %v3180_v63, 5  ;;  %v3246_v20 = vshrl.u32 %v5776_v3, 16  ;;  %v3202_v15 = vrot.slane %v3201_v31, 4  ;;  %v4811_v63 = vld [vmem:[%s6127_s6 + $0x8] sm:$0x3] }
 0x36f   : > { %v3178_v21 = vrot.slane %v3177_v25, 4  ;;  %v3192_v55 = vrot.slane %v3191_v30, 4  ;;  %v3214_v46 = vrot.slane %v3212_v47, 5  ;;  %v5798_v16 = vrot.slane %v3218_v49, 5  ;;  %v5808_v31 = vld [vmem:[#allocation2 + $0x50] sm:$0x1] }
 0x370   : > { %v3238_v25 = vrot.slane %v3236_v38, 5  ;;  %v3257_v30 = vshrl.u32 %v3127_v61, 16  ;;  %v3248_v49 = vrot.slane %v3246_v20, 4  ;;  %v5825_v20 = vld [vmem:[#allocation2 + $0x64] sm:$0xf] }
 0x373   : > { %4554 = vmatmul.mubr.msk.bf16.gmra.mrb[8].mxu0 %vm1540_vm9, %v4800_v42  ;;  %v3242_v42 = vshll.u32 %v5776_v3, 16 }
 0x374   : > { %4474 = vmatmul.mubr.msk.bf16.vlgmr.msra.gmra.mrb[0].mxu1 %vm1540_vm9, %v6151_v37  ;;  %4557 = vmatprep.mubr.msk.bf16.mxu0 %vm1540_vm9, %v4801_v10  ;;  %v3206_v10 = vrot.slane %v3204_v52, 5  ;;  %v3211_v37 = vrot.slane %v3209_v13, 4  ;;  %v4238_v52 = vcombine.low %v3149_v17, %v3159_v6  ;;  %v3260_v13 = vshll.u32 %v3127_v61, 16 }
 0x375   : > { %4490 = vmatpush3.bf16.msra.mxu1 %v2162_v54  ;;  %4477 = vmatprep.mubr.msk.bf16.mxu1 %vm1540_vm9, %v6152_v51  ;;  %v5804_v54 = vld [vmem:[#allocation2 + $0x58] sm:$0xf]  ;;  %v5810_v47 = vrot.slane %v3242_v42, 5  ;;  %v3173_v51 = vsel %vm5322_vm14, %v3168_v34, %v5753_v7  ;;  %v3197_v17 = vsel %vm5322_vm14, %v3192_v55, %v5759_v29  ;;  %v3228_v42 = vshll.u32 %v5806_v0, 16 }
 0x376   : > { %4736 = vmatprep.subr.msk.bf16.mxu1 %vm1565_vm0, %v4811_v63  ;;  %v3183_v63 = vsel %vm5322_vm14, %v3178_v21, %v3182_v24  ;;  %v3266_v5 = vshll.u32 %v5804_v54, 16  ;;  %v3270_v56 = vshrl.u32 %v5804_v54, 16  ;;  %v3207_v38 = vsel %vm5322_vm14, %v3202_v15, %v3206_v10 }
 0x377   : > { %v3215_v6 = vor.u32 %v3214_v46, %v3211_v37  ;;  %v3225_v7 = vor.u32 %v3224_v53, %v5798_v16  ;;  %v3239_v24 = vor.u32 %v3238_v25, %v3235_v39  ;;  %v3252_v61 = vshll.u32 %v5808_v31, 16  ;;  %v5840_v37 = vld [vmem:[#allocation2 + $0x5c] sm:$0x1] }
 0x378   : > { %v3259_v34 = vrot.slane %v3257_v30, 4  ;;  %v6153_v21 = vcombine.low %v5640_v11, %v5655_v4  ;;  %v3249_v29 = vor.u32 %v3248_v49, %v5810_v47  ;;  %v3262_v55 = vrot.slane %v3260_v13, 5 }
 0x379   : > { %v3281_v10 = vshrl.u32 %v3130_v57, 16  ;;  %v3284_v15 = vshll.u32 %v3130_v57, 16  ;;  %v5842_v46 = vrot.slane %v3266_v5, 5  ;;  %v3272_v53 = vrot.slane %v3270_v56, 4  ;;  %v3133_v57 = vld [vmem:[#allocation2 + $0x6c] sm:$0xf] }
 0x37a   : > { %v3290_v11 = vshll.u32 %v5825_v20, 16  ;;  %v3294_v4 = vshrl.u32 %v5825_v20, 16  ;;  %v4239_v39 = vcombine.low %v3173_v51, %v3183_v63  ;;  %v3633_v25 = vsel %vm1565_vm0, %v5704_v44, 0 }
 0x37b   : > { %4558 = vmatmul.mubr.msk.bf16.gmra.mrb[12].mxu0 %vm1540_vm9, %v4802_v62  ;;  %v6154_v62 = vcombine.low %v5659_v36, %v5668_v9  ;;  %v4240_v30 = vcombine.low %v3197_v17, %v3207_v38  ;;  %v3216_v49 = vrot.slane %v3215_v6, 4  ;;  %v3226_v13 = vrot.slane %v3225_v7, 4  ;;  %v5857_v6 = vld [vmem:[#allocation2 + $0x68] sm:$0x1] }
 0x37c   : > { %4478 = vmatmul.mubr.msk.bf16.gmra.mrb[4].mxu1 %vm1540_vm9, %v6153_v21  ;;  %4563 = vmatprep.mubr.msk.bf16.mxu0 %vm1540_vm9, %v4238_v52  ;;  %v3230_v52 = vrot.slane %v3228_v42, 5  ;;  %v3240_v36 = vrot.slane %v3239_v24, 4  ;;  %v3254_v9 = vrot.slane %v3252_v61, 5  ;;  %v3250_v21 = vrot.slane %v3249_v29, 4 }
 0x37d   : > { %4481 = vmatprep.mubr.msk.bf16.mxu1 %vm1540_vm9, %v6154_v62  ;;  %v3276_v5 = vshll.u32 %v5840_v37, 16  ;;  %v3283_v62 = vrot.slane %v3281_v10, 4  ;;  %v3286_v56 = vrot.slane %v3284_v15, 5  ;;  %v3263_v45 = vor.u32 %v3262_v55, %v3259_v34 }
 0x37e   : > { %v3273_v51 = vor.u32 %v3272_v53, %v5842_v46  ;;  %v5852_v63 = vrot.slane %v3290_v11, 5  ;;  %v3296_v44 = vrot.slane %v3294_v4, 4  ;;  %v2438_v17 = vor.u32 %v5765_v58, %v5755_v1 }
 0x37f   : > { %v2441_v38 = vshll.u32 %v5561_v60, 16  ;;  %v3305_v42 = vshrl.u32 %v3133_v57, 16  ;;  %v3308_v7 = vshll.u32 %v3133_v57, 16  ;;  %v3221_v24 = vsel %vm5322_vm14, %v3216_v49, %v5798_v16 }
 0x380   : > { %v3231_v61 = vsel %vm5322_vm14, %v3226_v13, %v3230_v52  ;;  %v3314_v34 = vshll.u32 %v5849_v23, 16  ;;  %v3318_v29 = vshrl.u32 %v5849_v23, 16  ;;  %v6155_v60 = vcombine.low %v5678_v50, %v5692_v43 }
 0x381   : > { %v3245_v58 = vsel %vm5322_vm14, %v3240_v36, %v5810_v47  ;;  %v3255_v16 = vsel %vm5322_vm14, %v3250_v21, %v3254_v9  ;;  %v3278_v55 = vrot.slane %v3276_v5, 5  ;;  %v3287_v10 = vor.u32 %v3286_v56, %v3283_v62  ;;  %v4803_v9 = vld [vmem:[#allocation2 + $0xc] sm:$0xff]   ;;  %v2292_v56 = vld [vmem:[#allocation2 + $0x48] sm:$0xf] }
 0x382   : > { %v6156_v15 = vcombine.low %v5715_v18, %v5726_v22  ;;  %v3264_v50 = vrot.slane %v3263_v45, 4  ;;  %v3274_v43 = vrot.slane %v3273_v51, 4  ;;  %v3297_v53 = vor.u32 %v3296_v44, %v5852_v63  ;;  %v3494_v44 = vld [vmem:[#allocation2 + $0x18] sm:$0xe] }
 0x383   : > { %4564 = vmatmul.mubr.msk.bf16.vlgmr.msra.gmra.mrb[0].mxu0 %vm1540_vm9, %v4239_v39  ;;  %v3300_v11 = vshll.u32 %v5857_v6, 16  ;;  %v3307_v4 = vrot.slane %v3305_v42, 4  ;;  %v3310_v47 = vrot.slane %v3308_v7, 5  ;;  %v4241_v39 = vcombine.low %v3221_v24, %v3231_v61 }
 0x384   : > { %4482 = vmatmul.mubr.msk.bf16.gmra.mrb[8].mxu1 %vm1540_vm9, %v6155_v60  ;;  %4580 = vmatpush3.bf16.msra.mxu0 %v3633_v25  ;;  %v5883_v25 = vld [vmem:[#allocation2 + $0x74] sm:$0x1]  ;;  %v5885_v52 = vrot.slane %v3314_v34, 5  ;;  %v3320_v49 = vrot.slane %v3318_v29, 4  ;;  %v2439_v13 = vrot.slane %v2438_v17, 4  ;;  %v2443_v18 = vrot.slane %v2441_v38, 5 }
 0x385   : > { %4485 = vmatprep.mubr.msk.bf16.mxu1 %vm1540_vm9, %v6156_v15  ;;  %4567 = vmatprep.mubr.msk.bf16.mxu0 %vm1540_vm9, %v4240_v30  ;;  %v4242_v22 = vcombine.low %v3245_v58, %v3255_v16  ;;  %v3288_v36 = vrot.slane %v3287_v10, 4  ;;  %v3269_v45 = vsel %vm5322_vm14, %v3264_v50, %v5842_v46  ;;  %v3279_v30 = vsel %vm5322_vm14, %v3274_v43, %v3278_v55  ;;  %v4805_v15 = vld [vmem:[#allocation2 + $0x24] sm:$0xff]   ;;  %v2289_v50 = vld [vmem:[#allocation2 + $0x3c] sm:$0xf] }
 0x386   : > { %v3298_v57 = vrot.slane %v3297_v53, 4  ;;  %v3302_v21 = vrot.slane %v3300_v11, 5  ;;  %v3311_v5 = vor.u32 %v3310_v47, %v3307_v4  ;;  %v3324_v62 = vshll.u32 %v5883_v25, 16  ;;  %v3495_v4 = vld [vmem:[#allocation2 + $0x24] sm:$0xe] }
 0x387   : > { %v3321_v51 = vor.u32 %v3320_v49, %v5885_v52  ;;  %v3528_v17 = vrot.slane %v5682_v14, 5  ;;  %v6157_v38 = vcombine.low %v5748_v33, %v5763_v41  ;;  %v4243_v46 = vcombine.low %v3269_v45, %v3279_v30  ;;  %v3496_v49 = vld [vmem:[#allocation2 + $0x30] sm:$0xe] }
 0x388   : > { %v3293_v42 = vsel %vm5322_vm14, %v3288_v36, %v5852_v63  ;;  %v3303_v7 = vsel %vm5322_vm14, %v3298_v57, %v3302_v21  ;;  %v2422_v24 = vshrl.u32 %v2292_v56, 16  ;;  %v2425_v61 = vshll.u32 %v2292_v56, 16  ;;  %v4804_v63 = vld [vmem:[#allocation2 + $0x18] sm:$0xff]  }
 0x389   : > { %v2444_v14 = vsel %vm5322_vm14, %v2439_v13, %v2443_v18  ;;  %v3312_v33 = vrot.slane %v3311_v5, 4  ;;  %v3326_v41 = vrot.slane %v3324_v62, 5  ;;  %v4254_v34 = vrot.slane %v3494_v44, 9 }
 0x38a   : > { %v3531_v29 = vrot.slane %v5730_v48, 5  ;;  %v3322_v60 = vrot.slane %v3321_v51, 4  ;;  %v3530_v58 = vrot.slane %v3528_v17, 4  ;;  %v2424_v16 = vrot.slane %v2422_v24, 4  ;;  %v4806_v51 = vld [vmem:[#allocation2 + $0x30] sm:$0xff]  }
 0x38b   : > { %4568 = vmatmul.mubr.msk.bf16.gmra.mrb[4].mxu0 %vm1540_vm9, %v4241_v39  ;;  %v2427_v55 = vrot.slane %v2425_v61, 5  ;;  %v4244_v10 = vcombine.low %v3293_v42, %v3303_v7  ;;  %v3317_v53 = vsel %vm5322_vm14, %v3312_v33, %v5885_v52  ;;  %v3529_v11 = vsel %vm5459_vm12, %v4254_v34, %v3528_v17  ;;  %v3497_v42 = vld [vmem:[#allocation2 + $0x3c] sm:$0xe]  ;;  %v2295_v61 = vld [vmem:[#allocation2 + $0x54] sm:$0xf] }
 0x38c   : > { %4486 = vmatmul.mubr.msk.bf16.gmra.mrb[12].mxu1 %vm1540_vm9, %v6157_v38  ;;  %4571 = vmatprep.mubr.msk.bf16.mxu0 %vm1540_vm9, %v4242_v22  ;;  %v3535_v47 = vrot.slane %v5711_v59, 5  ;;  %v3327_v48 = vsel %vm5322_vm14, %v3322_v60, %v3326_v41  ;;  %v3532_v39 = vsel %vm5459_vm12, %v3530_v58, %v3531_v29  ;;  %v3542_v13 = vrot.slane %v5728_v40, 5  ;;  %v3498_v34 = vld [vmem:[#allocation2 + $0x48] sm:$0xe] }
 0x38d   : > { %4491 = vmatprep.mubr.msk.bf16.mxu1 %vm1540_vm9, %v4803_v9  ;;  %v2428_v43 = vor.u32 %v2427_v55, %v2424_v16  ;;  %v2398_v52 = vshrl.u32 %v2289_v50, 16  ;;  %v2401_v22 = vshll.u32 %v2289_v50, 16  ;;  %v2407_v59 = vshll.u32 %v5530_v12, 16 }
 0x38e   : > { %v2411_v36 = vshrl.u32 %v5530_v12, 16  ;;  %v4255_v9 = vrot.slane %v3495_v4, 9  ;;  %v3537_v45 = vrot.slane %v3535_v47, 4  ;;  %v3538_v30 = vrot.slane %v5751_v27, 5 }
 0x38f   : > { %v2429_v18 = vrot.slane %v2428_v43, 4  ;;  %v4256_v57 = vrot.slane %v3496_v49, 9  ;;  %v4245_v5 = vcombine.low %v3317_v53, %v3327_v48  ;;  %v4263_v62 = vcombine.low %v3529_v11, %v3532_v39  ;;  %v4808_v53 = vld [vmem:[#allocation2 + $0x48] sm:$0xff]   ;;  %v4809_v48 = vld [vmem:[#allocation2 + $0x54] sm:$0xff]  }
 0x390   : > { %v3544_v56 = vrot.slane %v3542_v13, 4  ;;  %v3545_v12 = vrot.slane %v5757_v32, 5  ;;  %v2403_v44 = vrot.slane %v2401_v22, 5  ;;  %v5935_v17 = vrot.slane %v2407_v59, 5 }
 0x391   : > { %v2434_v40 = vsel %vm5322_vm14, %v2429_v18, %v5755_v1  ;;  %v2413_v38 = vrot.slane %v2411_v36, 4  ;;  %v3536_v1 = vsel %vm5459_vm12, %v4255_v9, %v3535_v47  ;;  %v3539_v27 = vsel %vm5459_vm12, %v3537_v45, %v3538_v30  ;;  %v2298_v18 = vld [vmem:[#allocation2 + $0x60] sm:$0xf] }
 0x392   : > { %v5932_v21 = vcombine.low %v2434_v40, %v2444_v14  ;;  %v3543_v7 = vsel %vm5459_vm12, %v4256_v57, %v3542_v13  ;;  %v3549_v32 = vrot.slane %v5769_v19, 5  ;;  %v2417_v24 = vshll.u32 %v5543_v28, 16  ;;  %v3499_v40 = vld [vmem:[#allocation2 + $0x54] sm:$0xe] }
 0x393   : > { %4572 = vmatmul.mubr.msk.bf16.gmra.mrb[8].mxu0 %vm1540_vm9, %v4243_v46  ;;  %v4807_v46 = vld [vmem:[#allocation2 + $0x3c] sm:$0xff]   ;;  %v3546_v14 = vsel %vm5459_vm12, %v3544_v56, %v3545_v12  ;;  %v2414_v41 = vor.u32 %v2413_v38, %v5935_v17  ;;  %v3556_v29 = vrot.slane %v5776_v3, 5  ;;  %v4264_v60 = vcombine.low %v3536_v1, %v3539_v27 }
 0x394   : > { %4492 = vmatmul.mubr.msk.bf16.vlgmr.msra.gmra.mrb[0].mxu1 %vm1540_vm9, %v4804_v63  ;;  %4575 = vmatprep.mubr.msk.bf16.mxu0 %vm1540_vm9, %v4244_v10  ;;  %v4257_v19 = vrot.slane %v3497_v42, 9  ;;  %v3552_v28 = vrot.slane %v5806_v0, 5  ;;  %v2446_v58 = vshrl.u32 %v2295_v61, 16  ;;  %v2449_v16 = vshll.u32 %v2295_v61, 16 }
 0x395   : > { %4600 = vmatpush3.bf16.msra.mxu1 %v5286_v2  ;;  %4495 = vmatprep.mubr.msk.bf16.mxu1 %vm1540_vm9, %v4805_v15  ;;  %v2400_v2 = vrot.slane %v2398_v52, 4  ;;  %v2455_v55 = vshll.u32 %v5569_v8, 16  ;;  %v2459_v63 = vshrl.u32 %v5569_v8, 16  ;;  %v4265_v10 = vcombine.low %v3543_v7, %v3546_v14 }
 0x396   : > { %v3551_v15 = vrot.slane %v3549_v32, 4  ;;  %v2419_v50 = vrot.slane %v2417_v24, 5  ;;  %v4258_v43 = vrot.slane %v3498_v34, 9  ;;  %v2415_v4 = vrot.slane %v2414_v41, 4 }
 0x397   : > { %v2404_v33 = vor.u32 %v2403_v44, %v2400_v2  ;;  %v3558_v3 = vrot.slane %v3556_v29, 4  ;;  %v3559_v47 = vrot.slane %v5808_v31, 5  ;;  %v2448_v39 = vrot.slane %v2446_v58, 4  ;;  %v6159_v44 = vld [vmem:[#allocation3_spill] sm:$0xff] }
 0x398   : > { %v2451_v49 = vrot.slane %v2449_v16, 5  ;;  %v2457_v0 = vrot.slane %v2455_v55, 5  ;;  %v2461_v13 = vrot.slane %v2459_v63, 4  ;;  %v3550_v8 = vsel %vm5459_vm12, %v4257_v19, %v3549_v32  ;;  %v6160_v63 = vld [vmem:[#allocation5_spill] sm:$0xff] }
 0x399   : > { %v2405_v11 = vrot.slane %v2404_v33, 4  ;;  %v3553_v52 = vsel %vm5459_vm12, %v3551_v15, %v3552_v28  ;;  %v3557_v22 = vsel %vm5459_vm12, %v4258_v43, %v3556_v29  ;;  %v3563_v59 = vrot.slane %v5804_v54, 5  ;;  %v3500_v54 = vld [vmem:[#allocation2 + $0x60] sm:$0xe]  ;;  %v3501_v15 = vld [vmem:[#allocation2 + $0x6c] sm:$0xe] }
 0x39a   : > { %v2420_v36 = vsel %vm5322_vm14, %v2415_v4, %v2419_v50  ;;  %v3560_v9 = vsel %vm5459_vm12, %v3558_v3, %v3559_v47  ;;  %v3570_v45 = vrot.slane %v5825_v20, 5  ;;  %v2470_v30 = vshrl.u32 %v2298_v18, 16  ;;  %v4810_v20 = vld [vmem:[#allocation2 + $0x60] sm:$0xff]  }
 0x39b   : > { %4576 = vmatmul.mubr.msk.bf16.gmra.mrb[12].mxu0 %vm1540_vm9, %v4245_v5  ;;  %v2410_v31 = vsel %vm5322_vm14, %v2405_v11, %v5935_v17  ;;  %v2473_v57 = vshll.u32 %v2298_v18, 16  ;;  %v6158_v5 = vld [vmem:[#allocation4_spill] sm:$0xff]  ;;  %v4266_v12 = vcombine.low %v3550_v8, %v3553_v52  ;;  %v2462_v2 = vor.u32 %v2461_v13, %v2457_v0 }
 0x39c   : > { %4496 = vmatmul.mubr.msk.bf16.gmra.mrb[4].mxu1 %vm1540_vm9, %v4806_v51  ;;  %4581 = vmatprep.mubr.msk.bf16.mxu0 %vm1540_vm9, %v4263_v62  ;;  %v2479_v62 = vshll.u32 %v6158_v5, 16  ;;  %v2483_v56 = vshrl.u32 %v6158_v5, 16  ;;  %v2452_v51 = vor.u32 %v2451_v49, %v2448_v39  ;;  %v2465_v17 = vshll.u32 %v6159_v44, 16 }
 0x39d   : > { %4499 = vmatprep.mubr.msk.bf16.mxu1 %vm1540_vm9, %v4807_v46  ;;  %v4183_v38 = vcombine.low %v2410_v31, %v2420_v36  ;;  %v4267_v46 = vcombine.low %v3557_v22, %v3560_v9  ;;  %v4259_v1 = vrot.slane %v3499_v40, 9  ;;  %v3566_v27 = vrot.slane %v5840_v37, 5 }
 0x39e   : > { %v3565_v42 = vrot.slane %v3563_v59, 4  ;;  %v4260_v7 = vrot.slane %v3500_v54, 9  ;;  %v3572_v32 = vrot.slane %v3570_v45, 4  ;;  %v3573_v24 = vrot.slane %v5857_v6, 5 }
 0x39f   : > { %v2472_v61 = vrot.slane %v2470_v30, 4  ;;  %v2475_v14 = vrot.slane %v2473_v57, 5  ;;  %v2481_v33 = vrot.slane %v2479_v62, 5  ;;  %v2485_v41 = vrot.slane %v2483_v56, 4  ;;  %v6023_v57 = vld [vmem:[%s6129_s8] ss:$0 sm:$0xff] }
 0x3a0   : > { %v2453_v34 = vrot.slane %v2452_v51, 4  ;;  %v2463_v29 = vrot.slane %v2462_v2, 4  ;;  %v3564_v37 = vsel %vm5459_vm12, %v4259_v1, %v3563_v59  ;;  %v3567_v19 = vsel %vm5459_vm12, %v3565_v42, %v3566_v27 }
 0x3a1   : > { %v3571_v6 = vsel %vm5459_vm12, %v4260_v7, %v3570_v45  ;;  %v3577_v28 = vrot.slane %v5849_v23, 5  ;;  %v3574_v58 = vsel %vm5459_vm12, %v3572_v32, %v3573_v24  ;;  %v2476_v16 = vor.u32 %v2475_v14, %v2472_v61  ;;  %v3842_v32 = vld [vmem:[%s4990_s29] sm:$0xff] }
 0x3a2   : > { %v2486_v55 = vor.u32 %v2485_v41, %v2481_v33  ;;  %v2458_v50 = vsel %vm5322_vm14, %v2453_v34, %v2457_v0  ;;  %v4269_v11 = vcombine.low %v3571_v6, %v3574_v58  ;;  %v4261_v4 = vrot.slane %v3501_v15, 9  ;;  %v3845_v41 = vld [vmem:[%s4990_s29 + $0x18] sm:$0xff]  ;;  %v3843_v6 = vld [vmem:[%s4990_s29 + $0x8] sm:$0xff] }
 0x3a3   : > { %4582 = vmatmul.mubr.msk.bf16.vlgmr.msra.gmra.mrb[0].mxu0 %vm1540_vm9, %v4264_v60  ;;  %v2467_v60 = vrot.slane %v2465_v17, 5  ;;  %v3579_v23 = vrot.slane %v3577_v28, 4  ;;  %v3580_v3 = vrot.slane %v5883_v25, 5 }
 0x3a4   : > { %4500 = vmatmul.mubr.msk.bf16.gmra.mrb[8].mxu1 %vm1540_vm9, %v4808_v53  ;;  %4585 = vmatprep.mubr.msk.bf16.mxu0 %vm1540_vm9, %v4265_v10  ;;  %v2489_v10 = vshll.u32 %v6160_v63, 16  ;;  %v4268_v53 = vcombine.low %v3564_v37, %v3567_v19  ;;  %v2487_v39 = vrot.slane %v2486_v55, 4  ;;  %v3578_v0 = vsel %vm5459_vm12, %v4261_v4, %v3577_v28 }
 0x3a5   : > { %4503 = vmatprep.mubr.msk.bf16.mxu1 %vm1540_vm9, %v4809_v48  ;;  %v2468_v43 = vsel %vm5322_vm14, %v2463_v29, %v2467_v60  ;;  %v2477_v48 = vrot.slane %v2476_v16, 4  ;;  %v3581_v13 = vsel %vm5459_vm12, %v3579_v23, %v3580_v3 }
 0x3a6   : > { %v4185_v47 = vcombine.low %v2458_v50, %v2468_v43  ;;  %v2491_v49 = vrot.slane %v2489_v10, 5  ;;  %v4270_v8 = vcombine.low %v3578_v0, %v3581_v13  ;;  %v3846_v0 = vld [vmem:[%s4990_s29 + $0x20] sm:$0xff] }
 0x3a7   : > { %v2482_v25 = vsel %vm5322_vm14, %v2477_v48, %v2481_v33 }
 0x3a8   : > { %v2492_v18 = vsel %vm5322_vm14, %v2487_v39, %v2491_v49  ;;  %v3848_v39 = vld [vmem:[%s4990_s29 + $0x30] sm:$0xff] }
 0x3a9   : > { %v4186_v52 = vcombine.low %v2482_v25, %v2492_v18 }
 0x3ab   : > { %4586 = vmatmul.mubr.msk.bf16.gmra.mrb[4].mxu0 %vm1540_vm9, %v4266_v12 }
 0x3ac   : > { %4504 = vmatmul.mubr.msk.bf16.gmra.mrb[12].mxu1 %vm1540_vm9, %v4810_v20  ;;  %4589 = vmatprep.mubr.msk.bf16.mxu0 %vm1540_vm9, %v4267_v46  ;;  %v3844_v20 = vld [vmem:[%s4990_s29 + $0x10] sm:$0xff] }
 0x3ad   : > { %4517 = vmatprep.mubr.msk.bf16.mxu1 %vm1540_vm9, %v4183_v38 }
 0x3b3   : > { %4590 = vmatmul.mubr.msk.bf16.gmra.mrb[8].mxu0 %vm1540_vm9, %v4268_v53 }
 0x3b4   : > { %4518 = vmatmul.mubr.msk.bf16.vlgmr.msra.gmra.mrb[8].mxu1 %vm1540_vm9, %v5932_v21  ;;  %4593 = vmatprep.mubr.msk.bf16.mxu0 %vm1540_vm9, %v4269_v11 }
 0x3b5   : > { %4521 = vmatprep.mubr.msk.bf16.mxu1 %vm1540_vm9, %v4185_v47 }
 0x3bb   : > { %4594 = vmatmul.mubr.msk.bf16.gmra.mrb[12].mxu0 %vm1540_vm9, %v4270_v8 }
 0x3bc   : > { %4522 = vmatmul.mubr.msk.bf16.gmra.mrb[12].mxu1 %vm1540_vm9, %v4186_v52 }
 0x467   : > { %v4493_v21 = vpop.f32.mrb[0].mxu1 }
 0x468   : > { %v2198_v22 = vpop.f32.mrb[1].mxu1 }
 0x469   : > { %v4494_v59 = vpop.f32.mrb[2].mxu1 }
 0x46a   : > { %v2201_v31 = vpop.f32.mrb[3].mxu1 }
 0x46f   : > { %v4497_v26 = vpop.f32.mrb[4].mxu1 }
 0x470   : > { %v2214_v36 = vpop.f32.mrb[5].mxu1 }
 0x471   : > { %v4498_v9 = vpop.f32.mrb[6].mxu1 }
 0x472   : > { %v2217_v40 = vpop.f32.mrb[7].mxu1 }
 0x476   : > { %v4583_v45 = vpop.f32.mrb[0].mxu0 }
 0x477   : > { %v4601_v54 = vadd.f32 %v4583_v45, %v4493_v21  ;;  %v3669_v30 = vpop.f32.mrb[1].mxu0  ;;  %v3849_v21 = vld [vmem:[%s4990_s29 + $0x38] sm:$0xff] }
 0x478   : > { %v4602_v5 = vadd.f32 %v3669_v30, %v2198_v22  ;;  %v4584_v62 = vpop.f32.mrb[2].mxu0 }
 0x479   : > { %v3757_v56 = vmul.f32 %v4601_v54, %v6018_v35  ;;  %v4603_v12 = vadd.f32 %v4584_v62, %v4494_v59  ;;  %v3672_v51 = vpop.f32.mrb[3].mxu0  ;;  %v3847_v54 = vld [vmem:[%s4990_s29 + $0x28] sm:$0xff] }
 0x47a   : > { %v3755_v2 = vmul.f32 %v4602_v5, %v6018_v35  ;;  %v4604_v44 = vadd.f32 %v3672_v51, %v2201_v31 }
 0x47b   : > { %v3780_v17 = vadd.f32 %v6023_v57, %v3757_v56  ;;  %v3758_v38 = vmul.f32 %v4603_v12, %v6018_v35 }
 0x47c   : > { %v3778_v46 = vadd.f32 %v6023_v57, %v3755_v2  ;;  %v3756_v1 = vmul.f32 %v4604_v44, %v6018_v35 }
 0x47d   : > { %vm3796_vm13 = vcmp.ge.f32.partialorder %v3780_v17, 0.0  ;;  %v3812_v27 = vmul.f32 0.01, %v3780_v17  ;;  %v3781_v42 = vadd.f32 %v6023_v57, %v3758_v38 }
 0x47e   : > { %vm3794_vm15 = vcmp.ge.f32.partialorder %v3778_v46, 0.0  ;;  %v3810_v7 = vmul.f32 0.01, %v3778_v46  ;;  %v3779_v24 = vadd.f32 %v6023_v57, %v3756_v1  ;;  %v4587_v61 = vpop.f32.mrb[4].mxu0 }
 0x47f   : > { %v3828_v14 = vsel %vm3796_vm13, %v3780_v17, %v3812_v27  ;;  %vm3797_vm1 = vcmp.ge.f32.partialorder %v3781_v42, 0.0  ;;  %v3813_v33 = vmul.f32 0.01, %v3781_v42  ;;  %v4605_v34 = vadd.f32 %v4587_v61, %v4497_v26  ;;  %v3685_v29 = vpop.f32.mrb[5].mxu0  ;;  %v3850_v61 = vld [vmem:[%s4990_s29 + $0x40] sm:$0xff] }
 0x480   : > { %v3860_v60 = vadd.f32 %v3844_v20, %v3828_v14  ;;  %v3826_v37 = vsel %vm3794_vm15, %v3778_v46, %v3810_v7  ;;  %vm3795_vm2 = vcmp.ge.f32.partialorder %v3779_v24, 0.0  ;;  %v3811_v19 = vmul.f32 0.01, %v3779_v24  ;;  %v4588_v28 = vpop.f32.mrb[6].mxu0 }
 0x481   : > { %v3858_v58 = vadd.f32 %v3842_v32, %v3826_v37  ;;  %v3829_v16 = vsel %vm3797_vm1, %v3781_v42, %v3813_v33  ;;  %v3761_v55 = vmul.f32 %v4605_v34, %v6018_v35  ;;  %v4606_v63 = vadd.f32 %v3685_v29, %v2214_v36  ;;  %v3688_v10 = vpop.f32.mrb[7].mxu0  ;;  %v3853_v37 = vld [vmem:[%s4990_s29 + $0x58] sm:$0xff] }
 0x482   : > { %3876 = vst.msk [vmem:[%s4995_s17 + $0x10] sm:$0xff] %vm594_vm6, %v3860_v60  ;;  %v3861_v15 = vadd.f32 %v3845_v41, %v3829_v16  ;;  %v3827_v50 = vsel %vm3795_vm2, %v3779_v24, %v3811_v19  ;;  %v4607_v43 = vadd.f32 %v4588_v28, %v4498_v9  ;;  %v4608_v53 = vadd.f32 %v3688_v10, %v2217_v40  ;;  %v3852_v24 = vld [vmem:[%s4990_s29 + $0x50] sm:$0xff] }
 0x483   : > { %3874 = vst.msk [vmem:[%s4995_s17] sm:$0xff] %vm594_vm6, %v3858_v58  ;;  %v3859_v11 = vadd.f32 %v3843_v6, %v3827_v50  ;;  %v3784_v4 = vadd.f32 %v6023_v57, %v3761_v55  ;;  %v3759_v23 = vmul.f32 %v4606_v63, %v6018_v35 }
 0x484   : > { %3877 = vst.msk [vmem:[%s4995_s17 + $0x18] sm:$0xff] %vm594_vm6, %v3861_v15  ;;  %v3762_v3 = vmul.f32 %v4607_v43, %v6018_v35  ;;  %v3760_v47 = vmul.f32 %v4608_v53, %v6018_v35 }
 0x485   : > { %3875 = vst.msk [vmem:[%s4995_s17 + $0x8] sm:$0xff] %vm594_vm6, %v3859_v11  ;;  %vm3800_vm4 = vcmp.ge.f32.partialorder %v3784_v4, 0.0  ;;  %v3816_v48 = vmul.f32 0.01, %v3784_v4  ;;  %v3782_v49 = vadd.f32 %v6023_v57, %v3759_v23 }
 0x486   : > { %v3785_v13 = vadd.f32 %v6023_v57, %v3762_v3  ;;  %v3783_v25 = vadd.f32 %v6023_v57, %v3760_v47  ;;  %v4591_v18 = vpop.f32.mrb[8].mxu0  ;;  %v3851_v3 = vld [vmem:[%s4990_s29 + $0x48] sm:$0xff] }
 0x487   : > { %v3832_v8 = vsel %vm3800_vm4, %v3784_v4, %v3816_v48  ;;  %vm3798_vm5 = vcmp.ge.f32.partialorder %v3782_v49, 0.0  ;;  %v3814_v52 = vmul.f32 0.01, %v3782_v49  ;;  %v4519_v22 = vpop.f32.mrb[8].mxu1  ;;  %v3701_v59 = vpop.f32.mrb[9].mxu0 }
 0x488   : > { %v3864_v31 = vadd.f32 %v3848_v39, %v3832_v8  ;;  %vm3801_vm8 = vcmp.ge.f32.partialorder %v3785_v13, 0.0  ;;  %v3817_v26 = vmul.f32 0.01, %v3785_v13  ;;  %vm3799_vm0 = vcmp.ge.f32.partialorder %v3783_v25, 0.0  ;;  %v2612_v36 = vpop.f32.mrb[9].mxu1  ;;  %v4592_v9 = vpop.f32.mrb[10].mxu0 }
 0x489   : > { %v3830_v40 = vsel %vm3798_vm5, %v3782_v49, %v3814_v52  ;;  %v3815_v45 = vmul.f32 0.01, %v3783_v25  ;;  %v4609_v30 = vadd.f32 %v4591_v18, %v4519_v22  ;;  %v4610_v5 = vadd.f32 %v3701_v59, %v2612_v36  ;;  %v4520_v62 = vpop.f32.mrb[10].mxu1  ;;  %v3704_v56 = vpop.f32.mrb[11].mxu0  ;;  %v3856_v59 = vld [vmem:[%s4990_s29 + $0x70] sm:$0xff] }
 0x48a   : > { %3880 = vst.msk [vmem:[%s4995_s17 + $0x30] sm:$0xff] %vm594_vm6, %v3864_v31  ;;  %v3862_v12 = vadd.f32 %v3846_v0, %v3830_v40  ;;  %v3833_v51 = vsel %vm3801_vm8, %v3785_v13, %v3817_v26  ;;  %v4611_v2 = vadd.f32 %v4592_v9, %v4520_v62  ;;  %v2615_v44 = vpop.f32.mrb[11].mxu1 }
 0x48b   : > { %v3865_v17 = vadd.f32 %v3849_v21, %v3833_v51  ;;  %v3831_v38 = vsel %vm3799_vm0, %v3783_v25, %v3815_v45  ;;  %v3765_v46 = vmul.f32 %v4609_v30, %v6018_v35  ;;  %v3763_v1 = vmul.f32 %v4610_v5, %v6018_v35  ;;  %v3854_v45 = vld [vmem:[%s4990_s29 + $0x60] sm:$0xff]  ;;  %v3857_v30 = vld [vmem:[%s4990_s29 + $0x78] sm:$0xff] }
 0x48c   : > { %3878 = vst.msk [vmem:[%s4995_s17 + $0x20] sm:$0xff] %vm594_vm6, %v3862_v12  ;;  %v3863_v27 = vadd.f32 %v3847_v54, %v3831_v38  ;;  %v3766_v20 = vmul.f32 %v4611_v2, %v6018_v35  ;;  %v4612_v42 = vadd.f32 %v3704_v56, %v2615_v44  ;;  %v3855_v56 = vld [vmem:[%s4990_s29 + $0x68] sm:$0xff] }
 0x48d   : > { %3881 = vst.msk [vmem:[%s4995_s17 + $0x38] sm:$0xff] %vm594_vm6, %v3865_v17  ;;  %v3788_v7 = vadd.f32 %v6023_v57, %v3765_v46  ;;  %v3786_v32 = vadd.f32 %v6023_v57, %v3763_v1 }
 0x48e   : > { %3879 = vst.msk [vmem:[%s4995_s17 + $0x28] sm:$0xff] %vm594_vm6, %v3863_v27  ;;  %v3789_v14 = vadd.f32 %v6023_v57, %v3766_v20  ;;  %v3764_v33 = vmul.f32 %v4612_v42, %v6018_v35  ;;  %v4595_v41 = vpop.f32.mrb[12].mxu0 }
 0x48f   : > { %vm3804_vm3 = vcmp.ge.f32.partialorder %v3788_v7, 0.0  ;;  %v3820_v34 = vmul.f32 0.01, %v3788_v7  ;;  %vm3802_vm7 = vcmp.ge.f32.partialorder %v3786_v32, 0.0  ;;  %v3818_v29 = vmul.f32 0.01, %v3786_v32 }
 0x490   : > { %vm3805_vm14 = vcmp.ge.f32.partialorder %v3789_v14, 0.0  ;;  %v3821_v60 = vmul.f32 0.01, %v3789_v14  ;;  %v3787_v19 = vadd.f32 %v6023_v57, %v3764_v33  ;;  %v4523_v6 = vpop.f32.mrb[12].mxu1  ;;  %v3717_v28 = vpop.f32.mrb[13].mxu0 }
 0x491   : > { %v3836_v58 = vsel %vm3804_vm3, %v3788_v7, %v3820_v34  ;;  %v3834_v16 = vsel %vm3802_vm7, %v3786_v32, %v3818_v29  ;;  %v4613_v55 = vadd.f32 %v4595_v41, %v4523_v6  ;;  %v2628_v63 = vpop.f32.mrb[13].mxu1  ;;  %v4596_v10 = vpop.f32.mrb[14].mxu0 }
 0x492   : > { %v3868_v15 = vadd.f32 %v3852_v24, %v3836_v58  ;;  %v3866_v50 = vadd.f32 %v3850_v61, %v3834_v16  ;;  %v3837_v43 = vsel %vm3805_vm14, %v3789_v14, %v3821_v60  ;;  %vm3803_vm9 = vcmp.ge.f32.partialorder %v3787_v19, 0.0  ;;  %v4524_v53 = vpop.f32.mrb[14].mxu1  ;;  %v3720_v11 = vpop.f32.mrb[15].mxu0 }
 0x493   : > { %v3869_v4 = vadd.f32 %v3853_v37, %v3837_v43  ;;  %v3819_v23 = vmul.f32 0.01, %v3787_v19  ;;  %v3769_v47 = vmul.f32 %v4613_v55, %v6018_v35  ;;  %v4614_v48 = vadd.f32 %v3717_v28, %v2628_v63  ;;  %v2631_v39 = vpop.f32.mrb[15].mxu1 }
 0x494   : > { %3884 = vst.msk [vmem:[%s4995_s17 + $0x50] sm:$0xff] %vm594_vm6, %v3868_v15  ;;  %3882 = vst.msk [vmem:[%s4995_s17 + $0x40] sm:$0xff] %vm594_vm6, %v3866_v50  ;;  %v4615_v49 = vadd.f32 %v4596_v10, %v4524_v53  ;;  %v4616_v0 = vadd.f32 %v3720_v11, %v2631_v39 }
 0x495   : > { %3885 = vst.msk [vmem:[%s4995_s17 + $0x58] sm:$0xff] %vm594_vm6, %v3869_v4  ;;  %v3835_v13 = vsel %vm3803_vm9, %v3787_v19, %v3819_v23  ;;  %v3792_v25 = vadd.f32 %v6023_v57, %v3769_v47  ;;  %v3767_v18 = vmul.f32 %v4614_v48, %v6018_v35 }
 0x496   : > { %v3867_v8 = vadd.f32 %v3851_v3, %v3835_v13  ;;  %v3770_v52 = vmul.f32 %v4615_v49, %v6018_v35  ;;  %v3768_v21 = vmul.f32 %v4616_v0, %v6018_v35 }
 0x497   : > { %vm3808_vm10 = vcmp.ge.f32.partialorder %v3792_v25, 0.0  ;;  %v3824_v22 = vmul.f32 0.01, %v3792_v25  ;;  %v3790_v31 = vadd.f32 %v6023_v57, %v3767_v18 }
 0x498   : > { %3883 = vst.msk [vmem:[%s4995_s17 + $0x48] sm:$0xff] %vm594_vm6, %v3867_v8  ;;  %v3793_v26 = vadd.f32 %v6023_v57, %v3770_v52  ;;  %v3791_v36 = vadd.f32 %v6023_v57, %v3768_v21 }
 0x499   : > { %v3840_v9 = vsel %vm3808_vm10, %v3792_v25, %v3824_v22  ;;  %vm3806_vm11 = vcmp.ge.f32.partialorder %v3790_v31, 0.0  ;;  %v3822_v40 = vmul.f32 0.01, %v3790_v31 }
 0x49a   : > { %v3872_v35 = vadd.f32 %v3856_v59, %v3840_v9  ;;  %vm3809_vm12 = vcmp.ge.f32.partialorder %v3793_v26, 0.0  ;;  %v3825_v54 = vmul.f32 0.01, %v3793_v26  ;;  %vm3807_vm13 = vcmp.ge.f32.partialorder %v3791_v36, 0.0 }
 0x49b   : > { %v3838_v5 = vsel %vm3806_vm11, %v3790_v31, %v3822_v40  ;;  %v3823_v62 = vmul.f32 0.01, %v3791_v36 }
 0x49c   : > { %3888 = vst.msk [vmem:[%s4995_s17 + $0x70] sm:$0xff] %vm594_vm6, %v3872_v35  ;;  %v3870_v12 = vadd.f32 %v3854_v45, %v3838_v5  ;;  %v3841_v51 = vsel %vm3809_vm12, %v3793_v26, %v3825_v54 }
 0x49d   : > { %v3873_v57 = vadd.f32 %v3857_v30, %v3841_v51  ;;  %v3839_v2 = vsel %vm3807_vm13, %v3791_v36, %v3823_v62 }
 0x49e   : > { %3886 = vst.msk [vmem:[%s4995_s17 + $0x60] sm:$0xff] %vm594_vm6, %v3870_v12  ;;  %v3871_v44 = vadd.f32 %v3855_v56, %v3839_v2 }
 0x49f   : > { %3889 = vst.msk [vmem:[%s4995_s17 + $0x78] sm:$0xff] %vm594_vm6, %v3873_v57 }
 0x4a0   : > { %3887 = vst.msk [vmem:[%s4995_s17 + $0x68] sm:$0xff] %vm594_vm6, %v3871_v44 }
 0x4a1 PF: > { %s19_s13 = sadd.s32 1, %s4850_s13   ;;  %s6161_s30 = smov %s4842_s11 }
 0x4a2   : > { %p16_p0 = scmp.ge.s32.totalorder %s19_s13, 6   ;;  %s6162_s10 = smov %s4846_s12 }
 0x4a3   : > { %s6163_s11 = smov %s6166_s14  ;;  %s6164_s12 = smov %s6170_s15 }
 0x4a4   :  { %18 = sbr.rel (!%p16_p0) target bundleno = 3 (0x3), region = 120 }

// kernel: resblock_pallas.1
= control target key start
LH: loop header
LB: loop body
LE: loop exit
PB: predicated region body
PF: predicated region fallthrough
CT: control target
= control target key end

     0   :  { %s4908_s30 = smov 0   ;;  %s4910_s10 = smov 0   ;;  %s6121_s0 = inlined_call_operand.vmem [shape: f32[2,16,16,8], index: 0, kind: input, shape index: {}, may-alias: {0,1,2}]   ;;  %s6122_s1 = inlined_call_operand.vmem [shape: f32[2,16,16,8], index: 1, kind: input, shape index: {}, may-alias: {0,1,2}]   ;;  %s6123_s2 = inlined_call_operand.vmem [shape: f32[2,16,16,8], index: 2, kind: input, shape index: {}, may-alias: {0,1,2}]   ;;  %s6124_s3 = inlined_call_operand.vmem [shape: bf16[8,4], index: 3, kind: input, shape index: {}]   ;;  %s6125_s4 = inlined_call_operand.vmem [shape: f32[1,4], index: 4, kind: input, shape index: {}]   ;;  %s6126_s5 = inlined_call_operand.vmem [shape: f32[1,4], index: 5, kind: input, shape index: {}]   ;;  %s6127_s6 = inlined_call_operand.vmem [shape: bf16[9,4,8], index: 6, kind: input, shape index: {}]   ;;  %s6128_s7 = inlined_call_operand.vmem [shape: f32[1,8], index: 7, kind: input, shape index: {}]   ;;  %s6129_s8 = inlined_call_operand.vmem [shape: f32[1,8], index: 8, kind: input, shape index: {}]   ;;  %s6130_s9 = inlined_call_operand.vmem [shape: f32[2,16,16,8], index: 9, kind: output, shape index: {}]  }
   0x1   :  { %s4912_s11 = smov 0   ;;  %s4914_s12 = smov 0  }
   0x2   :  { %s4916_s13 = smov 0  }
   0x3 LB: > { %s28_s14 = sadd.s32 1, %s4842_s11  ;;  %s31_s15 = sadd.s32 1, %s4846_s12  ;;  %s4850_s13 = sphi %s4916_s13, %s19_s13   ;;  %s4846_s12 = sphi %s4914_s12, %s6164_s12   ;;  %s4842_s11 = sphi %s4912_s11, %s6163_s11   ;;  %s4838_s10 = sphi %s4910_s10, %s6162_s10   ;;  %s4834_s30 = sphi %s4908_s30, %s6161_s30  }
   0x4   : > { %p29_p0 = scmp.ge.s32.totalorder %s28_s14, 2  ;;  %p4041_p1 = scmp.ge.s32.totalorder %s4850_s13, 1 }
   0x5   : > { %p373_p2 = scmp.lt.s32.totalorder %s4850_s13, 5 }
   0x6   : > { %s6166_s14 = smov (%p29_p0, %s28_s14), 0  ;;  %s6168_s15 = smov (!%p29_p0, %s31_s15), %s4846_s12 }
   0x7   : > { %p374_p3 = pnand %p4041_p1, %p373_p2  ;;  %p33_p4 = scmp.ge.s32.totalorder %s6168_s15, 2 }
   0x9   : > { %s6170_s15 = smov (%p33_p4, %s6168_s15), 0  ;;  %377 = sbr.rel (%p374_p3) target bundleno = 1185 (0x4a1), region = 56 }
  0x10   : > { %v502_v0 = vld [vmem:[%s6124_s3] sm:$0xf]  ;;  %vm619_vm0 = vcmask 1043456   ;;  %s4944_s18 = sshll.u32 %s4834_s30, 3  ;;  %p446_p5 = scmp.lt.s32.totalorder %s4838_s10, 1  ;;  %vm505_vm1 = vcmask 24576  }
  0x11   : > { %4729 = vmatprep.subr.msk.bf16.mxu0 %vm619_vm0, %v502_v0  ;;  %4730 = vmatprep.subr.msk.bf16.mxu1 %vm619_vm0, %v502_v0  ;;  %v4946_v1 = vsel %vm619_vm0, %v502_v0, 0  ;;  %p448_p6 = scmp.lt.s32.totalorder %s4944_s18, 15  ;;  %s4950_s19 = sadd.s32 4294967295, %s4944_s18  ;;  %vm506_vm2 = vsmask.f32 256  ;;  %vm594_vm6 = vcmask 64512  }
  0x12   : > { %4406 = vmatpush3.bf16.msra.mxu0 %v4946_v1  ;;  %4598 = vmatpush3.bf16.msra.mxu1 %v4946_v1  ;;  %s6172_s10 = smov (!%p446_p5, %s4838_s10), 1  ;;  %vm4957_vm3 = vmand %vm505_vm1, %vm506_vm2  ;;  %v508_v3 = vld [vmem:[#allocation2] sm:$0x1]  ;;  %v514_v4 = vld [vmem:[#allocation2 + $0x18] sm:$0x1]  ;;  %p458_p7 = scmp.gt.s32.totalorder %s4950_s19, 0 }
  0x13   : > { %s449_s20 = scalar_select %p448_p6, %s4944_s18, 15  ;;  %v509_v5 = vsel %vm4957_vm3, 0, %v508_v3  ;;  %v515_v6 = vsel %vm4957_vm3, 0, %v514_v4  ;;  %v535_v7 = vld [vmem:[#allocation2 + $0x6c] sm:$0x1]  ;;  %vm1023_vm7 = vcmask 27648  }
  0x14   : > { %s4961_s21 = sshll.u32 %s6172_s10, 5  ;;  %p4048_p8 = scmp.lt.s32.totalorder %s4950_s19, 15  ;;  %510 = vst [vmem:[#allocation2] sm:$0x1] %v509_v5  ;;  %516 = vst [vmem:[#allocation2 + $0x18] sm:$0x1] %v515_v6 }
  0x15   : > { %s4043_s22 = sshll.u32 %s449_s20, 1  ;;  %v536_v8 = vsel %vm4957_vm3, 0, %v535_v7  ;;  %vm538_vm4 = vsmask.f32 7938  ;;  %s4290_s24 = sadd.s32 8, %s4944_s18 }
  0x16   : > { %s452_s23 = sadd.s32 %s4961_s21, %s4043_s22  ;;  %537 = vst [vmem:[#allocation2 + $0x6c] sm:$0x1] %v536_v8  ;;  %vm4975_vm5 = vmand %vm505_vm1, %vm538_vm4  ;;  %v540_v10 = vld [vmem:[#allocation2 + $0x8] sm:$0x1]  ;;  %v567_v11 = vld [vmem:[#allocation2 + $0x74] sm:$0x1] }
  0x17   : > { %s4045_s25 = sshll.u32 %s452_s23, 3  ;;  %p4979_p9 = scmp.lt.s32.totalorder %s4290_s24, 15  ;;  %v541_v12 = vsel %vm4975_vm5, 0, %v540_v10  ;;  %v568_v13 = vsel %vm4975_vm5, 0, %v567_v11  ;;  %v526_v38 = vld [vmem:[#allocation2 + $0x48] sm:$0x1]  ;;  %vm5111_vm14 = vmand %vm1023_vm7, %vm538_vm4 }
  0x18   : > { %s4990_s29 = scalar_lea.vmem %s6121_s0, %s4045_s25  ;;  %s4995_s17 = scalar_lea.vmem %s6130_s9, %s4045_s25  ;;  %542 = vst [vmem:[#allocation2 + $0x8] sm:$0x1] %v541_v12  ;;  %569 = vst [vmem:[#allocation2 + $0x74] sm:$0x1] %v568_v13  ;;  %v527_v39 = vsel %vm4957_vm3, 0, %v526_v38 }
  0x19   : > { %s459_s18 = scalar_select %p458_p7, %s4950_s19, 0  ;;  %v570_v14 = vld [vmem:[%s4990_s29] sm:$0xff]  ;;  %v571_v15 = vld [vmem:[%s4990_s29 + $0x8] sm:$0xff]  ;;  %v572_v19 = vld [vmem:[%s4990_s29 + $0x10] sm:$0xff]  ;;  %528 = vst [vmem:[#allocation2 + $0x48] sm:$0x1] %v527_v39 }
  0x1a   : > { %v578_v16 = vld [vmem:[%s4990_s29 + $0x40] sm:$0xff]  ;;  %s6174_s24 = smov (!%p4979_p9, %s4290_s24), 15  ;;  %v586_v17 = vpack.c.bf16 %v571_v15, %v570_v14  ;;  %v579_v18 = vld [vmem:[%s4990_s29 + $0x48] sm:$0xff]  ;;  %v573_v20 = vld [vmem:[%s4990_s29 + $0x18] sm:$0xff]  ;;  %vm860_vm13 = vsmask.f32 4368 }
  0x1b   : > { %s6176_s18 = smov (!%p4048_p8, %s459_s18), 15  ;;  %v590_v21 = vpack.c.bf16 %v579_v18, %v578_v16  ;;  %v587_v22 = vpack.c.bf16 %v573_v20, %v572_v19  ;;  %v580_v23 = vld [vmem:[%s4990_s29 + $0x50] sm:$0xff]  ;;  %v581_v24 = vld [vmem:[%s4990_s29 + $0x58] sm:$0xff]  ;;  %v574_v25 = vld [vmem:[%s4990_s29 + $0x20] sm:$0xff]  ;;  %s6178_s24 = smov (!%p4979_p9, %s6174_s24), 15 }
  0x1c   : > { %4407 = vmatprep.mubr.msk.bf16.mxu0 %vm594_vm6, %v586_v17  ;;  %v591_v26 = vpack.c.bf16 %v581_v24, %v580_v23  ;;  %v575_v27 = vld [vmem:[%s4990_s29 + $0x28] sm:$0xff]  ;;  %v582_v28 = vld [vmem:[%s4990_s29 + $0x60] sm:$0xff]  ;;  %s4053_s19 = sshll.u32 %s6176_s18, 1  ;;  %s4060_s22 = sshll.u32 %s6178_s24, 1  ;;  %v576_v32 = vld [vmem:[%s4990_s29 + $0x30] sm:$0xff] }
  0x1d   : > { %v583_v29 = vld [vmem:[%s4990_s29 + $0x68] sm:$0xff]  ;;  %4415 = vmatprep.mubr.msk.bf16.mxu1 %vm594_vm6, %v590_v21  ;;  %4408 = vmatmul.mubr.msk.bf16.vlgmr.msra.gmra.mrb[0].mxu0 %vm594_vm6, %v587_v22  ;;  %v588_v30 = vpack.c.bf16 %v575_v27, %v574_v25  ;;  %s466_s20 = sadd.s32 %s4053_s19, %s4961_s21  ;;  %v577_v33 = vld [vmem:[%s4990_s29 + $0x38] sm:$0xff]  ;;  %s483_s25 = sadd.s32 %s4060_s22, %s4961_s21  ;;  %v584_v34 = vld [vmem:[%s4990_s29 + $0x70] sm:$0xff] }
  0x1e   : > { %v592_v31 = vpack.c.bf16 %v583_v29, %v582_v28  ;;  %4416 = vmatmul.mubr.msk.bf16.vlgmr.msra.gmra.mrb[0].mxu1 %vm594_vm6, %v591_v26  ;;  %s4055_s23 = sshll.u32 %s466_s20, 3  ;;  %v585_v35 = vld [vmem:[%s4990_s29 + $0x78] sm:$0xff]  ;;  %s4062_s10 = sshll.u32 %s483_s25, 3  ;;  %v589_v36 = vpack.c.bf16 %v577_v33, %v576_v32  ;;  %v511_v40 = vld [vmem:[#allocation2 + $0xc] sm:$0x1]  ;;  %vm5136_vm0 = vmor %vm506_vm2, %vm860_vm13 }
  0x1f   : > { %4411 = vmatprep.mubr.msk.bf16.mxu0 %vm594_vm6, %v588_v30  ;;  %s5033_s28 = scalar_lea.vmem %s6122_s1, %s4055_s23  ;;  %s5038_s18 = scalar_lea.vmem %s6123_s2, %s4062_s10  ;;  %v593_v37 = vpack.c.bf16 %v585_v35, %v584_v34  ;;  %v523_v41 = vld [vmem:[#allocation2 + $0x3c] sm:$0x1]  ;;  %v512_v42 = vsel %vm4957_vm3, 0, %v511_v40  ;;  %v546_v44 = vld [vmem:[#allocation2 + $0x20] sm:$0x1] }
  0x20   : > { %4419 = vmatprep.mubr.msk.bf16.mxu1 %vm594_vm6, %v592_v31  ;;  %v524_v43 = vsel %vm4957_vm3, 0, %v523_v41  ;;  %513 = vst [vmem:[#allocation2 + $0xc] sm:$0x1] %v512_v42  ;;  %v547_v45 = vsel %vm4975_vm5, 0, %v546_v44  ;;  %v558_v46 = vld [vmem:[#allocation2 + $0x50] sm:$0x1] }
  0x21   : > { %525 = vst [vmem:[#allocation2 + $0x3c] sm:$0x1] %v524_v43  ;;  %548 = vst [vmem:[#allocation2 + $0x20] sm:$0x1] %v547_v45  ;;  %v559_v47 = vsel %vm4975_vm5, 0, %v558_v46  ;;  %p4093_p10 = scmp.le.s32.totalorder %s4834_s30, 0 }
  0x22   : > { %560 = vst [vmem:[#allocation2 + $0x50] sm:$0x1] %v559_v47  ;;  %v543_v48 = vld [vmem:[#allocation2 + $0x14] sm:$0x1]  ;;  %v555_v50 = vld [vmem:[#allocation2 + $0x44] sm:$0x1] }
  0x23   : > { %v544_v49 = vsel %vm4975_vm5, 0, %v543_v48  ;;  %v556_v51 = vsel %vm4975_vm5, 0, %v555_v50  ;;  %v520_v52 = vld [vmem:[#allocation2 + $0x30] sm:$0x1]  ;;  %v532_v53 = vld [vmem:[#allocation2 + $0x60] sm:$0x1] }
  0x24   : > { %545 = vst [vmem:[#allocation2 + $0x14] sm:$0x1] %v544_v49  ;;  %557 = vst [vmem:[#allocation2 + $0x44] sm:$0x1] %v556_v51  ;;  %v521_v54 = vsel %vm4957_vm3, 0, %v520_v52  ;;  %v533_v55 = vsel %vm4957_vm3, 0, %v532_v53 }
  0x25   : > { %4412 = vmatmul.mubr.msk.bf16.gmra.mrb[4].mxu0 %vm594_vm6, %v589_v36  ;;  %v517_v56 = vld [vmem:[#allocation2 + $0x24] sm:$0x1]  ;;  %522 = vst [vmem:[#allocation2 + $0x30] sm:$0x1] %v521_v54  ;;  %534 = vst [vmem:[#allocation2 + $0x60] sm:$0x1] %v533_v55 }
  0x26   : > { %4420 = vmatmul.mubr.msk.bf16.gmra.mrb[4].mxu1 %vm594_vm6, %v593_v37  ;;  %v518_v57 = vsel %vm4957_vm3, 0, %v517_v56  ;;  %v529_v58 = vld [vmem:[#allocation2 + $0x54] sm:$0x1]  ;;  %v552_v60 = vld [vmem:[#allocation2 + $0x38] sm:$0x1] }
  0x27   : > { %519 = vst [vmem:[#allocation2 + $0x24] sm:$0x1] %v518_v57  ;;  %v530_v59 = vsel %vm4957_vm3, 0, %v529_v58  ;;  %v553_v61 = vsel %vm4975_vm5, 0, %v552_v60  ;;  %v564_v62 = vld [vmem:[#allocation2 + $0x68] sm:$0x1] }
  0x28   : > { %531 = vst [vmem:[#allocation2 + $0x54] sm:$0x1] %v530_v59  ;;  %554 = vst [vmem:[#allocation2 + $0x38] sm:$0x1] %v553_v61  ;;  %v565_v63 = vsel %vm4975_vm5, 0, %v564_v62 }
  0x29   : > { %566 = vst [vmem:[#allocation2 + $0x68] sm:$0x1] %v565_v63  ;;  %v549_v0 = vld [vmem:[#allocation2 + $0x2c] sm:$0x1]  ;;  %v561_v3 = vld [vmem:[#allocation2 + $0x5c] sm:$0x1] }
  0x2a   : > { %v550_v4 = vsel %vm4975_vm5, 0, %v549_v0  ;;  %v562_v5 = vsel %vm4975_vm5, 0, %v561_v3  ;;  %v5075_v6 = vld [vmem:[%s6125_s4] ss:$0 sm:$0xff]  ;;  %v1033_v50 = vld [vmem:[#allocation2 + $0x18] sm:$0xf] }
  0x2b   : > { %551 = vst [vmem:[#allocation2 + $0x2c] sm:$0x1] %v550_v4  ;;  %563 = vst [vmem:[#allocation2 + $0x5c] sm:$0x1] %v562_v5  ;;  %v5080_v7 = vld [vmem:[%s6126_s5] ss:$0 sm:$0xff] }
  0x2c   : > { %v1061_v57 = vld [vmem:[#allocation2 + $0x48] sm:$0xf] }
  0xf0   : > { %v4409_v8 = vpop.f32.mrb[0].mxu0 }
  0xf1   : > { %v728_v10 = vmul.f32 %v4409_v8, %v5075_v6  ;;  %v4417_v11 = vpop.f32.mrb[0].mxu1  ;;  %v657_v12 = vpop.f32.mrb[1].mxu0  ;;  %v1025_v8 = vld [vmem:[#allocation2 + $0xc] sm:$0xf] }
  0xf2   : > { %v736_v9 = vmul.f32 %v4417_v11, %v5075_v6  ;;  %v726_v13 = vmul.f32 %v5075_v6, %v657_v12  ;;  %v689_v14 = vpop.f32.mrb[1].mxu1  ;;  %v4410_v15 = vpop.f32.mrb[2].mxu0 }
  0xf3   : > { %v750_v16 = vadd.f32 %v5080_v7, %v728_v10  ;;  %v734_v17 = vmul.f32 %v5075_v6, %v689_v14  ;;  %v729_v18 = vmul.f32 %v4410_v15, %v5075_v6  ;;  %v4418_v19 = vpop.f32.mrb[2].mxu1  ;;  %v660_v20 = vpop.f32.mrb[3].mxu0  ;;  %v1054_v15 = vld [vmem:[#allocation2 + $0x3c] sm:$0xf] }
  0xf4   : > { %v758_v21 = vadd.f32 %v5080_v7, %v736_v9  ;;  %v748_v22 = vadd.f32 %v5080_v7, %v726_v13  ;;  %v737_v23 = vmul.f32 %v4418_v19, %v5075_v6  ;;  %v5091_v24 = vpop.f32.mrb[3].mxu1  ;;  %v727_v46 = vmul.f32 %v5075_v6, %v660_v20 }
  0xf5   : > { %vm766_vm8 = vcmp.ge.f32.partialorder %v750_v16, 0.0  ;;  %v782_v25 = vmul.f32 0.01, %v750_v16  ;;  %v756_v26 = vadd.f32 %v5080_v7, %v734_v17  ;;  %v751_v27 = vadd.f32 %v5080_v7, %v729_v18 }
  0xf6   : > { %vm774_vm9 = vcmp.ge.f32.partialorder %v758_v21, 0.0  ;;  %v790_v28 = vmul.f32 0.01, %v758_v21  ;;  %vm764_vm10 = vcmp.ge.f32.partialorder %v748_v22, 0.0  ;;  %v780_v29 = vmul.f32 0.01, %v748_v22 }
  0xf7   : > { %v798_v30 = vsel %vm766_vm8, %v750_v16, %v782_v25  ;;  %vm772_vm11 = vcmp.ge.f32.partialorder %v756_v26, 0.0  ;;  %v788_v31 = vmul.f32 0.01, %v756_v26  ;;  %vm767_vm12 = vcmp.ge.f32.partialorder %v751_v27, 0.0 }
  0xf8   : > { %v4293_v32 = vpack.c.bf16 %v798_v30, %v798_v30  ;;  %v806_v33 = vsel %vm774_vm9, %v758_v21, %v790_v28  ;;  %v796_v34 = vsel %vm764_vm10, %v748_v22, %v780_v29  ;;  %v783_v35 = vmul.f32 0.01, %v751_v27  ;;  %v4413_v36 = vpop.f32.mrb[4].mxu0 }
  0xf9   : > { %v4301_v37 = vpack.c.bf16 %v806_v33, %v806_v33  ;;  %v4291_v38 = vpack.c.bf16 %v796_v34, %v796_v34  ;;  %v804_v39 = vsel %vm772_vm11, %v756_v26, %v788_v31  ;;  %v759_v40 = vadd.f32 %v5080_v7, %v737_v23  ;;  %v4421_v41 = vpop.f32.mrb[4].mxu1  ;;  %v5096_v42 = vpop.f32.mrb[5].mxu0  ;;  %v1037_v23 = vld [vmem:[#allocation2 + $0x20] sm:$0x1] }
  0xfa   : > { %v880_v43 = vshrl.u32 %v4293_v32, 16  ;;  %v4299_v44 = vpack.c.bf16 %v804_v39, %v804_v39  ;;  %v799_v45 = vsel %vm767_vm12, %v751_v27, %v783_v35  ;;  %v5099_v47 = vpop.f32.mrb[5].mxu1  ;;  %v5101_v48 = vpop.f32.mrb[6].mxu0  ;;  %v883_v49 = vshll.u32 %v4293_v32, 16 }
  0xfb   : > { %v948_v51 = vshrl.u32 %v4301_v37, 16  ;;  %v951_v52 = vshll.u32 %v4301_v37, 16  ;;  %v863_v53 = vshrl.u32 %v4291_v38, 16  ;;  %v5103_v54 = vpop.f32.mrb[6].mxu1  ;;  %v5105_v55 = vpop.f32.mrb[7].mxu0  ;;  %v866_v58 = vshll.u32 %v4291_v38, 16 }
  0xfc   : > { %v882_v56 = vrot.slane %v880_v43, 7  ;;  %v931_v59 = vshrl.u32 %v4299_v44, 16  ;;  %v4294_v60 = vpack.c.bf16 %v799_v45, %v799_v45  ;;  %v5107_v61 = vpop.f32.mrb[7].mxu1  ;;  %v934_v3 = vshll.u32 %v4299_v44, 16 }
  0xfd   : > { %v5115_v63 = vrot.slane %v948_v51, 7  ;;  %v5117_v0 = vrot.slane %v863_v53, 7  ;;  %v791_v4 = vmul.f32 0.01, %v759_v40  ;;  %vm775_vm15 = vcmp.ge.f32.partialorder %v759_v40, 0.0 }
  0xfe   : > { %v885_v5 = vor.u32 %v883_v49, %v882_v56  ;;  %v5119_v10 = vrot.slane %v931_v59, 7  ;;  %v888_v11 = vshrl.u32 %v4294_v60, 16  ;;  %v886_v12 = vrot.slane %v882_v56, 4 }
  0xff   : > { %v953_v9 = vor.u32 %v951_v52, %v5115_v63  ;;  %v954_v13 = vrot.slane %v5115_v63, 4  ;;  %v868_v14 = vor.u32 %v866_v58, %v5117_v0  ;;  %v869_v17 = vrot.slane %v5117_v0, 4 }
 0x100   : > { %v1034_v16 = vsel %vm5111_vm14, %v885_v5, %v1033_v50  ;;  %v936_v18 = vor.u32 %v934_v3, %v5119_v10  ;;  %v890_v19 = vrot.slane %v888_v11, 7  ;;  %v891_v22 = vshll.u32 %v4294_v60, 16 }
 0x101   : > { %1035 = vst [vmem:[#allocation2 + $0x18] sm:$0xf] %v1034_v16  ;;  %v1062_v20 = vsel %vm5111_vm14, %v953_v9, %v1061_v57  ;;  %v1026_v21 = vsel %vm5111_vm14, %v868_v14, %v1025_v8  ;;  %v807_v25 = vsel %vm775_vm15, %v759_v40, %v791_v4  ;;  %v749_v30 = vadd.f32 %v5080_v7, %v727_v46  ;;  %v1065_v46 = vld [vmem:[#allocation2 + $0x50] sm:$0x1] }
 0x102   : > { %1063 = vst [vmem:[#allocation2 + $0x48] sm:$0xf] %v1062_v20  ;;  %1027 = vst [vmem:[#allocation2 + $0xc] sm:$0xf] %v1026_v21  ;;  %v1055_v26 = vsel %vm5111_vm14, %v936_v18, %v1054_v15  ;;  %v895_v28 = vrot.slane %v890_v19, 4  ;;  %v4302_v29 = vpack.c.bf16 %v807_v25, %v807_v25  ;;  %v893_v31 = vor.u32 %v891_v22, %v890_v19 }
 0x103   : > { %1056 = vst [vmem:[#allocation2 + $0x3c] sm:$0xf] %v1055_v26  ;;  %v735_v32 = vmul.f32 %v5075_v6, %v5091_v24  ;;  %v732_v33 = vmul.f32 %v4413_v36, %v5075_v6  ;;  %v740_v34 = vmul.f32 %v4421_v41, %v5075_v6  ;;  %vm765_vm1 = vcmp.ge.f32.partialorder %v749_v30, 0.0 }
 0x104   : > { %v1038_v35 = vsel %vm4957_vm3, %v895_v28, %v1037_v23  ;;  %v956_v37 = vshrl.u32 %v4302_v29, 16  ;;  %v959_v38 = vshll.u32 %v4302_v29, 16  ;;  %v894_v39 = vsel %vm5136_vm0, %v886_v12, %v893_v31 }
 0x105   : > { %1039 = vst [vmem:[#allocation2 + $0x20] sm:$0x1] %v1038_v35  ;;  %v781_v40 = vmul.f32 0.01, %v749_v30  ;;  %v757_v43 = vadd.f32 %v5080_v7, %v735_v32  ;;  %v754_v44 = vadd.f32 %v5080_v7, %v732_v33  ;;  %1036 = vst.msk [vmem:[#allocation2 + $0x1c] sm:$0xf] %vm1023_vm7, %v894_v39  ;;  %v762_v36 = vadd.f32 %v5080_v7, %v740_v34 }
 0x106   : > { %v958_v24 = vrot.slane %v956_v37, 7  ;;  %v730_v41 = vmul.f32 %v5075_v6, %v5096_v42  ;;  %v738_v45 = vmul.f32 %v5075_v6, %v5099_v47  ;;  %v937_v14 = vrot.slane %v5119_v10, 4  ;;  %v1047_v34 = vld [vmem:[#allocation2 + $0x30] sm:$0xf] }
 0x107   : > { %v797_v49 = vsel %vm765_vm1, %v749_v30, %v781_v40  ;;  %vm773_vm2 = vcmp.ge.f32.partialorder %v757_v43, 0.0  ;;  %v789_v50 = vmul.f32 0.01, %v757_v43  ;;  %vm770_vm4 = vcmp.ge.f32.partialorder %v754_v44, 0.0  ;;  %v1058_v30 = vld [vmem:[#allocation2 + $0x44] sm:$0x1] }
 0x108   : > { %v961_v51 = vor.u32 %v959_v38, %v958_v24  ;;  %v963_v52 = vrot.slane %v958_v24, 4  ;;  %v4292_v53 = vpack.c.bf16 %v797_v49, %v797_v49  ;;  %v786_v56 = vmul.f32 0.01, %v754_v44  ;;  %v1075_v38 = vld [vmem:[#allocation2 + $0x60] sm:$0xf] }
 0x109   : > { %v805_v57 = vsel %vm773_vm2, %v757_v43, %v789_v50  ;;  %vm778_vm5 = vcmp.ge.f32.partialorder %v762_v36, 0.0  ;;  %v794_v58 = vmul.f32 0.01, %v762_v36  ;;  %v752_v59 = vadd.f32 %v5080_v7, %v730_v41  ;;  %v1040_v49 = vld [vmem:[#allocation2 + $0x24] sm:$0xf] }
 0x10a   : > { %v962_v42 = vsel %vm5136_vm0, %v954_v13, %v961_v51  ;;  %v1066_v47 = vsel %vm4957_vm3, %v963_v52, %v1065_v46  ;;  %v871_v60 = vshrl.u32 %v4292_v53, 16  ;;  %v874_v63 = vshll.u32 %v4292_v53, 16  ;;  %v1030_v13 = vld [vmem:[#allocation2 + $0x14] sm:$0x1] }
 0x10b   : > { %1064 = vst.msk [vmem:[#allocation2 + $0x4c] sm:$0xf] %vm1023_vm7, %v962_v42  ;;  %1067 = vst [vmem:[#allocation2 + $0x50] sm:$0x1] %v1066_v47  ;;  %v4300_v3 = vpack.c.bf16 %v805_v57, %v805_v57  ;;  %v802_v4 = vsel %vm770_vm4, %v754_v44, %v786_v56  ;;  %v810_v5 = vsel %vm778_vm5, %v762_v36, %v794_v58  ;;  %vm768_vm8 = vcmp.ge.f32.partialorder %v752_v59, 0.0 }
 0x10c   : > { %v873_v8 = vrot.slane %v871_v60, 7  ;;  %v4297_v11 = vpack.c.bf16 %v802_v4, %v802_v4  ;;  %v4305_v12 = vpack.c.bf16 %v810_v5, %v810_v5  ;;  %v784_v9 = vmul.f32 0.01, %v752_v59 }
 0x10d   : > { %v939_v15 = vshrl.u32 %v4300_v3, 16  ;;  %v942_v16 = vshll.u32 %v4300_v3, 16  ;;  %v760_v18 = vadd.f32 %v5080_v7, %v738_v45  ;;  %v733_v22 = vmul.f32 %v5101_v48, %v5075_v6 }
 0x10e   : > { %v876_v19 = vor.u32 %v874_v63, %v873_v8  ;;  %v878_v20 = vrot.slane %v873_v8, 4  ;;  %v914_v21 = vshrl.u32 %v4297_v11, 16  ;;  %v917_v25 = vshll.u32 %v4297_v11, 16  ;;  %v1068_v11 = vld [vmem:[#allocation2 + $0x54] sm:$0xf] }
 0x10f   : > { %v941_v23 = vrot.slane %v939_v15, 7  ;;  %v982_v26 = vshrl.u32 %v4305_v12, 16  ;;  %v800_v28 = vsel %vm768_vm8, %v752_v59, %v784_v9  ;;  %v985_v37 = vshll.u32 %v4305_v12, 16 }
 0x110   : > { %v877_v10 = vsel %vm5136_vm0, %v869_v17, %v876_v19  ;;  %v1031_v29 = vsel %vm4957_vm3, %v878_v20, %v1030_v13  ;;  %v5175_v31 = vrot.slane %v914_v21, 7  ;;  %v4295_v32 = vpack.c.bf16 %v800_v28, %v800_v28 }
 0x111   : > { %1029 = vst.msk [vmem:[#allocation2 + $0x10] sm:$0xf] %vm1023_vm7, %v877_v10  ;;  %1032 = vst [vmem:[#allocation2 + $0x14] sm:$0x1] %v1031_v29  ;;  %v944_v48 = vor.u32 %v942_v16, %v941_v23  ;;  %v946_v33 = vrot.slane %v941_v23, 4  ;;  %v5178_v35 = vrot.slane %v982_v26, 7  ;;  %v755_v45 = vadd.f32 %v5080_v7, %v733_v22 }
 0x112   : > { %v919_v0 = vor.u32 %v917_v25, %v5175_v31  ;;  %v897_v17 = vshrl.u32 %v4295_v32, 16  ;;  %vm776_vm9 = vcmp.ge.f32.partialorder %v760_v18, 0.0  ;;  %v900_v44 = vshll.u32 %v4295_v32, 16  ;;  %v1051_v23 = vld [vmem:[#allocation2 + $0x38] sm:$0x1] }
 0x113   : > { %v945_v39 = vsel %vm5136_vm0, %v937_v14, %v944_v48  ;;  %v1059_v40 = vsel %vm4957_vm3, %v946_v33, %v1058_v30  ;;  %v987_v43 = vor.u32 %v985_v37, %v5178_v35  ;;  %v792_v41 = vmul.f32 0.01, %v760_v18 }
 0x114   : > { %1057 = vst.msk [vmem:[#allocation2 + $0x40] sm:$0xf] %vm1023_vm7, %v945_v39  ;;  %1060 = vst [vmem:[#allocation2 + $0x44] sm:$0x1] %v1059_v40  ;;  %v1048_v24 = vsel %vm5111_vm14, %v919_v0, %v1047_v34  ;;  %v5189_v36 = vrot.slane %v897_v17, 7  ;;  %v741_v50 = vmul.f32 %v5103_v54, %v5075_v6  ;;  %v731_v51 = vmul.f32 %v5075_v6, %v5105_v55 }
 0x115   : > { %1049 = vst [vmem:[#allocation2 + $0x30] sm:$0xf] %v1048_v24  ;;  %v1076_v46 = vsel %vm5111_vm14, %v987_v43, %v1075_v38  ;;  %v739_v52 = vmul.f32 %v5075_v6, %v5107_v61  ;;  %v808_v56 = vsel %vm776_vm9, %v760_v18, %v792_v41  ;;  %vm771_vm10 = vcmp.ge.f32.partialorder %v755_v45, 0.0  ;;  %v1079_v38 = vld [vmem:[#allocation2 + $0x68] sm:$0x1] }
 0x116   : > { %1077 = vst [vmem:[#allocation2 + $0x60] sm:$0xf] %v1076_v46  ;;  %v902_v53 = vor.u32 %v900_v44, %v5189_v36  ;;  %v4303_v57 = vpack.c.bf16 %v808_v56, %v808_v56  ;;  %v787_v58 = vmul.f32 0.01, %v755_v45  ;;  %v763_v59 = vadd.f32 %v5080_v7, %v741_v50  ;;  %v1044_v17 = vld [vmem:[#allocation2 + $0x2c] sm:$0x1] }
 0x117   : > { %v753_v42 = vadd.f32 %v5080_v7, %v731_v51  ;;  %v761_v55 = vadd.f32 %v5080_v7, %v739_v52  ;;  %v920_v21 = vrot.slane %v5175_v31, 4  ;;  %v988_v28 = vrot.slane %v5178_v35, 4  ;;  %v1072_v50 = vld [vmem:[#allocation2 + $0x5c] sm:$0x1] }
 0x118   : > { %v1041_v54 = vsel %vm5111_vm14, %v902_v53, %v1040_v49  ;;  %v965_v47 = vshrl.u32 %v4303_v57, 16  ;;  %v803_v61 = vsel %vm771_vm10, %v755_v45, %v787_v58  ;;  %vm779_vm11 = vcmp.ge.f32.partialorder %v763_v59, 0.0  ;;  %v1086_v58 = vld [vmem:[%s5033_s28] sm:$0xff] (!%p4093_p10) }
 0x119   : > { %1042 = vst [vmem:[#allocation2 + $0x24] sm:$0xf] %v1041_v54  ;;  %v4298_v60 = vpack.c.bf16 %v803_v61, %v803_v61  ;;  %v795_v63 = vmul.f32 0.01, %v763_v59  ;;  %vm769_vm12 = vcmp.ge.f32.partialorder %v753_v42, 0.0  ;;  %v968_v5 = vshll.u32 %v4303_v57, 16 }
 0x11a   : > { %v785_v3 = vmul.f32 0.01, %v753_v42  ;;  %v967_v4 = vrot.slane %v965_v47, 7  ;;  %vm777_vm13 = vcmp.ge.f32.partialorder %v761_v55, 0.0  ;;  %v793_v8 = vmul.f32 0.01, %v761_v55 }
 0x11b   : > { %v922_v12 = vshrl.u32 %v4298_v60, 16  ;;  %v811_v9 = vsel %vm779_vm11, %v763_v59, %v795_v63  ;;  %v925_v19 = vshll.u32 %v4298_v60, 16  ;;  %v903_v37 = vrot.slane %v5189_v36, 4  ;;  %v1087_v59 = vld [vmem:[%s5033_s28 + $0x8] sm:$0xff] (!%p4093_p10) }
 0x11c   : > { %v801_v14 = vsel %vm769_vm12, %v753_v42, %v785_v3  ;;  %v970_v13 = vor.u32 %v968_v5, %v967_v4  ;;  %v4306_v15 = vpack.c.bf16 %v811_v9, %v811_v9  ;;  %v809_v20 = vsel %vm777_vm13, %v761_v55, %v793_v8 }
 0x11d   : > { %v4296_v16 = vpack.c.bf16 %v801_v14, %v801_v14  ;;  %v924_v18 = vrot.slane %v922_v12, 7  ;;  %v4304_v30 = vpack.c.bf16 %v809_v20, %v809_v20  ;;  %v971_v51 = vrot.slane %v967_v4, 4  ;;  %v1169_v20 = vld [vmem:[#allocation2] sm:$0xf] (!%p4093_p10) }
 0x11e   : > { %v1069_v22 = vsel %vm5111_vm14, %v970_v13, %v1068_v11  ;;  %v990_v25 = vshrl.u32 %v4306_v15, 16  ;;  %v993_v48 = vshll.u32 %v4306_v15, 16  ;;  %v4852_v42 = vmov (!%p4093_p10), 0.0  }
 0x11f   : > { %v905_v26 = vshrl.u32 %v4296_v16, 16  ;;  %1070 = vst [vmem:[#allocation2 + $0x54] sm:$0xf] %v1069_v22  ;;  %v927_v10 = vor.u32 %v925_v19, %v924_v18  ;;  %v929_v29 = vrot.slane %v924_v18, 4  ;;  %v908_v34 = vshll.u32 %v4296_v16, 16  ;;  %4423 = vmatprep.subr.bf16.mxu0 (!%p4093_p10), %v4852_v42 }
 0x120   : > { %v992_v32 = vrot.slane %v990_v25, 7  ;;  %v973_v39 = vshrl.u32 %v4304_v30, 16  ;;  %v976_v41 = vshll.u32 %v4304_v30, 16  ;;  %vm4853_vm15 = vmmov (!%p4093_p10), 0   ;;  %4424 = vmatpush3.bf16.msra.mxu0 (!%p4093_p10), %v4946_v1  ;;  %v1173_v25 = vld [vmem:[#allocation2 + $0x8] sm:$0x1] (!%p4093_p10) }
 0x121   : > { %v907_v33 = vrot.slane %v905_v26, 7  ;;  %v928_v31 = vsel %vm5136_vm0, %v920_v21, %v927_v10  ;;  %v1052_v0 = vsel %vm4957_vm3, %v929_v29, %v1051_v23  ;;  %1085 = sbr.rel (%p4093_p10) target bundleno = 522 (0x20a), region = 60  ;;  %4425 = vmatprep.mubr.msk.bf16.mxu0 (!%p4093_p10), %vm4853_vm15, %v4852_v42  ;;  %v1088_v54 = vpack.c.bf16 (!%p4093_p10), %v1087_v59, %v1086_v58 }
 0x122   : > { %1050 = vst.msk [vmem:[#allocation2 + $0x34] sm:$0xf] %vm1023_vm7, %v928_v31  ;;  %1053 = vst [vmem:[#allocation2 + $0x38] sm:$0x1] %v1052_v0  ;;  %v995_v35 = vor.u32 %v993_v48, %v992_v32  ;;  %v997_v40 = vrot.slane %v992_v32, 4  ;;  %v975_v24 = vrot.slane %v973_v39, 7 }
 0x123   : > { %v910_v43 = vor.u32 %v908_v34, %v907_v33  ;;  %v912_v44 = vrot.slane %v907_v33, 4  ;;  %4426 = vmatmul.mubr.msk.bf16.vlgmr.msra.gmra.mrb[0].mxu0 (!%p4093_p10), %vm594_vm6, %v1088_v54 }
 0x124   : > { %v996_v36 = vsel %vm5136_vm0, %v988_v28, %v995_v35  ;;  %v1080_v45 = vsel %vm4957_vm3, %v997_v40, %v1079_v38  ;;  %v978_v52 = vor.u32 %v976_v41, %v975_v24  ;;  %v980_v53 = vrot.slane %v975_v24, 4 }
 0x125   : > { %v911_v46 = vsel %vm5136_vm0, %v903_v37, %v910_v43  ;;  %v1045_v49 = vsel %vm4957_vm3, %v912_v44, %v1044_v17  ;;  %1078 = vst.msk [vmem:[#allocation2 + $0x64] sm:$0xf] %vm1023_vm7, %v996_v36  ;;  %1081 = vst [vmem:[#allocation2 + $0x68] sm:$0x1] %v1080_v45 }
 0x126   : > { %1043 = vst.msk [vmem:[#allocation2 + $0x28] sm:$0xf] %vm1023_vm7, %v911_v46  ;;  %1046 = vst [vmem:[#allocation2 + $0x2c] sm:$0x1] %v1045_v49  ;;  %v979_v56 = vsel %vm5136_vm0, %v971_v51, %v978_v52  ;;  %v1073_v57 = vsel %vm4957_vm3, %v980_v53, %v1072_v50 }
 0x127   : > { %1071 = vst.msk [vmem:[#allocation2 + $0x58] sm:$0xf] %vm1023_vm7, %v979_v56  ;;  %1074 = vst [vmem:[#allocation2 + $0x5c] sm:$0x1] %v1073_v57 }
 0x1f6   : > { %v1126_v55 = vpop.f32.mrb[0].mxu0 }
 0x1f7   : > { %v1133_v47 = vmul.f32 %v5075_v6, %v1126_v55  ;;  %v4427_v61 = vpop.f32.mrb[1].mxu0 }
 0x1f8   : > { %v1129_v60 = vpop.f32.mrb[2].mxu0 }
 0x1f9   : > { %v1135_v63 = vadd.f32 %v5080_v7, %v1133_v47  ;;  %v1134_v3 = vmul.f32 %v5075_v6, %v1129_v60  ;;  %v4428_v4 = vpop.f32.mrb[3].mxu0 }
 0x1fb   : > { %vm1137_vm1 = vcmp.ge.f32.partialorder %v1135_v63, 0.0  ;;  %v1139_v5 = vmul.f32 0.01, %v1135_v63  ;;  %v1136_v8 = vadd.f32 %v5080_v7, %v1134_v3 }
 0x1fd   : > { %v1141_v11 = vsel %vm1137_vm1, %v1135_v63, %v1139_v5  ;;  %vm1138_vm2 = vcmp.ge.f32.partialorder %v1136_v8, 0.0  ;;  %v1140_v12 = vmul.f32 0.01, %v1136_v8 }
 0x1fe   : > { %v4307_v9 = vpack.c.bf16 %v1141_v11, %v1141_v11 }
 0x1ff   : > { %v1142_v14 = vsel %vm1138_vm2, %v1136_v8, %v1140_v12 }
 0x200   : > { %v1150_v13 = vshrl.u32 %v4307_v9, 16  ;;  %v4308_v15 = vpack.c.bf16 %v1142_v14, %v1142_v14  ;;  %v1153_v18 = vshll.u32 %v4307_v9, 16 }
 0x202   : > { %v1152_v16 = vrot.slane %v1150_v13, 7  ;;  %v1158_v19 = vshrl.u32 %v4308_v15, 16  ;;  %v1161_v23 = vshll.u32 %v4308_v15, 16 }
 0x204   : > { %v1155_v21 = vor.u32 %v1153_v18, %v1152_v16  ;;  %v1160_v22 = vrot.slane %v1158_v19, 7  ;;  %v1156_v26 = vrot.slane %v1152_v16, 4 }
 0x206   : > { %v1170_v28 = vsel %vm5111_vm14, %v1155_v21, %v1169_v20  ;;  %v1163_v10 = vor.u32 %v1161_v23, %v1160_v22  ;;  %v1165_v29 = vrot.slane %v1160_v22, 4 }
 0x207   : > { %1171 = vst [vmem:[#allocation2] sm:$0xf] %v1170_v28 }
 0x208   : > { %v1164_v30 = vsel %vm5136_vm0, %v1156_v26, %v1163_v10  ;;  %v1174_v32 = vsel %vm4957_vm3, %v1165_v29, %v1173_v25 }
 0x209   : > { %1172 = vst.msk [vmem:[#allocation2 + $0x4] sm:$0xf] %vm1023_vm7, %v1164_v30  ;;  %1175 = vst [vmem:[#allocation2 + $0x8] sm:$0x1] %v1174_v32 }
 0x20a PF: > { %p4097_p11 = scmp.ne.s32.totalorder %s4834_s30, 0 }
 0x20b   : > { %v4854_v37 = vmov (!%p4097_p11), 0  }
 0x20c   : > { %1179 = sbr.rel (%p4097_p11) target bundleno = 531 (0x213), region = 64  ;;  %1183 = vst.msk [vmem:[#allocation2 + $0x4] sm:$0xf] (!%p4097_p11), %vm1023_vm7, %v4854_v37 }
 0x20e   : > { %v1180_v48 = vld [vmem:[#allocation2] sm:$0xf] (!%p4097_p11) }
 0x20f   : > { %v1181_v34 = vsel (!%p4097_p11), %vm5111_vm14, 0, %v1180_v48 }
 0x210   : > { %v1184_v33 = vld [vmem:[#allocation2 + $0x8] sm:$0x1] (!%p4097_p11)  ;;  %1182 = vst [vmem:[#allocation2] sm:$0xf] (!%p4097_p11), %v1181_v34 }
 0x211   : > { %v1185_v31 = vsel (!%p4097_p11), %vm4957_vm3, 0, %v1184_v33 }
 0x212   : > { %1186 = vst [vmem:[#allocation2 + $0x8] sm:$0x1] (!%p4097_p11), %v1185_v31 }
 0x213 PF: > { %p4098_p12 = scmp.ge.s32.totalorder %s4834_s30, 1 }
 0x214   : > { %v1191_v0 = vld [vmem:[%s5038_s18] sm:$0xff] (!%p4098_p12)  ;;  %v1192_v38 = vld [vmem:[%s5038_s18 + $0x8] sm:$0xff] (!%p4098_p12)  ;;  %v4855_v17 = vmov (!%p4098_p12), 0.0   ;;  %vm4856_vm4 = vmmov (!%p4098_p12), 0  }
 0x215   : > { %1190 = sbr.rel (%p4098_p12) target bundleno = 768 (0x300), region = 68  ;;  %4429 = vmatprep.subr.bf16.mxu0 (!%p4098_p12), %v4855_v17  ;;  %4431 = vmatprep.mubr.msk.bf16.mxu0 (!%p4098_p12), %vm4856_vm4, %v4855_v17  ;;  %v1193_v39 = vpack.c.bf16 (!%p4098_p12), %v1192_v38, %v1191_v0  ;;  %v1275_v59 = vld [vmem:[#allocation2 + $0x6c] sm:$0xf] (!%p4098_p12) }
 0x216   : > { %4430 = vmatpush3.bf16.msra.mxu0 (!%p4098_p12), %v4946_v1 }
 0x219   : > { %4432 = vmatmul.mubr.msk.bf16.vlgmr.msra.gmra.mrb[0].mxu0 (!%p4098_p12), %vm594_vm6, %v1193_v39 }
 0x2ec   : > { %v1231_v35 = vpop.f32.mrb[0].mxu0 }
 0x2ed   : > { %v1238_v40 = vmul.f32 %v5075_v6, %v1231_v35  ;;  %v4433_v43 = vpop.f32.mrb[1].mxu0 }
 0x2ee   : > { %v1234_v44 = vpop.f32.mrb[2].mxu0 }
 0x2ef   : > { %v1240_v24 = vadd.f32 %v5080_v7, %v1238_v40  ;;  %v1239_v41 = vmul.f32 %v5075_v6, %v1234_v44  ;;  %v4434_v36 = vpop.f32.mrb[3].mxu0  ;;  %v1279_v6 = vld [vmem:[#allocation2 + $0x74] sm:$0x1] }
 0x2f1   : > { %vm1242_vm5 = vcmp.ge.f32.partialorder %v1240_v24, 0.0  ;;  %v1244_v45 = vmul.f32 0.01, %v1240_v24  ;;  %v1241_v46 = vadd.f32 %v5080_v7, %v1239_v41 }
 0x2f3   : > { %v1246_v49 = vsel %vm1242_vm5, %v1240_v24, %v1244_v45  ;;  %vm1243_vm8 = vcmp.ge.f32.partialorder %v1241_v46, 0.0  ;;  %v1245_v50 = vmul.f32 0.01, %v1241_v46 }
 0x2f4   : > { %v4309_v1 = vpack.c.bf16 %v1246_v49, %v1246_v49 }
 0x2f5   : > { %v1247_v51 = vsel %vm1243_vm8, %v1241_v46, %v1245_v50 }
 0x2f6   : > { %v1255_v52 = vshrl.u32 %v4309_v1, 16  ;;  %v4310_v53 = vpack.c.bf16 %v1247_v51, %v1247_v51  ;;  %v1258_v57 = vshll.u32 %v4309_v1, 16 }
 0x2f8   : > { %v1257_v56 = vrot.slane %v1255_v52, 7  ;;  %v1263_v58 = vshrl.u32 %v4310_v53, 16  ;;  %v1266_v55 = vshll.u32 %v4310_v53, 16 }
 0x2fa   : > { %v1260_v42 = vor.u32 %v1258_v57, %v1257_v56  ;;  %v1265_v54 = vrot.slane %v1263_v58, 7  ;;  %v1261_v47 = vrot.slane %v1257_v56, 4 }
 0x2fc   : > { %v1276_v61 = vsel %vm5111_vm14, %v1260_v42, %v1275_v59  ;;  %v1268_v7 = vor.u32 %v1266_v55, %v1265_v54  ;;  %v1270_v60 = vrot.slane %v1265_v54, 4 }
 0x2fd   : > { %1277 = vst [vmem:[#allocation2 + $0x6c] sm:$0xf] %v1276_v61 }
 0x2fe   : > { %v1269_v63 = vsel %vm5136_vm0, %v1261_v47, %v1268_v7  ;;  %v1280_v3 = vsel %vm4957_vm3, %v1270_v60, %v1279_v6 }
 0x2ff   : > { %1278 = vst.msk [vmem:[#allocation2 + $0x70] sm:$0xf] %vm1023_vm7, %v1269_v63  ;;  %1281 = vst [vmem:[#allocation2 + $0x74] sm:$0x1] %v1280_v3 }
 0x300 PF: > { %p4102_p13 = scmp.ne.s32.totalorder %s4834_s30, 1 }
 0x301   : > { %v4857_v11 = vmov (!%p4102_p13), 0  }
 0x302   : > { %1285 = sbr.rel (%p4102_p13) target bundleno = 777 (0x309), region = 72  ;;  %1290 = vst.msk [vmem:[#allocation2 + $0x70] sm:$0xf] (!%p4102_p13), %vm1023_vm7, %v4857_v11 }
 0x304   : > { %v1287_v4 = vld [vmem:[#allocation2 + $0x6c] sm:$0xf] (!%p4102_p13) }
 0x305   : > { %v1288_v8 = vsel (!%p4102_p13), %vm5111_vm14, 0, %v1287_v4 }
 0x306   : > { %v1291_v5 = vld [vmem:[#allocation2 + $0x74] sm:$0x1] (!%p4102_p13)  ;;  %1289 = vst [vmem:[#allocation2 + $0x6c] sm:$0xf] (!%p4102_p13), %v1288_v8 }
 0x307   : > { %v1292_v27 = vsel (!%p4102_p13), %vm4957_vm3, 0, %v1291_v5 }
 0x308   : > { %1293 = vst [vmem:[#allocation2 + $0x74] sm:$0x1] (!%p4102_p13), %v1292_v27 }
 0x309 PF: > { %v4103_v12 = vld [vmem:[%s6127_s6 + $0x2] sm:$0x3]  ;;  %vm1565_vm0 = vcmask 1041408   ;;  %v4178_v9 = vld [vmem:[%s6127_s6 + $0x8] sm:$0x3]  ;;  %vm1540_vm9 = vcmask 31744  }
 0x30a   : > { %4731 = vmatprep.subr.msk.bf16.mxu1 %vm1565_vm0, %v4103_v12  ;;  %4735 = vmatprep.subr.msk.bf16.mxu0 %vm1565_vm0, %v4178_v9  ;;  %v1567_v62 = vsel %vm1565_vm0, %v4103_v12, 0  ;;  %v5286_v2 = vsel %vm1565_vm0, %v4178_v9, 0  ;;  %v5288_v14 = vld [vmem:[#allocation2] sm:$0xf]  ;;  %v5290_v13 = vld [vmem:[#allocation2 + $0x4] sm:$0xf] }
 0x30b   : > { %4436 = vmatpush3.bf16.msra.mxu1 %v1567_v62  ;;  %4508 = vmatpush3.bf16.msra.mxu0 %v5286_v2  ;;  %v5293_v15 = vld [vmem:[#allocation2 + $0x8] sm:$0x1]  ;;  %vm1319_vm3 = vsmask.f32 3328  ;;  %vm1320_vm7 = vsmask.f32 7440 }
 0x30c   : > { %v1323_v16 = vshrl.u32 %v5288_v14, 16  ;;  %v1326_v18 = vshll.u32 %v5288_v14, 16  ;;  %v1332_v19 = vshll.u32 %v5290_v13, 16  ;;  %v1336_v20 = vshrl.u32 %v5290_v13, 16  ;;  %v1310_v21 = vld [vmem:[%s6127_s6] sm:$0x3]  ;;  %vm5322_vm14 = vmor %vm1319_vm3, %vm1320_vm7 }
 0x30d   : > { %v1342_v22 = vshll.u32 %v5293_v15, 16  ;;  %4732 = vmatprep.subr.msk.bf16.mxu1 %vm1565_vm0, %v1310_v21  ;;  %v2277_v23 = vld [vmem:[#allocation2 + $0xc] sm:$0xf]  ;;  %v5304_v25 = vld [vmem:[#allocation2 + $0x10] sm:$0xf]  ;;  %v1731_v9 = vsel %vm1565_vm0, %v1310_v21, 0 }
 0x30e   : > { %v1325_v26 = vrot.slane %v1323_v16, 4  ;;  %v1328_v28 = vrot.slane %v1326_v18, 5  ;;  %v1334_v10 = vrot.slane %v1332_v19, 5  ;;  %v1338_v29 = vrot.slane %v1336_v20, 4  ;;  %v5306_v30 = vld [vmem:[#allocation2 + $0x14] sm:$0x1] }
 0x30f   : > { %v1344_v32 = vrot.slane %v1342_v22, 5  ;;  %v2302_v48 = vshrl.u32 %v2277_v23, 16  ;;  %v2305_v33 = vshll.u32 %v2277_v23, 16  ;;  %v2311_v34 = vshll.u32 %v5304_v25, 16  ;;  %v5312_v37 = vld [vmem:[%s6127_s6 + $0xa] sm:$0x3] }
 0x310   : > { %v1329_v31 = vor.u32 %v1328_v28, %v1325_v26  ;;  %v1339_v0 = vor.u32 %v1338_v29, %v1334_v10  ;;  %v2315_v38 = vshrl.u32 %v5304_v25, 16  ;;  %v2321_v17 = vshll.u32 %v5306_v30, 16  ;;  %4737 = vmatprep.subr.msk.bf16.mxu0 %vm1565_vm0, %v5312_v37  ;;  %v5318_v39 = vld [vmem:[#allocation2 + $0xc] sm:$0xf]  ;;  %v5326_v24 = vld [vmem:[#allocation2 + $0x10] sm:$0xf] }
 0x311   : > { %v2304_v40 = vrot.slane %v2302_v48, 4  ;;  %v2307_v43 = vrot.slane %v2305_v33, 5  ;;  %v2313_v44 = vrot.slane %v2311_v34, 5  ;;  %v5328_v50 = vld [vmem:[#allocation2 + $0x14] sm:$0x1]  ;;  %v1347_v1 = vshrl.u32 %v5318_v39, 16 }
 0x312   : > { %v1330_v41 = vrot.slane %v1329_v31, 4  ;;  %v1340_v36 = vrot.slane %v1339_v0, 4  ;;  %v2317_v45 = vrot.slane %v2315_v38, 4  ;;  %v2323_v49 = vrot.slane %v2321_v17, 5  ;;  %v2280_v7 = vld [vmem:[#allocation2 + $0x18] sm:$0xf] }
 0x313   : > { %v2308_v46 = vor.u32 %v2307_v43, %v2304_v40  ;;  %v1350_v51 = vshll.u32 %v5318_v39, 16  ;;  %v1356_v57 = vshll.u32 %v5326_v24, 16  ;;  %v1349_v42 = vrot.slane %v1347_v1, 4  ;;  %v5344_v5 = vld [vmem:[#allocation2 + $0x1c] sm:$0xf] }
 0x314   : > { %v1335_v52 = vsel %vm5322_vm14, %v1330_v41, %v1334_v10  ;;  %v1345_v53 = vsel %vm5322_vm14, %v1340_v36, %v1344_v32  ;;  %v2318_v56 = vor.u32 %v2317_v45, %v2313_v44  ;;  %v1360_v47 = vshrl.u32 %v5326_v24, 16  ;;  %v5346_v8 = vld [vmem:[#allocation2 + $0x20] sm:$0x1]  ;;  %v5358_v32 = vld [vmem:[#allocation2 + $0x18] sm:$0xf] }
 0x315   : > { %v4104_v58 = vcombine.low %v1335_v52, %v1345_v53  ;;  %v2309_v59 = vrot.slane %v2308_v46, 4  ;;  %v1352_v54 = vrot.slane %v1350_v51, 5  ;;  %v1358_v6 = vrot.slane %v1356_v57, 5  ;;  %v5360_v0 = vld [vmem:[#allocation2 + $0x1c] sm:$0xf] }
 0x316   : > { %v2319_v55 = vrot.slane %v2318_v56, 4  ;;  %v1366_v61 = vshll.u32 %v5328_v50, 16  ;;  %v2693_v63 = vrot.slane %v5304_v25, 5  ;;  %v2696_v3 = vrot.slane %v5306_v30, 5  ;;  %v6018_v35 = vld [vmem:[%s6128_s7] ss:$0 sm:$0xff] }
 0x317   : > { %4437 = vmatprep.mubr.msk.bf16.mxu1 %vm1540_vm9, %v4104_v58  ;;  %v2314_v60 = vsel %vm5322_vm14, %v2309_v59, %v2313_v44  ;;  %v1353_v4 = vor.u32 %v1352_v54, %v1349_v42  ;;  %v1362_v27 = vrot.slane %v1360_v47, 4  ;;  %v2326_v18 = vshrl.u32 %v2280_v7, 16  ;;  %v5369_v44 = vld [vmem:[#allocation2 + $0x20] sm:$0x1]  ;;  %v5378_v59 = vld [vmem:[#allocation2 + $0x28] sm:$0xf] }
 0x318   : > { %v2324_v11 = vsel %vm5322_vm14, %v2319_v55, %v2323_v49  ;;  %v1368_v12 = vrot.slane %v1366_v61, 5  ;;  %v2329_v19 = vshll.u32 %v2280_v7, 16  ;;  %v2335_v22 = vshll.u32 %v5344_v5, 16  ;;  %v2283_v49 = vld [vmem:[#allocation2 + $0x24] sm:$0xf] }
 0x319   : > { %v4179_v62 = vcombine.low %v2314_v60, %v2324_v11  ;;  %v1354_v16 = vrot.slane %v1353_v4, 4  ;;  %v1363_v20 = vor.u32 %v1362_v27, %v1358_v6  ;;  %v2339_v23 = vshrl.u32 %v5344_v5, 16  ;;  %v5387_v11 = vld [vmem:[#allocation2 + $0x24] sm:$0xf] }
 0x31a   : > { %v2345_v26 = vshll.u32 %v5346_v8, 16  ;;  %v2328_v10 = vrot.slane %v2326_v18, 4  ;;  %v2331_v29 = vrot.slane %v2329_v19, 5  ;;  %v2700_v21 = vrot.slane %v5344_v5, 5  ;;  %v5390_v18 = vld [vmem:[#allocation2 + $0x28] sm:$0xf] }
 0x31b   : > { %4509 = vmatprep.mubr.msk.bf16.mxu0 %vm1540_vm9, %v4179_v62  ;;  %v1359_v28 = vsel %vm5322_vm14, %v1354_v16, %v1358_v6  ;;  %v1364_v48 = vrot.slane %v1363_v20, 4  ;;  %v2337_v33 = vrot.slane %v2335_v22, 5  ;;  %v2341_v34 = vrot.slane %v2339_v23, 4  ;;  %v5383_v6 = vld [vmem:[#allocation2 + $0x2c] sm:$0x1] }
 0x31c   : > { %v2347_v31 = vrot.slane %v2345_v26, 5  ;;  %v2332_v38 = vor.u32 %v2331_v29, %v2328_v10  ;;  %v5364_v17 = vrot.slane %v2700_v21, 4  ;;  %v2703_v40 = vrot.slane %v5346_v8, 5  ;;  %v5397_v23 = vld [vmem:[%s6127_s6 + $0xc] sm:$0x3] }
 0x31d   : > { %v2798_v43 = vsel %vm1565_vm0, %v5312_v37, 0  ;;  %v1369_v41 = vsel %vm5322_vm14, %v1364_v48, %v1368_v12  ;;  %v2342_v36 = vor.u32 %v2341_v34, %v2337_v33  ;;  %v1371_v45 = vshrl.u32 %v5358_v32, 16 }
 0x31e   : > { %v1374_v46 = vshll.u32 %v5358_v32, 16  ;;  %v4105_v1 = vcombine.low %v1359_v28, %v1369_v41  ;;  %v2333_v51 = vrot.slane %v2332_v38, 4  ;;  %v1380_v52 = vshll.u32 %v5360_v0, 16  ;;  %v5404_v38 = vld [vmem:[#allocation2 + $0x2c] sm:$0x1] }
 0x31f   : > { %v1384_v53 = vshrl.u32 %v5360_v0, 16  ;;  %v2343_v56 = vrot.slane %v2342_v36, 4  ;;  %v1373_v57 = vrot.slane %v1371_v45, 4  ;;  %v1390_v58 = vshll.u32 %v5369_v44, 16  ;;  %v2286_v41 = vld [vmem:[#allocation2 + $0x30] sm:$0xf] }
 0x320   : > { %v1376_v37 = vrot.slane %v1374_v46, 5  ;;  %4438 = vmatmul.mubr.msk.bf16.vlgmr.msra.gmra.mrb[0].mxu1 %vm1540_vm9, %v4105_v1  ;;  %v2338_v42 = vsel %vm5322_vm14, %v2333_v51, %v2337_v33  ;;  %v1382_v54 = vrot.slane %v1380_v52, 5  ;;  %v2350_v47 = vshrl.u32 %v2283_v49, 16 }
 0x321   : > { %v1386_v55 = vrot.slane %v1384_v53, 4  ;;  %4454 = vmatpush3.bf16.msra.mxu1 %v1731_v9  ;;  %v2348_v61 = vsel %vm5322_vm14, %v2343_v56, %v2347_v31  ;;  %v1392_v60 = vrot.slane %v1390_v58, 5  ;;  %v2353_v4 = vshll.u32 %v2283_v49, 16  ;;  %v5412_v53 = vld [vmem:[#allocation2 + $0x34] sm:$0xf] }
 0x322   : > { %v1377_v7 = vor.u32 %v1376_v37, %v1373_v57  ;;  %v4180_v27 = vcombine.low %v2338_v42, %v2348_v61  ;;  %v2352_v62 = vrot.slane %v2350_v47, 4  ;;  %v2359_v16 = vshll.u32 %v5378_v59, 16  ;;  %v5415_v58 = vld [vmem:[#allocation2 + $0x38] sm:$0x1] }
 0x323   : > { %v1387_v12 = vor.u32 %v1386_v55, %v1382_v54  ;;  %v2355_v20 = vrot.slane %v2353_v4, 5  ;;  %v2363_v22 = vshrl.u32 %v5378_v59, 16  ;;  %v2369_v9 = vshll.u32 %v5383_v6, 16 }
 0x324   : > { %v1378_v19 = vrot.slane %v1377_v7, 4  ;;  %4510 = vmatmul.mubr.msk.bf16.vlgmr.msra.gmra.mrb[0].mxu0 %vm1540_vm9, %v4180_v27  ;;  %v2361_v28 = vrot.slane %v2359_v16, 5  ;;  %v1395_v10 = vshrl.u32 %v5387_v11, 16  ;;  %v1398_v29 = vshll.u32 %v5387_v11, 16  ;;  %v5420_v7 = vld [vmem:[#allocation2 + $0x30] sm:$0xf] }
 0x325   : > { %v1388_v26 = vrot.slane %v1387_v12, 4  ;;  %4526 = vmatpush3.bf16.msra.mxu0 %v2798_v43  ;;  %v2356_v33 = vor.u32 %v2355_v20, %v2352_v62  ;;  %v2365_v34 = vrot.slane %v2363_v22, 4  ;;  %v2371_v31 = vrot.slane %v2369_v9, 5  ;;  %v5426_v62 = vld [vmem:[%s6127_s6 + $0x4] sm:$0x3] }
 0x326   : > { %v1383_v48 = vsel %vm5322_vm14, %v1378_v19, %v1382_v54  ;;  %v1397_v45 = vrot.slane %v1395_v10, 4  ;;  %v1400_v46 = vrot.slane %v1398_v29, 5  ;;  %v1404_v49 = vshll.u32 %v5390_v18, 16  ;;  %4738 = vmatprep.subr.msk.bf16.mxu0 %vm1565_vm0, %v5397_v23  ;;  %v5431_v9 = vld [vmem:[#allocation2 + $0x34] sm:$0xf]  ;;  %4733 = vmatprep.subr.msk.bf16.mxu1 %vm1565_vm0, %v5426_v62 }
 0x327   : > { %v1393_v36 = vsel %vm5322_vm14, %v1388_v26, %v1392_v60  ;;  %v2357_v1 = vrot.slane %v2356_v33, 4  ;;  %v2366_v51 = vor.u32 %v2365_v34, %v2361_v28  ;;  %v1408_v52 = vshrl.u32 %v5390_v18, 16 }
 0x328   : > { %v4106_v43 = vcombine.low %v1383_v48, %v1393_v36  ;;  %v1401_v56 = vor.u32 %v1400_v46, %v1397_v45  ;;  %v1406_v57 = vrot.slane %v1404_v49, 5  ;;  %v1414_v37 = vshll.u32 %v5404_v38, 16  ;;  %v5440_v36 = vld [vmem:[#allocation2 + $0x38] sm:$0x1] }
 0x329   : > { %v2374_v42 = vshrl.u32 %v2286_v41, 16  ;;  %v2362_v54 = vsel %vm5322_vm14, %v2357_v1, %v2361_v28  ;;  %v2367_v55 = vrot.slane %v2366_v51, 4  ;;  %v1410_v47 = vrot.slane %v1408_v52, 4 }
 0x32a   : > { %4441 = vmatprep.mubr.msk.bf16.mxu1 %vm1540_vm9, %v4106_v43  ;;  %v2377_v61 = vshll.u32 %v2286_v41, 16  ;;  %v1402_v60 = vrot.slane %v1401_v56, 4  ;;  %v1416_v4 = vrot.slane %v1414_v37, 5  ;;  %v2383_v12 = vshll.u32 %v5412_v53, 16  ;;  %v2659_v56 = vld [vmem:[#allocation2 + $0xc] sm:$0xe] }
 0x32b   : > { %v2376_v27 = vrot.slane %v2374_v42, 4  ;;  %v2372_v16 = vsel %vm5322_vm14, %v2367_v55, %v2371_v31  ;;  %v1411_v19 = vor.u32 %v1410_v47, %v1406_v57  ;;  %v2387_v22 = vshrl.u32 %v5412_v53, 16  ;;  %v5447_v55 = vld [vmem:[#allocation2 + $0x3c] sm:$0xf] }
 0x32c   : > { %v2379_v20 = vrot.slane %v2377_v61, 5  ;;  %v4181_v26 = vcombine.low %v2362_v54, %v2372_v16  ;;  %v1407_v28 = vsel %vm5322_vm14, %v1402_v60, %v1406_v57  ;;  %v2385_v10 = vrot.slane %v2383_v12, 5  ;;  %v5453_v16 = vld [vmem:[#allocation2 + $0x40] sm:$0xf] }
 0x32d   : > { %v2393_v29 = vshll.u32 %v5415_v58, 16  ;;  %v1412_v48 = vrot.slane %v1411_v19, 4  ;;  %v2389_v34 = vrot.slane %v2387_v22, 4  ;;  %v1419_v31 = vshrl.u32 %v5420_v7, 16  ;;  %v5455_v19 = vld [vmem:[#allocation2 + $0x44] sm:$0x1] }
 0x32e   : > { %v2380_v33 = vor.u32 %v2379_v20, %v2376_v27  ;;  %4513 = vmatprep.mubr.msk.bf16.mxu0 %vm1540_vm9, %v4181_v26  ;;  %v1422_v45 = vshll.u32 %v5420_v7, 16  ;;  %v1428_v46 = vshll.u32 %v5431_v9, 16  ;;  %v1432_v49 = vshrl.u32 %v5431_v9, 16 }
 0x32f   : > { %v2395_v41 = vrot.slane %v2393_v29, 5  ;;  %v1417_v43 = vsel %vm5322_vm14, %v1412_v48, %v1416_v4  ;;  %v2390_v51 = vor.u32 %v2389_v34, %v2385_v10  ;;  %v1421_v52 = vrot.slane %v1419_v31, 4  ;;  %v2660_v29 = vld [vmem:[#allocation2 + $0x18] sm:$0xe] }
 0x330   : > { %v2381_v1 = vrot.slane %v2380_v33, 4  ;;  %v4107_v57 = vcombine.low %v1407_v28, %v1417_v43  ;;  %v1424_v37 = vrot.slane %v1422_v45, 5  ;;  %v1430_v42 = vrot.slane %v1428_v46, 5 }
 0x331   : > { %v1434_v54 = vrot.slane %v1432_v49, 4  ;;  %v2391_v61 = vrot.slane %v2390_v51, 4  ;;  %v1438_v60 = vshll.u32 %v5440_v36, 16  ;;  %vm1854_vm10 = vcmask 1042432  }
 0x332   : > { %v2386_v47 = vsel %vm5322_vm14, %v2381_v1, %v2385_v10  ;;  %4442 = vmatmul.mubr.msk.bf16.gmra.mrb[4].mxu1 %vm1540_vm9, %v4107_v57  ;;  %v1425_v4 = vor.u32 %v1424_v37, %v1421_v52  ;;  %vm1855_vm11 = vcmask 1046532   ;;  %v4195_v12 = vrot.slane %v2659_v56, 9  ;;  %v5478_v1 = vld [vmem:[#allocation2 + $0x4c] sm:$0xf]  ;;  %v5487_v37 = vld [vmem:[#allocation2 + $0x50] sm:$0x1] }
 0x333   : > { %v1435_v27 = vor.u32 %v1434_v54, %v1430_v42  ;;  %v2396_v20 = vsel %vm5322_vm14, %v2391_v61, %v2395_v41  ;;  %v1440_v22 = vrot.slane %v1438_v60, 5  ;;  %vm5459_vm12 = vmor %vm1854_vm10, %vm1855_vm11  ;;  %v2695_v28 = vrot.slane %v2693_v63, 4  ;;  %v5470_v41 = vld [vmem:[#allocation2 + $0x48] sm:$0xf] }
 0x334   : > { %v1443_v10 = vshrl.u32 %v5447_v55, 16  ;;  %v4182_v48 = vcombine.low %v2386_v47, %v2396_v20  ;;  %v1426_v33 = vrot.slane %v1425_v4, 4  ;;  %v2694_v31 = vsel %vm5459_vm12, %v4195_v12, %v2693_v63 }
 0x335   : > { %v1436_v34 = vrot.slane %v1435_v27, 4  ;;  %v2697_v45 = vsel %vm5459_vm12, %v2695_v28, %v2696_v3  ;;  %v1446_v49 = vshll.u32 %v5447_v55, 16  ;;  %v1452_v43 = vshll.u32 %v5453_v16, 16 }
 0x336   : > { %v1445_v46 = vrot.slane %v1443_v10, 4  ;;  %4514 = vmatmul.mubr.msk.bf16.gmra.mrb[4].mxu0 %vm1540_vm9, %v4182_v48  ;;  %v1431_v25 = vsel %vm5322_vm14, %v1426_v33, %v1430_v42  ;;  %v4204_v51 = vcombine.low %v2694_v31, %v2697_v45  ;;  %v1456_v30 = vshrl.u32 %v5453_v16, 16  ;;  %v5506_v48 = vld [vmem:[#allocation2 + $0x54] sm:$0xf]  ;;  %v5508_v33 = vld [vmem:[#allocation2 + $0x58] sm:$0xf] }
 0x337   : > { %v1441_v63 = vsel %vm5322_vm14, %v1436_v34, %v1440_v22  ;;  %v1448_v3 = vrot.slane %v1446_v49, 5  ;;  %v1454_v56 = vrot.slane %v1452_v43, 5  ;;  %v1462_v57 = vshll.u32 %v5455_v19, 16 }
 0x338   : > { %v4108_v52 = vcombine.low %v1431_v25, %v1441_v63  ;;  %4527 = vmatprep.mubr.msk.bf16.mxu0 %vm1540_vm9, %v4204_v51  ;;  %v1458_v54 = vrot.slane %v1456_v30, 4  ;;  %v4196_v47 = vrot.slane %v2660_v29, 9  ;;  %v2704_v42 = vsel %vm5459_vm12, %v5364_v17, %v2703_v40  ;;  %v2661_v40 = vld [vmem:[#allocation2 + $0x24] sm:$0xe]  ;;  %v5517_v25 = vld [vmem:[%s6127_s6 + $0xe] sm:$0x3] }
 0x339   : > { %v2997_v61 = vsel %vm1565_vm0, %v5397_v23, 0  ;;  %v1449_v60 = vor.u32 %v1448_v3, %v1445_v46  ;;  %v1464_v4 = vrot.slane %v1462_v57, 5  ;;  %v1467_v27 = vshrl.u32 %v5470_v41, 16  ;;  %v5523_v3 = vld [vmem:[#allocation2 + $0x5c] sm:$0x1] }
 0x33a   : > { %4445 = vmatprep.mubr.msk.bf16.mxu1 %vm1540_vm9, %v4108_v52  ;;  %v1470_v12 = vshll.u32 %v5470_v41, 16  ;;  %v1459_v20 = vor.u32 %v1458_v54, %v1454_v56  ;;  %v2701_v8 = vsel %vm5459_vm12, %v4196_v47, %v2700_v21  ;;  %v1476_v22 = vshll.u32 %v5478_v1, 16  ;;  %v2662_v47 = vld [vmem:[#allocation2 + $0x30] sm:$0xe] }
 0x33b   : > { %v1480_v17 = vshrl.u32 %v5478_v1, 16  ;;  %v1450_v23 = vrot.slane %v1449_v60, 4  ;;  %v4205_v28 = vcombine.low %v2701_v8, %v2704_v42  ;;  %v1469_v10 = vrot.slane %v1467_v27, 4 }
 0x33c   : > { %v1472_v29 = vrot.slane %v1470_v12, 5  ;;  %v1460_v34 = vrot.slane %v1459_v20, 4  ;;  %v1478_v31 = vrot.slane %v1476_v22, 5  ;;  %v1486_v5 = vshll.u32 %v5487_v37, 16  ;;  %v5530_v12 = vld [vmem:[#allocation2 + $0x40] sm:$0xf] }
 0x33d   : > { %v1482_v45 = vrot.slane %v1480_v17, 4  ;;  %v1455_v21 = vsel %vm5322_vm14, %v1450_v23, %v1454_v56  ;;  %v4197_v49 = vrot.slane %v2661_v40, 9  ;;  %v2707_v43 = vrot.slane %v5378_v59, 5 }
 0x33e   : > { %v1473_v46 = vor.u32 %v1472_v29, %v1469_v10  ;;  %v1465_v63 = vsel %vm5322_vm14, %v1460_v34, %v1464_v4  ;;  %4528 = vmatmul.mubr.msk.bf16.vlgmr.msra.gmra.mrb[0].mxu0 %vm1540_vm9, %v4205_v28  ;;  %v1488_v30 = vrot.slane %v1486_v5, 5  ;;  %v2710_v52 = vrot.slane %v5383_v6, 5  ;;  %v5543_v28 = vld [vmem:[#allocation2 + $0x44] sm:$0x1]  ;;  %v2663_v10 = vld [vmem:[#allocation2 + $0x3c] sm:$0xe] }
 0x33f   : > { %v1483_v51 = vor.u32 %v1482_v45, %v1478_v31  ;;  %v4109_v56 = vcombine.low %v1455_v21, %v1465_v63  ;;  %4544 = vmatpush3.bf16.msra.mxu0 %v2997_v61  ;;  %v2708_v59 = vsel %vm5459_vm12, %v4197_v49, %v2707_v43  ;;  %v2709_v54 = vrot.slane %v2707_v43, 4 }
 0x340   : > { %v1474_v57 = vrot.slane %v1473_v46, 4  ;;  %v1491_v60 = vshrl.u32 %v5506_v48, 16  ;;  %v1494_v4 = vshll.u32 %v5506_v48, 16  ;;  %v1500_v27 = vshll.u32 %v5508_v33, 16  ;;  %4739 = vmatprep.subr.msk.bf16.mxu0 %vm1565_vm0, %v5517_v25 }
 0x341   : > { %v1484_v42 = vrot.slane %v1483_v51, 4  ;;  %4446 = vmatmul.mubr.msk.bf16.gmra.mrb[8].mxu1 %vm1540_vm9, %v4109_v56  ;;  %v2711_v61 = vsel %vm5459_vm12, %v2709_v54, %v2710_v52  ;;  %v1504_v20 = vshrl.u32 %v5508_v33, 16  ;;  %v1510_v8 = vshll.u32 %v5523_v3, 16 }
 0x342   : > { %v1479_v6 = vsel %vm5322_vm14, %v1474_v57, %v1478_v31  ;;  %v4206_v17 = vcombine.low %v2708_v59, %v2711_v61  ;;  %v1493_v40 = vrot.slane %v1491_v60, 4  ;;  %v1496_v23 = vrot.slane %v1494_v4, 5  ;;  %v5561_v60 = vld [vmem:[#allocation2 + $0x50] sm:$0x1]  ;;  %v2664_v4 = vld [vmem:[#allocation2 + $0x48] sm:$0xe] }
 0x343   : > { %v1489_v22 = vsel %vm5322_vm14, %v1484_v42, %v1488_v30  ;;  %v1502_v34 = vrot.slane %v1500_v27, 5  ;;  %v1506_v45 = vrot.slane %v1504_v20, 4  ;;  %v1512_v31 = vrot.slane %v1510_v8, 5  ;;  %v5559_v42 = vld [vmem:[#allocation2 + $0x4c] sm:$0xf] }
 0x344   : > { %v4110_v29 = vcombine.low %v1479_v6, %v1489_v22  ;;  %4531 = vmatprep.mubr.msk.bf16.mxu0 %vm1540_vm9, %v4206_v17  ;;  %v1497_v5 = vor.u32 %v1496_v23, %v1493_v40  ;;  %v4198_v21 = vrot.slane %v2662_v47, 9  ;;  %v2714_v46 = vrot.slane %v5412_v53, 5  ;;  %v5569_v8 = vld [vmem:[#allocation2 + $0x58] sm:$0xf]  ;;  %v2665_v22 = vld [vmem:[#allocation2 + $0x54] sm:$0xe] }
 0x345   : > { %v2717_v49 = vrot.slane %v5415_v58, 5  ;;  %v1507_v43 = vor.u32 %v1506_v45, %v1502_v34  ;;  %v4199_v63 = vrot.slane %v2663_v10, 9  ;;  %v2721_v51 = vrot.slane %v5530_v12, 5  ;;  %v5571_v23 = vld [vmem:[#allocation2 + $0x5c] sm:$0x1] }
 0x346   : > { %4449 = vmatprep.mubr.msk.bf16.mxu1 %vm1540_vm9, %v4110_v29  ;;  %v2724_v30 = vrot.slane %v5543_v28, 5  ;;  %v1498_v52 = vrot.slane %v1497_v5, 4  ;;  %v2715_v56 = vsel %vm5459_vm12, %v4198_v21, %v2714_v46  ;;  %v2716_v57 = vrot.slane %v2714_v46, 4  ;;  %6148 = vst [vmem:[#allocation3_spill] sm:$0xff] %v5571_v23  ;;  %v5576_v45 = vld [vmem:[#allocation2 + $0x64] sm:$0xf] }
 0x347   : > { %v1508_v59 = vrot.slane %v1507_v43, 4  ;;  %v2722_v54 = vsel %vm5459_vm12, %v4199_v63, %v2721_v51  ;;  %v2723_v53 = vrot.slane %v2721_v51, 4  ;;  %v4120_v61 = vcombine.low %v5288_v14, %v5290_v13  ;;  %6149 = vst [vmem:[#allocation4_spill] sm:$0xff] %v5576_v45  ;;  %v5581_v5 = vld [vmem:[#allocation2 + $0x68] sm:$0x1] }
 0x348   : > { %v1503_v58 = vsel %vm5322_vm14, %v1498_v52, %v1502_v34  ;;  %v2718_v47 = vsel %vm5459_vm12, %v2716_v57, %v2717_v49  ;;  %v4200_v10 = vrot.slane %v2664_v4, 9  ;;  %v2728_v29 = vrot.slane %v5559_v42, 5  ;;  %6150 = vst [vmem:[#allocation5_spill] sm:$0xff] %v5581_v5  ;;  %v2666_v21 = vld [vmem:[#allocation2 + $0x60] sm:$0xe] }
 0x349   : > { %v1513_v27 = vsel %vm5322_vm14, %v1508_v59, %v1512_v31  ;;  %v4207_v6 = vcombine.low %v2715_v56, %v2718_v47  ;;  %v2725_v20 = vsel %vm5459_vm12, %v2723_v53, %v2724_v30  ;;  %v2731_v34 = vrot.slane %v5561_v60, 5  ;;  %v1831_v59 = vld [vmem:[#allocation2 + $0xc] sm:$0xe] }
 0x34a   : > { %v4111_v17 = vcombine.low %v1503_v58, %v1513_v27  ;;  %v4208_v40 = vcombine.low %v2722_v54, %v2725_v20  ;;  %v4201_v14 = vrot.slane %v2665_v22, 9  ;;  %v2735_v31 = vrot.slane %v5569_v8, 5  ;;  %v1832_v54 = vld [vmem:[#allocation2 + $0x18] sm:$0xe]  ;;  %v1833_v22 = vld [vmem:[#allocation2 + $0x24] sm:$0xe] }
 0x34b   : > { %4532 = vmatmul.mubr.msk.bf16.gmra.mrb[4].mxu0 %vm1540_vm9, %v4207_v6  ;;  %v2729_v46 = vsel %vm5459_vm12, %v4200_v10, %v2728_v29  ;;  %v2730_v49 = vrot.slane %v2728_v29, 4  ;;  %v2738_v43 = vrot.slane %v5571_v23, 5  ;;  %v1866_v30 = vrot.slane %v5326_v24, 5  ;;  %v1834_v29 = vld [vmem:[#allocation2 + $0x30] sm:$0xe] }
 0x34c   : > { %4450 = vmatmul.mubr.msk.bf16.gmra.mrb[12].mxu1 %vm1540_vm9, %v4111_v17  ;;  %4535 = vmatprep.mubr.msk.bf16.mxu0 %vm1540_vm9, %v4208_v40  ;;  %v2736_v63 = vsel %vm5459_vm12, %v4201_v14, %v2735_v31  ;;  %v2737_v51 = vrot.slane %v2735_v31, 4  ;;  %v4121_v52 = vcombine.low %v5318_v39, %v5326_v24  ;;  %v2742_v57 = vrot.slane %v5576_v45, 5  ;;  %v5607_v17 = vld [vmem:[%s6127_s6 + $0x6] sm:$0x3]  ;;  %v5849_v23 = vld [vmem:[#allocation2 + $0x70] sm:$0xf] }
 0x34d   : > { %4455 = vmatprep.mubr.msk.bf16.mxu1 %vm1540_vm9, %v4120_v61  ;;  %v2732_v56 = vsel %vm5459_vm12, %v2730_v49, %v2731_v34  ;;  %v4202_v47 = vrot.slane %v2666_v21, 9  ;;  %v2745_v4 = vrot.slane %v5581_v5, 5  ;;  %v1869_v27 = vrot.slane %v5328_v50, 5 }
 0x34e   : > { %v4209_v53 = vcombine.low %v2729_v46, %v2732_v56  ;;  %v2739_v58 = vsel %vm5459_vm12, %v2737_v51, %v2738_v43  ;;  %v4122_v6 = vcombine.low %v5358_v32, %v5360_v0  ;;  %v2744_v24 = vrot.slane %v2742_v57, 4 }
 0x34f   : > { %v4210_v39 = vcombine.low %v2736_v63, %v2739_v58  ;;  %v1964_v61 = vsel %vm1565_vm0, %v5426_v62, 0  ;;  %v4137_v20 = vrot.slane %v1831_v59, 9  ;;  %v1868_v40 = vrot.slane %v1866_v30, 4  ;;  %v1835_v58 = vld [vmem:[#allocation2 + $0x3c] sm:$0xe] }
 0x350   : > { %v4138_v10 = vrot.slane %v1832_v54, 9  ;;  %v2743_v50 = vsel %vm5459_vm12, %v4202_v47, %v2742_v57  ;;  %v2746_v32 = vsel %vm5459_vm12, %v2744_v24, %v2745_v4  ;;  %v1873_v14 = vrot.slane %v5360_v0, 5 }
 0x351   : > { %v5617_v62 = vsel %vm5459_vm12, %v4137_v20, %v1866_v30  ;;  %v5622_v34 = vsel %vm5459_vm12, %v1868_v40, %v1869_v27  ;;  %v1876_v31 = vrot.slane %v5369_v44, 5  ;;  %v4139_v21 = vrot.slane %v1833_v22, 9  ;;  %v4794_v40 = vld [vmem:[#allocation2 + $0x24] sm:$0xff]  }
 0x352   : > { %v4123_v46 = vcombine.low %v5387_v11, %v5390_v18  ;;  %v1880_v43 = vrot.slane %v5390_v18, 5  ;;  %v1883_v63 = vrot.slane %v5404_v38, 5  ;;  %v4211_v51 = vcombine.low %v2743_v50, %v2746_v32  ;;  %v1830_v38 = vld [vmem:[#allocation2] sm:$0xe] }
 0x353   : > { %4536 = vmatmul.mubr.msk.bf16.gmra.mrb[8].mxu0 %vm1540_vm9, %v4209_v53  ;;  %v5636_v0 = vsel %vm5459_vm12, %v4138_v10, %v1873_v14  ;;  %v1875_v44 = vrot.slane %v1873_v14, 4  ;;  %v4140_v30 = vrot.slane %v1834_v29, 9  ;;  %v1887_v57 = vrot.slane %v5431_v9, 5  ;;  %v3112_v10 = vld [vmem:[#allocation2 + $0x18] sm:$0xf] }
 0x354   : > { %4456 = vmatmul.mubr.msk.bf16.vlgmr.msra.gmra.mrb[0].mxu1 %vm1540_vm9, %v4121_v52  ;;  %4539 = vmatprep.mubr.msk.bf16.mxu0 %vm1540_vm9, %v4210_v39  ;;  %v4792_v52 = vld [vmem:[#allocation2 + $0x18] sm:$0xff]   ;;  %v5640_v11 = vsel %vm5459_vm12, %v4139_v21, %v1880_v43  ;;  %v1882_v56 = vrot.slane %v1880_v43, 4  ;;  %v1890_v59 = vrot.slane %v5440_v36, 5  ;;  %v4124_v18 = vcombine.low %v5420_v7, %v5431_v9 }
 0x355   : > { %4472 = vmatpush3.bf16.msra.mxu1 %v1964_v61  ;;  %4459 = vmatprep.mubr.msk.bf16.mxu1 %vm1540_vm9, %v4122_v6  ;;  %v1859_v54 = vrot.slane %v5290_v13, 5  ;;  %v5649_v53 = vsel %vm5459_vm12, %v1875_v44, %v1876_v31  ;;  %v5659_v36 = vsel %vm5459_vm12, %v4140_v30, %v1887_v57  ;;  %v1889_v7 = vrot.slane %v1887_v57, 4  ;;  %v5682_v14 = vld [vmem:[#allocation2 + $0x1c] sm:$0xf]  ;;  %v1836_v31 = vld [vmem:[#allocation2 + $0x48] sm:$0xe] }
 0x356   : > { %4734 = vmatprep.subr.msk.bf16.mxu1 %vm1565_vm0, %v5607_v17  ;;  %v5655_v4 = vsel %vm5459_vm12, %v1882_v56, %v1883_v63  ;;  %v4141_v27 = vrot.slane %v1835_v58, 9  ;;  %v4136_v6 = vrot.slane %v1830_v38, 9  ;;  %v1894_v24 = vrot.slane %v5453_v16, 5  ;;  %v5704_v44 = vld [vmem:[%s6127_s6 + $0x10] sm:$0x3] }
 0x357   : > { %v5668_v9 = vsel %vm5459_vm12, %v1889_v7, %v1890_v59  ;;  %v1897_v61 = vrot.slane %v5455_v19, 5  ;;  %v1862_v20 = vrot.slane %v5293_v15, 5  ;;  %v1861_v22 = vrot.slane %v1859_v54, 4  ;;  %v4796_v19 = vld [vmem:[#allocation2 + $0x30] sm:$0xff]   ;;  %v3115_v57 = vld [vmem:[#allocation2 + $0x24] sm:$0xf] }
 0x358   : > { %v5678_v50 = vsel %vm5459_vm12, %v4141_v27, %v1894_v24  ;;  %v1896_v32 = vrot.slane %v1894_v24, 4  ;;  %v4125_v29 = vcombine.low %v5447_v55, %v5453_v16  ;;  %v3379_v21 = vsel %vm1565_vm0, %v5517_v25, 0  ;;  %v5711_v59 = vld [vmem:[#allocation2 + $0x28] sm:$0xf]  ;;  %v1837_v27 = vld [vmem:[#allocation2 + $0x54] sm:$0xe] }
 0x359   : > { %v4126_v15 = vcombine.low %v5470_v41, %v5478_v1  ;;  %v1863_v55 = vsel %vm5459_vm12, %v1861_v22, %v1862_v20  ;;  %v3137_v16 = vshrl.u32 %v3112_v10, 16  ;;  %v3140_v63 = vshll.u32 %v3112_v10, 16  ;;  %v4799_v10 = vld [vmem:[#allocation2 + $0x48] sm:$0xff]  }
 0x35a   : > { %v5692_v43 = vsel %vm5459_vm12, %v1896_v32, %v1897_v61  ;;  %v3146_v41 = vshll.u32 %v5682_v14, 16  ;;  %v3150_v25 = vshrl.u32 %v5682_v14, 16  ;;  %v4142_v30 = vrot.slane %v1836_v31, 9 }
 0x35b   : > { %4540 = vmatmul.mubr.msk.bf16.gmra.mrb[12].mxu0 %vm1540_vm9, %v4211_v51  ;;  %v1904_v56 = vrot.slane %v5487_v37, 5  ;;  %v3139_v7 = vrot.slane %v3137_v16, 4  ;;  %v3118_v37 = vld [vmem:[#allocation2 + $0x30] sm:$0xf]  ;;  %v3142_v24 = vrot.slane %v3140_v63, 5  ;;  %v3161_v32 = vshrl.u32 %v3115_v57, 16 }
 0x35c   : > { %4460 = vmatmul.mubr.msk.bf16.gmra.mrb[4].mxu1 %vm1540_vm9, %v4123_v46  ;;  %4545 = vmatprep.mubr.msk.bf16.mxu0 %vm1540_vm9, %v4792_v52  ;;  %v1860_v46 = vsel %vm5459_vm12, %v4136_v6, %v1859_v54  ;;  %v1901_v52 = vrot.slane %v5478_v1, 5  ;;  %v2431_v54 = vshll.u32 %v5559_v42, 16  ;;  %v4127_v1 = vcombine.low %v5506_v48, %v5508_v33  ;;  %v4798_v6 = vld [vmem:[#allocation2 + $0x3c] sm:$0xff]   ;;  %v3124_v51 = vld [vmem:[#allocation2 + $0x48] sm:$0xf] }
 0x35d   : > { %4463 = vmatprep.mubr.msk.bf16.mxu1 %vm1540_vm9, %v4124_v18  ;;  %v4145_v58 = vcombine.low %v1860_v46, %v1863_v55  ;;  %v5722_v61 = vrot.slane %v3146_v41, 5  ;;  %v3152_v20 = vrot.slane %v3150_v25, 4  ;;  %v5730_v48 = vld [vmem:[#allocation2 + $0x20] sm:$0x1]  ;;  %v3170_v31 = vshll.u32 %v5711_v59, 16 }
 0x35e   : > { %v5715_v18 = vsel %vm5459_vm12, %v4142_v30, %v1901_v52  ;;  %v1903_v38 = vrot.slane %v1901_v52, 4  ;;  %v3188_v46 = vshll.u32 %v3118_v37, 16  ;;  %v4143_v55 = vrot.slane %v1837_v27, 9  ;;  %v5751_v27 = vld [vmem:[#allocation2 + $0x2c] sm:$0x1] }
 0x35f   : > { %v1908_v41 = vrot.slane %v5508_v33, 5  ;;  %v1911_v25 = vrot.slane %v5523_v3, 5  ;;  %v2435_v30 = vshrl.u32 %v5559_v42, 16  ;;  %v3143_v52 = vor.u32 %v3142_v24, %v3139_v7  ;;  %v4800_v42 = vld [vmem:[#allocation2 + $0x54] sm:$0xff]  }
 0x360   : > { %v5726_v22 = vsel %vm5459_vm12, %v1903_v38, %v1904_v56  ;;  %v3153_v56 = vor.u32 %v3152_v20, %v5722_v61  ;;  %v3163_v38 = vrot.slane %v3161_v32, 4  ;;  %v5753_v7 = vrot.slane %v3170_v31, 5  ;;  %v5757_v32 = vld [vmem:[#allocation2 + $0x38] sm:$0x1] }
 0x361   : > { %v5748_v33 = vsel %vm5459_vm12, %v4143_v55, %v1908_v41  ;;  %v1910_v3 = vrot.slane %v1908_v41, 4  ;;  %v3190_v20 = vrot.slane %v3188_v46, 5 }
 0x362   : > { %v3154_v46 = vrot.slane %v3153_v56, 4 }
 0x363   : > { %4546 = vmatmul.mubr.msk.bf16.vlgmr.msra.gmra.mrb[0].mxu0 %vm1540_vm9, %v4794_v40  ;;  %v5728_v40 = vld [vmem:[#allocation2 + $0x34] sm:$0xf]  ;;  %v5763_v41 = vsel %vm5459_vm12, %v1910_v3, %v1911_v25  ;;  %v5776_v3 = vld [vmem:[#allocation2 + $0x4c] sm:$0xf] }
 0x364   : > { %4464 = vmatmul.mubr.msk.bf16.gmra.mrb[8].mxu1 %vm1540_vm9, %v4125_v29  ;;  %4562 = vmatpush3.bf16.msra.mxu0 %v3379_v21  ;;  %v3164_v29 = vshll.u32 %v3115_v57, 16  ;;  %v3194_v16 = vshll.u32 %v5728_v40, 16  ;;  %v3198_v63 = vshrl.u32 %v5728_v40, 16  ;;  %v3156_v57 = vshll.u32 %v5730_v48, 16 }
 0x365   : > { %4467 = vmatprep.mubr.msk.bf16.mxu1 %vm1540_vm9, %v4126_v15  ;;  %4549 = vmatprep.mubr.msk.bf16.mxu0 %vm1540_vm9, %v4796_v19  ;;  %v3174_v15 = vshrl.u32 %v5711_v59, 16  ;;  %v3185_v19 = vshrl.u32 %v3118_v37, 16  ;;  %v3144_v21 = vrot.slane %v3143_v52, 4  ;;  %v3204_v52 = vshll.u32 %v5757_v32, 16 }
 0x366   : > { %4740 = vmatprep.subr.msk.bf16.mxu0 %vm1565_vm0, %v5704_v44  ;;  %v3166_v37 = vrot.slane %v3164_v29, 5  ;;  %v5759_v29 = vrot.slane %v3194_v16, 5  ;;  %v3200_v55 = vrot.slane %v3198_v63, 4  ;;  %v3158_v16 = vrot.slane %v3156_v57, 5 }
 0x367   : > { %v3187_v24 = vrot.slane %v3185_v19, 4  ;;  %v5769_v19 = vld [vmem:[#allocation2 + $0x40] sm:$0xf]  ;;  %v3180_v63 = vshll.u32 %v5751_v27, 16  ;;  %v3233_v57 = vshrl.u32 %v3124_v51, 16 }
 0x368   : > { %v3167_v39 = vor.u32 %v3166_v37, %v3163_v38  ;;  %v3201_v31 = vor.u32 %v3200_v55, %v5759_v29  ;;  %v3218_v49 = vshll.u32 %v5769_v19, 16  ;;  %v3222_v56 = vshrl.u32 %v5769_v19, 16 }
 0x369   : > { %v3236_v38 = vshll.u32 %v3124_v51, 16  ;;  %v6151_v37 = vcombine.low %v5617_v62, %v5622_v34  ;;  %v6152_v51 = vcombine.low %v5636_v0, %v5649_v53  ;;  %v4802_v62 = vld [vmem:[#allocation2 + $0x6c] sm:$0xff]   ;;  %v5806_v0 = vld [vmem:[#allocation2 + $0x44] sm:$0x1] }
 0x36a   : > { %v3168_v34 = vrot.slane %v3167_v39, 4  ;;  %v3224_v53 = vrot.slane %v3222_v56, 4  ;;  %v3235_v39 = vrot.slane %v3233_v57, 4  ;;  %v3130_v57 = vld [vmem:[#allocation2 + $0x60] sm:$0xf] }
 0x36b   : > { %4550 = vmatmul.mubr.msk.bf16.gmra.mrb[4].mxu0 %vm1540_vm9, %v4798_v6  ;;  %v3176_v6 = vrot.slane %v3174_v15, 4  ;;  %v3121_v15 = vld [vmem:[#allocation2 + $0x3c] sm:$0xf] }
 0x36c   : > { %4468 = vmatmul.mubr.msk.bf16.gmra.mrb[12].mxu1 %vm1540_vm9, %v4127_v1  ;;  %4553 = vmatprep.mubr.msk.bf16.mxu0 %vm1540_vm9, %v4799_v10  ;;  %v5755_v1 = vrot.slane %v2431_v54, 5  ;;  %v4801_v10 = vld [vmem:[#allocation2 + $0x60] sm:$0xff]   ;;  %v2162_v54 = vsel %vm1565_vm0, %v5607_v17, 0  ;;  %v3209_v13 = vshrl.u32 %v3121_v15, 16  ;;  %v3212_v47 = vshll.u32 %v3121_v15, 16 }
 0x36d   : > { %4473 = vmatprep.mubr.msk.bf16.mxu1 %vm1540_vm9, %v4145_v58  ;;  %v5765_v58 = vrot.slane %v2435_v30, 4  ;;  %v3177_v25 = vor.u32 %v3176_v6, %v5753_v7  ;;  %v3191_v30 = vor.u32 %v3190_v20, %v3187_v24  ;;  %v3149_v17 = vsel %vm5322_vm14, %v3144_v21, %v5722_v61  ;;  %v3127_v61 = vld [vmem:[#allocation2 + $0x54] sm:$0xf] }
 0x36e   : > { %v3159_v6 = vsel %vm5322_vm14, %v3154_v46, %v3158_v16  ;;  %v3182_v24 = vrot.slane %v3180_v63, 5  ;;  %v3246_v20 = vshrl.u32 %v5776_v3, 16  ;;  %v3202_v15 = vrot.slane %v3201_v31, 4  ;;  %v4811_v63 = vld [vmem:[%s6127_s6 + $0x8] sm:$0x3] }
 0x36f   : > { %v3178_v21 = vrot.slane %v3177_v25, 4  ;;  %v3192_v55 = vrot.slane %v3191_v30, 4  ;;  %v3214_v46 = vrot.slane %v3212_v47, 5  ;;  %v5798_v16 = vrot.slane %v3218_v49, 5  ;;  %v5808_v31 = vld [vmem:[#allocation2 + $0x50] sm:$0x1] }
 0x370   : > { %v3238_v25 = vrot.slane %v3236_v38, 5  ;;  %v3257_v30 = vshrl.u32 %v3127_v61, 16  ;;  %v3248_v49 = vrot.slane %v3246_v20, 4  ;;  %v5825_v20 = vld [vmem:[#allocation2 + $0x64] sm:$0xf] }
 0x373   : > { %4554 = vmatmul.mubr.msk.bf16.gmra.mrb[8].mxu0 %vm1540_vm9, %v4800_v42  ;;  %v3242_v42 = vshll.u32 %v5776_v3, 16 }
 0x374   : > { %4474 = vmatmul.mubr.msk.bf16.vlgmr.msra.gmra.mrb[0].mxu1 %vm1540_vm9, %v6151_v37  ;;  %4557 = vmatprep.mubr.msk.bf16.mxu0 %vm1540_vm9, %v4801_v10  ;;  %v3206_v10 = vrot.slane %v3204_v52, 5  ;;  %v3211_v37 = vrot.slane %v3209_v13, 4  ;;  %v4238_v52 = vcombine.low %v3149_v17, %v3159_v6  ;;  %v3260_v13 = vshll.u32 %v3127_v61, 16 }
 0x375   : > { %4490 = vmatpush3.bf16.msra.mxu1 %v2162_v54  ;;  %4477 = vmatprep.mubr.msk.bf16.mxu1 %vm1540_vm9, %v6152_v51  ;;  %v5804_v54 = vld [vmem:[#allocation2 + $0x58] sm:$0xf]  ;;  %v5810_v47 = vrot.slane %v3242_v42, 5  ;;  %v3173_v51 = vsel %vm5322_vm14, %v3168_v34, %v5753_v7  ;;  %v3197_v17 = vsel %vm5322_vm14, %v3192_v55, %v5759_v29  ;;  %v3228_v42 = vshll.u32 %v5806_v0, 16 }
 0x376   : > { %4736 = vmatprep.subr.msk.bf16.mxu1 %vm1565_vm0, %v4811_v63  ;;  %v3183_v63 = vsel %vm5322_vm14, %v3178_v21, %v3182_v24  ;;  %v3266_v5 = vshll.u32 %v5804_v54, 16  ;;  %v3270_v56 = vshrl.u32 %v5804_v54, 16  ;;  %v3207_v38 = vsel %vm5322_vm14, %v3202_v15, %v3206_v10 }
 0x377   : > { %v3215_v6 = vor.u32 %v3214_v46, %v3211_v37  ;;  %v3225_v7 = vor.u32 %v3224_v53, %v5798_v16  ;;  %v3239_v24 = vor.u32 %v3238_v25, %v3235_v39  ;;  %v3252_v61 = vshll.u32 %v5808_v31, 16  ;;  %v5840_v37 = vld [vmem:[#allocation2 + $0x5c] sm:$0x1] }
 0x378   : > { %v3259_v34 = vrot.slane %v3257_v30, 4  ;;  %v6153_v21 = vcombine.low %v5640_v11, %v5655_v4  ;;  %v3249_v29 = vor.u32 %v3248_v49, %v5810_v47  ;;  %v3262_v55 = vrot.slane %v3260_v13, 5 }
 0x379   : > { %v3281_v10 = vshrl.u32 %v3130_v57, 16  ;;  %v3284_v15 = vshll.u32 %v3130_v57, 16  ;;  %v5842_v46 = vrot.slane %v3266_v5, 5  ;;  %v3272_v53 = vrot.slane %v3270_v56, 4  ;;  %v3133_v57 = vld [vmem:[#allocation2 + $0x6c] sm:$0xf] }
 0x37a   : > { %v3290_v11 = vshll.u32 %v5825_v20, 16  ;;  %v3294_v4 = vshrl.u32 %v5825_v20, 16  ;;  %v4239_v39 = vcombine.low %v3173_v51, %v3183_v63  ;;  %v3633_v25 = vsel %vm1565_vm0, %v5704_v44, 0 }
 0x37b   : > { %4558 = vmatmul.mubr.msk.bf16.gmra.mrb[12].mxu0 %vm1540_vm9, %v4802_v62  ;;  %v6154_v62 = vcombine.low %v5659_v36, %v5668_v9  ;;  %v4240_v30 = vcombine.low %v3197_v17, %v3207_v38  ;;  %v3216_v49 = vrot.slane %v3215_v6, 4  ;;  %v3226_v13 = vrot.slane %v3225_v7, 4  ;;  %v5857_v6 = vld [vmem:[#allocation2 + $0x68] sm:$0x1] }
 0x37c   : > { %4478 = vmatmul.mubr.msk.bf16.gmra.mrb[4].mxu1 %vm1540_vm9, %v6153_v21  ;;  %4563 = vmatprep.mubr.msk.bf16.mxu0 %vm1540_vm9, %v4238_v52  ;;  %v3230_v52 = vrot.slane %v3228_v42, 5  ;;  %v3240_v36 = vrot.slane %v3239_v24, 4  ;;  %v3254_v9 = vrot.slane %v3252_v61, 5  ;;  %v3250_v21 = vrot.slane %v3249_v29, 4 }
 0x37d   : > { %4481 = vmatprep.mubr.msk.bf16.mxu1 %vm1540_vm9, %v6154_v62  ;;  %v3276_v5 = vshll.u32 %v5840_v37, 16  ;;  %v3283_v62 = vrot.slane %v3281_v10, 4  ;;  %v3286_v56 = vrot.slane %v3284_v15, 5  ;;  %v3263_v45 = vor.u32 %v3262_v55, %v3259_v34 }
 0x37e   : > { %v3273_v51 = vor.u32 %v3272_v53, %v5842_v46  ;;  %v5852_v63 = vrot.slane %v3290_v11, 5  ;;  %v3296_v44 = vrot.slane %v3294_v4, 4  ;;  %v2438_v17 = vor.u32 %v5765_v58, %v5755_v1 }
 0x37f   : > { %v2441_v38 = vshll.u32 %v5561_v60, 16  ;;  %v3305_v42 = vshrl.u32 %v3133_v57, 16  ;;  %v3308_v7 = vshll.u32 %v3133_v57, 16  ;;  %v3221_v24 = vsel %vm5322_vm14, %v3216_v49, %v5798_v16 }
 0x380   : > { %v3231_v61 = vsel %vm5322_vm14, %v3226_v13, %v3230_v52  ;;  %v3314_v34 = vshll.u32 %v5849_v23, 16  ;;  %v3318_v29 = vshrl.u32 %v5849_v23, 16  ;;  %v6155_v60 = vcombine.low %v5678_v50, %v5692_v43 }
 0x381   : > { %v3245_v58 = vsel %vm5322_vm14, %v3240_v36, %v5810_v47  ;;  %v3255_v16 = vsel %vm5322_vm14, %v3250_v21, %v3254_v9  ;;  %v3278_v55 = vrot.slane %v3276_v5, 5  ;;  %v3287_v10 = vor.u32 %v3286_v56, %v3283_v62  ;;  %v4803_v9 = vld [vmem:[#allocation2 + $0xc] sm:$0xff]   ;;  %v2292_v56 = vld [vmem:[#allocation2 + $0x48] sm:$0xf] }
 0x382   : > { %v6156_v15 = vcombine.low %v5715_v18, %v5726_v22  ;;  %v3264_v50 = vrot.slane %v3263_v45, 4  ;;  %v3274_v43 = vrot.slane %v3273_v51, 4  ;;  %v3297_v53 = vor.u32 %v3296_v44, %v5852_v63  ;;  %v3494_v44 = vld [vmem:[#allocation2 + $0x18] sm:$0xe] }
 0x383   : > { %4564 = vmatmul.mubr.msk.bf16.vlgmr.msra.gmra.mrb[0].mxu0 %vm1540_vm9, %v4239_v39  ;;  %v3300_v11 = vshll.u32 %v5857_v6, 16  ;;  %v3307_v4 = vrot.slane %v3305_v42, 4  ;;  %v3310_v47 = vrot.slane %v3308_v7, 5  ;;  %v4241_v39 = vcombine.low %v3221_v24, %v3231_v61 }
 0x384   : > { %4482 = vmatmul.mubr.msk.bf16.gmra.mrb[8].mxu1 %vm1540_vm9, %v6155_v60  ;;  %4580 = vmatpush3.bf16.msra.mxu0 %v3633_v25  ;;  %v5883_v25 = vld [vmem:[#allocation2 + $0x74] sm:$0x1]  ;;  %v5885_v52 = vrot.slane %v3314_v34, 5  ;;  %v3320_v49 = vrot.slane %v3318_v29, 4  ;;  %v2439_v13 = vrot.slane %v2438_v17, 4  ;;  %v2443_v18 = vrot.slane %v2441_v38, 5 }
 0x385   : > { %4485 = vmatprep.mubr.msk.bf16.mxu1 %vm1540_vm9, %v6156_v15  ;;  %4567 = vmatprep.mubr.msk.bf16.mxu0 %vm1540_vm9, %v4240_v30  ;;  %v4242_v22 = vcombine.low %v3245_v58, %v3255_v16  ;;  %v3288_v36 = vrot.slane %v3287_v10, 4  ;;  %v3269_v45 = vsel %vm5322_vm14, %v3264_v50, %v5842_v46  ;;  %v3279_v30 = vsel %vm5322_vm14, %v3274_v43, %v3278_v55  ;;  %v4805_v15 = vld [vmem:[#allocation2 + $0x24] sm:$0xff]   ;;  %v2289_v50 = vld [vmem:[#allocation2 + $0x3c] sm:$0xf] }
 0x386   : > { %v3298_v57 = vrot.slane %v3297_v53, 4  ;;  %v3302_v21 = vrot.slane %v3300_v11, 5  ;;  %v3311_v5 = vor.u32 %v3310_v47, %v3307_v4  ;;  %v3324_v62 = vshll.u32 %v5883_v25, 16  ;;  %v3495_v4 = vld [vmem:[#allocation2 + $0x24] sm:$0xe] }
 0x387   : > { %v3321_v51 = vor.u32 %v3320_v49, %v5885_v52  ;;  %v3528_v17 = vrot.slane %v5682_v14, 5  ;;  %v6157_v38 = vcombine.low %v5748_v33, %v5763_v41  ;;  %v4243_v46 = vcombine.low %v3269_v45, %v3279_v30  ;;  %v3496_v49 = vld [vmem:[#allocation2 + $0x30] sm:$0xe] }
 0x388   : > { %v3293_v42 = vsel %vm5322_vm14, %v3288_v36, %v5852_v63  ;;  %v3303_v7 = vsel %vm5322_vm14, %v3298_v57, %v3302_v21  ;;  %v2422_v24 = vshrl.u32 %v2292_v56, 16  ;;  %v2425_v61 = vshll.u32 %v2292_v56, 16  ;;  %v4804_v63 = vld [vmem:[#allocation2 + $0x18] sm:$0xff]  }
 0x389   : > { %v2444_v14 = vsel %vm5322_vm14, %v2439_v13, %v2443_v18  ;;  %v3312_v33 = vrot.slane %v3311_v5, 4  ;;  %v3326_v41 = vrot.slane %v3324_v62, 5  ;;  %v4254_v34 = vrot.slane %v3494_v44, 9 }
 0x38a   : > { %v3531_v29 = vrot.slane %v5730_v48, 5  ;;  %v3322_v60 = vrot.slane %v3321_v51, 4  ;;  %v3530_v58 = vrot.slane %v3528_v17, 4  ;;  %v2424_v16 = vrot.slane %v2422_v24, 4  ;;  %v4806_v51 = vld [vmem:[#allocation2 + $0x30] sm:$0xff]  }
 0x38b   : > { %4568 = vmatmul.mubr.msk.bf16.gmra.mrb[4].mxu0 %vm1540_vm9, %v4241_v39  ;;  %v2427_v55 = vrot.slane %v2425_v61, 5  ;;  %v4244_v10 = vcombine.low %v3293_v42, %v3303_v7  ;;  %v3317_v53 = vsel %vm5322_vm14, %v3312_v33, %v5885_v52  ;;  %v3529_v11 = vsel %vm5459_vm12, %v4254_v34, %v3528_v17  ;;  %v3497_v42 = vld [vmem:[#allocation2 + $0x3c] sm:$0xe]  ;;  %v2295_v61 = vld [vmem:[#allocation2 + $0x54] sm:$0xf] }
 0x38c   : > { %4486 = vmatmul.mubr.msk.bf16.gmra.mrb[12].mxu1 %vm1540_vm9, %v6157_v38  ;;  %4571 = vmatprep.mubr.msk.bf16.mxu0 %vm1540_vm9, %v4242_v22  ;;  %v3535_v47 = vrot.slane %v5711_v59, 5  ;;  %v3327_v48 = vsel %vm5322_vm14, %v3322_v60, %v3326_v41  ;;  %v3532_v39 = vsel %vm5459_vm12, %v3530_v58, %v3531_v29  ;;  %v3542_v13 = vrot.slane %v5728_v40, 5  ;;  %v3498_v34 = vld [vmem:[#allocation2 + $0x48] sm:$0xe] }
 0x38d   : > { %4491 = vmatprep.mubr.msk.bf16.mxu1 %vm1540_vm9, %v4803_v9  ;;  %v2428_v43 = vor.u32 %v2427_v55, %v2424_v16  ;;  %v2398_v52 = vshrl.u32 %v2289_v50, 16  ;;  %v2401_v22 = vshll.u32 %v2289_v50, 16  ;;  %v2407_v59 = vshll.u32 %v5530_v12, 16 }
 0x38e   : > { %v2411_v36 = vshrl.u32 %v5530_v12, 16  ;;  %v4255_v9 = vrot.slane %v3495_v4, 9  ;;  %v3537_v45 = vrot.slane %v3535_v47, 4  ;;  %v3538_v30 = vrot.slane %v5751_v27, 5 }
 0x38f   : > { %v2429_v18 = vrot.slane %v2428_v43, 4  ;;  %v4256_v57 = vrot.slane %v3496_v49, 9  ;;  %v4245_v5 = vcombine.low %v3317_v53, %v3327_v48  ;;  %v4263_v62 = vcombine.low %v3529_v11, %v3532_v39  ;;  %v4808_v53 = vld [vmem:[#allocation2 + $0x48] sm:$0xff]   ;;  %v4809_v48 = vld [vmem:[#allocation2 + $0x54] sm:$0xff]  }
 0x390   : > { %v3544_v56 = vrot.slane %v3542_v13, 4  ;;  %v3545_v12 = vrot.slane %v5757_v32, 5  ;;  %v2403_v44 = vrot.slane %v2401_v22, 5  ;;  %v5935_v17 = vrot.slane %v2407_v59, 5 }
 0x391   : > { %v2434_v40 = vsel %vm5322_vm14, %v2429_v18, %v5755_v1  ;;  %v2413_v38 = vrot.slane %v2411_v36, 4  ;;  %v3536_v1 = vsel %vm5459_vm12, %v4255_v9, %v3535_v47  ;;  %v3539_v27 = vsel %vm5459_vm12, %v3537_v45, %v3538_v30  ;;  %v2298_v18 = vld [vmem:[#allocation2 + $0x60] sm:$0xf] }
 0x392   : > { %v5932_v21 = vcombine.low %v2434_v40, %v2444_v14  ;;  %v3543_v7 = vsel %vm5459_vm12, %v4256_v57, %v3542_v13  ;;  %v3549_v32 = vrot.slane %v5769_v19, 5  ;;  %v2417_v24 = vshll.u32 %v5543_v28, 16  ;;  %v3499_v40 = vld [vmem:[#allocation2 + $0x54] sm:$0xe] }
 0x393   : > { %4572 = vmatmul.mubr.msk.bf16.gmra.mrb[8].mxu0 %vm1540_vm9, %v4243_v46  ;;  %v4807_v46 = vld [vmem:[#allocation2 + $0x3c] sm:$0xff]   ;;  %v3546_v14 = vsel %vm5459_vm12, %v3544_v56, %v3545_v12  ;;  %v2414_v41 = vor.u32 %v2413_v38, %v5935_v17  ;;  %v3556_v29 = vrot.slane %v5776_v3, 5  ;;  %v4264_v60 = vcombine.low %v3536_v1, %v3539_v27 }
 0x394   : > { %4492 = vmatmul.mubr.msk.bf16.vlgmr.msra.gmra.mrb[0].mxu1 %vm1540_vm9, %v4804_v63  ;;  %4575 = vmatprep.mubr.msk.bf16.mxu0 %vm1540_vm9, %v4244_v10  ;;  %v4257_v19 = vrot.slane %v3497_v42, 9  ;;  %v3552_v28 = vrot.slane %v5806_v0, 5  ;;  %v2446_v58 = vshrl.u32 %v2295_v61, 16  ;;  %v2449_v16 = vshll.u32 %v2295_v61, 16 }
 0x395   : > { %4600 = vmatpush3.bf16.msra.mxu1 %v5286_v2  ;;  %4495 = vmatprep.mubr.msk.bf16.mxu1 %vm1540_vm9, %v4805_v15  ;;  %v2400_v2 = vrot.slane %v2398_v52, 4  ;;  %v2455_v55 = vshll.u32 %v5569_v8, 16  ;;  %v2459_v63 = vshrl.u32 %v5569_v8, 16  ;;  %v4265_v10 = vcombine.low %v3543_v7, %v3546_v14 }
 0x396   : > { %v3551_v15 = vrot.slane %v3549_v32, 4  ;;  %v2419_v50 = vrot.slane %v2417_v24, 5  ;;  %v4258_v43 = vrot.slane %v3498_v34, 9  ;;  %v2415_v4 = vrot.slane %v2414_v41, 4 }
 0x397   : > { %v2404_v33 = vor.u32 %v2403_v44, %v2400_v2  ;;  %v3558_v3 = vrot.slane %v3556_v29, 4  ;;  %v3559_v47 = vrot.slane %v5808_v31, 5  ;;  %v2448_v39 = vrot.slane %v2446_v58, 4  ;;  %v6159_v44 = vld [vmem:[#allocation3_spill] sm:$0xff] }
 0x398   : > { %v2451_v49 = vrot.slane %v2449_v16, 5  ;;  %v2457_v0 = vrot.slane %v2455_v55, 5  ;;  %v2461_v13 = vrot.slane %v2459_v63, 4  ;;  %v3550_v8 = vsel %vm5459_vm12, %v4257_v19, %v3549_v32  ;;  %v6160_v63 = vld [vmem:[#allocation5_spill] sm:$0xff] }
 0x399   : > { %v2405_v11 = vrot.slane %v2404_v33, 4  ;;  %v3553_v52 = vsel %vm5459_vm12, %v3551_v15, %v3552_v28  ;;  %v3557_v22 = vsel %vm5459_vm12, %v4258_v43, %v3556_v29  ;;  %v3563_v59 = vrot.slane %v5804_v54, 5  ;;  %v3500_v54 = vld [vmem:[#allocation2 + $0x60] sm:$0xe]  ;;  %v3501_v15 = vld [vmem:[#allocation2 + $0x6c] sm:$0xe] }
 0x39a   : > { %v2420_v36 = vsel %vm5322_vm14, %v2415_v4, %v2419_v50  ;;  %v3560_v9 = vsel %vm5459_vm12, %v3558_v3, %v3559_v47  ;;  %v3570_v45 = vrot.slane %v5825_v20, 5  ;;  %v2470_v30 = vshrl.u32 %v2298_v18, 16  ;;  %v4810_v20 = vld [vmem:[#allocation2 + $0x60] sm:$0xff]  }
 0x39b   : > { %4576 = vmatmul.mubr.msk.bf16.gmra.mrb[12].mxu0 %vm1540_vm9, %v4245_v5  ;;  %v2410_v31 = vsel %vm5322_vm14, %v2405_v11, %v5935_v17  ;;  %v2473_v57 = vshll.u32 %v2298_v18, 16  ;;  %v6158_v5 = vld [vmem:[#allocation4_spill] sm:$0xff]  ;;  %v4266_v12 = vcombine.low %v3550_v8, %v3553_v52  ;;  %v2462_v2 = vor.u32 %v2461_v13, %v2457_v0 }
 0x39c   : > { %4496 = vmatmul.mubr.msk.bf16.gmra.mrb[4].mxu1 %vm1540_vm9, %v4806_v51  ;;  %4581 = vmatprep.mubr.msk.bf16.mxu0 %vm1540_vm9, %v4263_v62  ;;  %v2479_v62 = vshll.u32 %v6158_v5, 16  ;;  %v2483_v56 = vshrl.u32 %v6158_v5, 16  ;;  %v2452_v51 = vor.u32 %v2451_v49, %v2448_v39  ;;  %v2465_v17 = vshll.u32 %v6159_v44, 16 }
 0x39d   : > { %4499 = vmatprep.mubr.msk.bf16.mxu1 %vm1540_vm9, %v4807_v46  ;;  %v4183_v38 = vcombine.low %v2410_v31, %v2420_v36  ;;  %v4267_v46 = vcombine.low %v3557_v22, %v3560_v9  ;;  %v4259_v1 = vrot.slane %v3499_v40, 9  ;;  %v3566_v27 = vrot.slane %v5840_v37, 5 }
 0x39e   : > { %v3565_v42 = vrot.slane %v3563_v59, 4  ;;  %v4260_v7 = vrot.slane %v3500_v54, 9  ;;  %v3572_v32 = vrot.slane %v3570_v45, 4  ;;  %v3573_v24 = vrot.slane %v5857_v6, 5 }
 0x39f   : > { %v2472_v61 = vrot.slane %v2470_v30, 4  ;;  %v2475_v14 = vrot.slane %v2473_v57, 5  ;;  %v2481_v33 = vrot.slane %v2479_v62, 5  ;;  %v2485_v41 = vrot.slane %v2483_v56, 4  ;;  %v6023_v57 = vld [vmem:[%s6129_s8] ss:$0 sm:$0xff] }
 0x3a0   : > { %v2453_v34 = vrot.slane %v2452_v51, 4  ;;  %v2463_v29 = vrot.slane %v2462_v2, 4  ;;  %v3564_v37 = vsel %vm5459_vm12, %v4259_v1, %v3563_v59  ;;  %v3567_v19 = vsel %vm5459_vm12, %v3565_v42, %v3566_v27 }
 0x3a1   : > { %v3571_v6 = vsel %vm5459_vm12, %v4260_v7, %v3570_v45  ;;  %v3577_v28 = vrot.slane %v5849_v23, 5  ;;  %v3574_v58 = vsel %vm5459_vm12, %v3572_v32, %v3573_v24  ;;  %v2476_v16 = vor.u32 %v2475_v14, %v2472_v61  ;;  %v3842_v32 = vld [vmem:[%s4990_s29] sm:$0xff] }
 0x3a2   : > { %v2486_v55 = vor.u32 %v2485_v41, %v2481_v33  ;;  %v2458_v50 = vsel %vm5322_vm14, %v2453_v34, %v2457_v0  ;;  %v4269_v11 = vcombine.low %v3571_v6, %v3574_v58  ;;  %v4261_v4 = vrot.slane %v3501_v15, 9  ;;  %v3845_v41 = vld [vmem:[%s4990_s29 + $0x18] sm:$0xff]  ;;  %v3843_v6 = vld [vmem:[%s4990_s29 + $0x8] sm:$0xff] }
 0x3a3   : > { %4582 = vmatmul.mubr.msk.bf16.vlgmr.msra.gmra.mrb[0].mxu0 %vm1540_vm9, %v4264_v60  ;;  %v2467_v60 = vrot.slane %v2465_v17, 5  ;;  %v3579_v23 = vrot.slane %v3577_v28, 4  ;;  %v3580_v3 = vrot.slane %v5883_v25, 5 }
 0x3a4   : > { %4500 = vmatmul.mubr.msk.bf16.gmra.mrb[8].mxu1 %vm1540_vm9, %v4808_v53  ;;  %4585 = vmatprep.mubr.msk.bf16.mxu0 %vm1540_vm9, %v4265_v10  ;;  %v2489_v10 = vshll.u32 %v6160_v63, 16  ;;  %v4268_v53 = vcombine.low %v3564_v37, %v3567_v19  ;;  %v2487_v39 = vrot.slane %v2486_v55, 4  ;;  %v3578_v0 = vsel %vm5459_vm12, %v4261_v4, %v3577_v28 }
 0x3a5   : > { %4503 = vmatprep.mubr.msk.bf16.mxu1 %vm1540_vm9, %v4809_v48  ;;  %v2468_v43 = vsel %vm5322_vm14, %v2463_v29, %v2467_v60  ;;  %v2477_v48 = vrot.slane %v2476_v16, 4  ;;  %v3581_v13 = vsel %vm5459_vm12, %v3579_v23, %v3580_v3 }
 0x3a6   : > { %v4185_v47 = vcombine.low %v2458_v50, %v2468_v43  ;;  %v2491_v49 = vrot.slane %v2489_v10, 5  ;;  %v4270_v8 = vcombine.low %v3578_v0, %v3581_v13  ;;  %v3846_v0 = vld [vmem:[%s4990_s29 + $0x20] sm:$0xff] }
 0x3a7   : > { %v2482_v25 = vsel %vm5322_vm14, %v2477_v48, %v2481_v33 }
 0x3a8   : > { %v2492_v18 = vsel %vm5322_vm14, %v2487_v39, %v2491_v49  ;;  %v3848_v39 = vld [vmem:[%s4990_s29 + $0x30] sm:$0xff] }
 0x3a9   : > { %v4186_v52 = vcombine.low %v2482_v25, %v2492_v18 }
 0x3ab   : > { %4586 = vmatmul.mubr.msk.bf16.gmra.mrb[4].mxu0 %vm1540_vm9, %v4266_v12 }
 0x3ac   : > { %4504 = vmatmul.mubr.msk.bf16.gmra.mrb[12].mxu1 %vm1540_vm9, %v4810_v20  ;;  %4589 = vmatprep.mubr.msk.bf16.mxu0 %vm1540_vm9, %v4267_v46  ;;  %v3844_v20 = vld [vmem:[%s4990_s29 + $0x10] sm:$0xff] }
 0x3ad   : > { %4517 = vmatprep.mubr.msk.bf16.mxu1 %vm1540_vm9, %v4183_v38 }
 0x3b3   : > { %4590 = vmatmul.mubr.msk.bf16.gmra.mrb[8].mxu0 %vm1540_vm9, %v4268_v53 }
 0x3b4   : > { %4518 = vmatmul.mubr.msk.bf16.vlgmr.msra.gmra.mrb[8].mxu1 %vm1540_vm9, %v5932_v21  ;;  %4593 = vmatprep.mubr.msk.bf16.mxu0 %vm1540_vm9, %v4269_v11 }
 0x3b5   : > { %4521 = vmatprep.mubr.msk.bf16.mxu1 %vm1540_vm9, %v4185_v47 }
 0x3bb   : > { %4594 = vmatmul.mubr.msk.bf16.gmra.mrb[12].mxu0 %vm1540_vm9, %v4270_v8 }
 0x3bc   : > { %4522 = vmatmul.mubr.msk.bf16.gmra.mrb[12].mxu1 %vm1540_vm9, %v4186_v52 }
 0x467   : > { %v4493_v21 = vpop.f32.mrb[0].mxu1 }
 0x468   : > { %v2198_v22 = vpop.f32.mrb[1].mxu1 }
 0x469   : > { %v4494_v59 = vpop.f32.mrb[2].mxu1 }
 0x46a   : > { %v2201_v31 = vpop.f32.mrb[3].mxu1 }
 0x46f   : > { %v4497_v26 = vpop.f32.mrb[4].mxu1 }
 0x470   : > { %v2214_v36 = vpop.f32.mrb[5].mxu1 }
 0x471   : > { %v4498_v9 = vpop.f32.mrb[6].mxu1 }
 0x472   : > { %v2217_v40 = vpop.f32.mrb[7].mxu1 }
 0x476   : > { %v4583_v45 = vpop.f32.mrb[0].mxu0 }
 0x477   : > { %v4601_v54 = vadd.f32 %v4583_v45, %v4493_v21  ;;  %v3669_v30 = vpop.f32.mrb[1].mxu0  ;;  %v3849_v21 = vld [vmem:[%s4990_s29 + $0x38] sm:$0xff] }
 0x478   : > { %v4602_v5 = vadd.f32 %v3669_v30, %v2198_v22  ;;  %v4584_v62 = vpop.f32.mrb[2].mxu0 }
 0x479   : > { %v3757_v56 = vmul.f32 %v4601_v54, %v6018_v35  ;;  %v4603_v12 = vadd.f32 %v4584_v62, %v4494_v59  ;;  %v3672_v51 = vpop.f32.mrb[3].mxu0  ;;  %v3847_v54 = vld [vmem:[%s4990_s29 + $0x28] sm:$0xff] }
 0x47a   : > { %v3755_v2 = vmul.f32 %v4602_v5, %v6018_v35  ;;  %v4604_v44 = vadd.f32 %v3672_v51, %v2201_v31 }
 0x47b   : > { %v3780_v17 = vadd.f32 %v6023_v57, %v3757_v56  ;;  %v3758_v38 = vmul.f32 %v4603_v12, %v6018_v35 }
 0x47c   : > { %v3778_v46 = vadd.f32 %v6023_v57, %v3755_v2  ;;  %v3756_v1 = vmul.f32 %v4604_v44, %v6018_v35 }
 0x47d   : > { %vm3796_vm13 = vcmp.ge.f32.partialorder %v3780_v17, 0.0  ;;  %v3812_v27 = vmul.f32 0.01, %v3780_v17  ;;  %v3781_v42 = vadd.f32 %v6023_v57, %v3758_v38 }
 0x47e   : > { %vm3794_vm15 = vcmp.ge.f32.partialorder %v3778_v46, 0.0  ;;  %v3810_v7 = vmul.f32 0.01, %v3778_v46  ;;  %v3779_v24 = vadd.f32 %v6023_v57, %v3756_v1  ;;  %v4587_v61 = vpop.f32.mrb[4].mxu0 }
 0x47f   : > { %v3828_v14 = vsel %vm3796_vm13, %v3780_v17, %v3812_v27  ;;  %vm3797_vm1 = vcmp.ge.f32.partialorder %v3781_v42, 0.0  ;;  %v3813_v33 = vmul.f32 0.01, %v3781_v42  ;;  %v4605_v34 = vadd.f32 %v4587_v61, %v4497_v26  ;;  %v3685_v29 = vpop.f32.mrb[5].mxu0  ;;  %v3850_v61 = vld [vmem:[%s4990_s29 + $0x40] sm:$0xff] }
 0x480   : > { %v3860_v60 = vadd.f32 %v3844_v20, %v3828_v14  ;;  %v3826_v37 = vsel %vm3794_vm15, %v3778_v46, %v3810_v7  ;;  %vm3795_vm2 = vcmp.ge.f32.partialorder %v3779_v24, 0.0  ;;  %v3811_v19 = vmul.f32 0.01, %v3779_v24  ;;  %v4588_v28 = vpop.f32.mrb[6].mxu0 }
 0x481   : > { %v3858_v58 = vadd.f32 %v3842_v32, %v3826_v37  ;;  %v3829_v16 = vsel %vm3797_vm1, %v3781_v42, %v3813_v33  ;;  %v3761_v55 = vmul.f32 %v4605_v34, %v6018_v35  ;;  %v4606_v63 = vadd.f32 %v3685_v29, %v2214_v36  ;;  %v3688_v10 = vpop.f32.mrb[7].mxu0  ;;  %v3853_v37 = vld [vmem:[%s4990_s29 + $0x58] sm:$0xff] }
 0x482   : > { %3876 = vst.msk [vmem:[%s4995_s17 + $0x10] sm:$0xff] %vm594_vm6, %v3860_v60  ;;  %v3861_v15 = vadd.f32 %v3845_v41, %v3829_v16  ;;  %v3827_v50 = vsel %vm3795_vm2, %v3779_v24, %v3811_v19  ;;  %v4607_v43 = vadd.f32 %v4588_v28, %v4498_v9  ;;  %v4608_v53 = vadd.f32 %v3688_v10, %v2217_v40  ;;  %v3852_v24 = vld [vmem:[%s4990_s29 + $0x50] sm:$0xff] }
 0x483   : > { %3874 = vst.msk [vmem:[%s4995_s17] sm:$0xff] %vm594_vm6, %v3858_v58  ;;  %v3859_v11 = vadd.f32 %v3843_v6, %v3827_v50  ;;  %v3784_v4 = vadd.f32 %v6023_v57, %v3761_v55  ;;  %v3759_v23 = vmul.f32 %v4606_v63, %v6018_v35 }
 0x484   : > { %3877 = vst.msk [vmem:[%s4995_s17 + $0x18] sm:$0xff] %vm594_vm6, %v3861_v15  ;;  %v3762_v3 = vmul.f32 %v4607_v43, %v6018_v35  ;;  %v3760_v47 = vmul.f32 %v4608_v53, %v6018_v35 }
 0x485   : > { %3875 = vst.msk [vmem:[%s4995_s17 + $0x8] sm:$0xff] %vm594_vm6, %v3859_v11  ;;  %vm3800_vm4 = vcmp.ge.f32.partialorder %v3784_v4, 0.0  ;;  %v3816_v48 = vmul.f32 0.01, %v3784_v4  ;;  %v3782_v49 = vadd.f32 %v6023_v57, %v3759_v23 }
 0x486   : > { %v3785_v13 = vadd.f32 %v6023_v57, %v3762_v3  ;;  %v3783_v25 = vadd.f32 %v6023_v57, %v3760_v47  ;;  %v4591_v18 = vpop.f32.mrb[8].mxu0  ;;  %v3851_v3 = vld [vmem:[%s4990_s29 + $0x48] sm:$0xff] }
 0x487   : > { %v3832_v8 = vsel %vm3800_vm4, %v3784_v4, %v3816_v48  ;;  %vm3798_vm5 = vcmp.ge.f32.partialorder %v3782_v49, 0.0  ;;  %v3814_v52 = vmul.f32 0.01, %v3782_v49  ;;  %v4519_v22 = vpop.f32.mrb[8].mxu1  ;;  %v3701_v59 = vpop.f32.mrb[9].mxu0 }
 0x488   : > { %v3864_v31 = vadd.f32 %v3848_v39, %v3832_v8  ;;  %vm3801_vm8 = vcmp.ge.f32.partialorder %v3785_v13, 0.0  ;;  %v3817_v26 = vmul.f32 0.01, %v3785_v13  ;;  %vm3799_vm0 = vcmp.ge.f32.partialorder %v3783_v25, 0.0  ;;  %v2612_v36 = vpop.f32.mrb[9].mxu1  ;;  %v4592_v9 = vpop.f32.mrb[10].mxu0 }
 0x489   : > { %v3830_v40 = vsel %vm3798_vm5, %v3782_v49, %v3814_v52  ;;  %v3815_v45 = vmul.f32 0.01, %v3783_v25  ;;  %v4609_v30 = vadd.f32 %v4591_v18, %v4519_v22  ;;  %v4610_v5 = vadd.f32 %v3701_v59, %v2612_v36  ;;  %v4520_v62 = vpop.f32.mrb[10].mxu1  ;;  %v3704_v56 = vpop.f32.mrb[11].mxu0  ;;  %v3856_v59 = vld [vmem:[%s4990_s29 + $0x70] sm:$0xff] }
 0x48a   : > { %3880 = vst.msk [vmem:[%s4995_s17 + $0x30] sm:$0xff] %vm594_vm6, %v3864_v31  ;;  %v3862_v12 = vadd.f32 %v3846_v0, %v3830_v40  ;;  %v3833_v51 = vsel %vm3801_vm8, %v3785_v13, %v3817_v26  ;;  %v4611_v2 = vadd.f32 %v4592_v9, %v4520_v62  ;;  %v2615_v44 = vpop.f32.mrb[11].mxu1 }
 0x48b   : > { %v3865_v17 = vadd.f32 %v3849_v21, %v3833_v51  ;;  %v3831_v38 = vsel %vm3799_vm0, %v3783_v25, %v3815_v45  ;;  %v3765_v46 = vmul.f32 %v4609_v30, %v6018_v35  ;;  %v3763_v1 = vmul.f32 %v4610_v5, %v6018_v35  ;;  %v3854_v45 = vld [vmem:[%s4990_s29 + $0x60] sm:$0xff]  ;;  %v3857_v30 = vld [vmem:[%s4990_s29 + $0x78] sm:$0xff] }
 0x48c   : > { %3878 = vst.msk [vmem:[%s4995_s17 + $0x20] sm:$0xff] %vm594_vm6, %v3862_v12  ;;  %v3863_v27 = vadd.f32 %v3847_v54, %v3831_v38  ;;  %v3766_v20 = vmul.f32 %v4611_v2, %v6018_v35  ;;  %v4612_v42 = vadd.f32 %v3704_v56, %v2615_v44  ;;  %v3855_v56 = vld [vmem:[%s4990_s29 + $0x68] sm:$0xff] }
 0x48d   : > { %3881 = vst.msk [vmem:[%s4995_s17 + $0x38] sm:$0xff] %vm594_vm6, %v3865_v17  ;;  %v3788_v7 = vadd.f32 %v6023_v57, %v3765_v46  ;;  %v3786_v32 = vadd.f32 %v6023_v57, %v3763_v1 }
 0x48e   : > { %3879 = vst.msk [vmem:[%s4995_s17 + $0x28] sm:$0xff] %vm594_vm6, %v3863_v27  ;;  %v3789_v14 = vadd.f32 %v6023_v57, %v3766_v20  ;;  %v3764_v33 = vmul.f32 %v4612_v42, %v6018_v35  ;;  %v4595_v41 = vpop.f32.mrb[12].mxu0 }
 0x48f   : > { %vm3804_vm3 = vcmp.ge.f32.partialorder %v3788_v7, 0.0  ;;  %v3820_v34 = vmul.f32 0.01, %v3788_v7  ;;  %vm3802_vm7 = vcmp.ge.f32.partialorder %v3786_v32, 0.0  ;;  %v3818_v29 = vmul.f32 0.01, %v3786_v32 }
 0x490   : > { %vm3805_vm14 = vcmp.ge.f32.partialorder %v3789_v14, 0.0  ;;  %v3821_v60 = vmul.f32 0.01, %v3789_v14  ;;  %v3787_v19 = vadd.f32 %v6023_v57, %v3764_v33  ;;  %v4523_v6 = vpop.f32.mrb[12].mxu1  ;;  %v3717_v28 = vpop.f32.mrb[13].mxu0 }
 0x491   : > { %v3836_v58 = vsel %vm3804_vm3, %v3788_v7, %v3820_v34  ;;  %v3834_v16 = vsel %vm3802_vm7, %v3786_v32, %v3818_v29  ;;  %v4613_v55 = vadd.f32 %v4595_v41, %v4523_v6  ;;  %v2628_v63 = vpop.f32.mrb[13].mxu1  ;;  %v4596_v10 = vpop.f32.mrb[14].mxu0 }
 0x492   : > { %v3868_v15 = vadd.f32 %v3852_v24, %v3836_v58  ;;  %v3866_v50 = vadd.f32 %v3850_v61, %v3834_v16  ;;  %v3837_v43 = vsel %vm3805_vm14, %v3789_v14, %v3821_v60  ;;  %vm3803_vm9 = vcmp.ge.f32.partialorder %v3787_v19, 0.0  ;;  %v4524_v53 = vpop.f32.mrb[14].mxu1  ;;  %v3720_v11 = vpop.f32.mrb[15].mxu0 }
 0x493   : > { %v3869_v4 = vadd.f32 %v3853_v37, %v3837_v43  ;;  %v3819_v23 = vmul.f32 0.01, %v3787_v19  ;;  %v3769_v47 = vmul.f32 %v4613_v55, %v6018_v35  ;;  %v4614_v48 = vadd.f32 %v3717_v28, %v2628_v63  ;;  %v2631_v39 = vpop.f32.mrb[15].mxu1 }
 0x494   : > { %3884 = vst.msk [vmem:[%s4995_s17 + $0x50] sm:$0xff] %vm594_vm6, %v3868_v15  ;;  %3882 = vst.msk [vmem:[%s4995_s17 + $0x40] sm:$0xff] %vm594_vm6, %v3866_v50  ;;  %v4615_v49 = vadd.f32 %v4596_v10, %v4524_v53  ;;  %v4616_v0 = vadd.f32 %v3720_v11, %v2631_v39 }
 0x495   : > { %3885 = vst.msk [vmem:[%s4995_s17 + $0x58] sm:$0xff] %vm594_vm6, %v3869_v4  ;;  %v3835_v13 = vsel %vm3803_vm9, %v3787_v19, %v3819_v23  ;;  %v3792_v25 = vadd.f32 %v6023_v57, %v3769_v47  ;;  %v3767_v18 = vmul.f32 %v4614_v48, %v6018_v35 }
 0x496   : > { %v3867_v8 = vadd.f32 %v3851_v3, %v3835_v13  ;;  %v3770_v52 = vmul.f32 %v4615_v49, %v6018_v35  ;;  %v3768_v21 = vmul.f32 %v4616_v0, %v6018_v35 }
 0x497   : > { %vm3808_vm10 = vcmp.ge.f32.partialorder %v3792_v25, 0.0  ;;  %v3824_v22 = vmul.f32 0.01, %v3792_v25  ;;  %v3790_v31 = vadd.f32 %v6023_v57, %v3767_v18 }
 0x498   : > { %3883 = vst.msk [vmem:[%s4995_s17 + $0x48] sm:$0xff] %vm594_vm6, %v3867_v8  ;;  %v3793_v26 = vadd.f32 %v6023_v57, %v3770_v52  ;;  %v3791_v36 = vadd.f32 %v6023_v57, %v3768_v21 }
 0x499   : > { %v3840_v9 = vsel %vm3808_vm10, %v3792_v25, %v3824_v22  ;;  %vm3806_vm11 = vcmp.ge.f32.partialorder %v3790_v31, 0.0  ;;  %v3822_v40 = vmul.f32 0.01, %v3790_v31 }
 0x49a   : > { %v3872_v35 = vadd.f32 %v3856_v59, %v3840_v9  ;;  %vm3809_vm12 = vcmp.ge.f32.partialorder %v3793_v26, 0.0  ;;  %v3825_v54 = vmul.f32 0.01, %v3793_v26  ;;  %vm3807_vm13 = vcmp.ge.f32.partialorder %v3791_v36, 0.0 }
 0x49b   : > { %v3838_v5 = vsel %vm3806_vm11, %v3790_v31, %v3822_v40  ;;  %v3823_v62 = vmul.f32 0.01, %v3791_v36 }
 0x49c   : > { %3888 = vst.msk [vmem:[%s4995_s17 + $0x70] sm:$0xff] %vm594_vm6, %v3872_v35  ;;  %v3870_v12 = vadd.f32 %v3854_v45, %v3838_v5  ;;  %v3841_v51 = vsel %vm3809_vm12, %v3793_v26, %v3825_v54 }
 0x49d   : > { %v3873_v57 = vadd.f32 %v3857_v30, %v3841_v51  ;;  %v3839_v2 = vsel %vm3807_vm13, %v3791_v36, %v3823_v62 }
 0x49e   : > { %3886 = vst.msk [vmem:[%s4995_s17 + $0x60] sm:$0xff] %vm594_vm6, %v3870_v12  ;;  %v3871_v44 = vadd.f32 %v3855_v56, %v3839_v2 }
 0x49f   : > { %3889 = vst.msk [vmem:[%s4995_s17 + $0x78] sm:$0xff] %vm594_vm6, %v3873_v57 }
 0x4a0   : > { %3887 = vst.msk [vmem:[%s4995_s17 + $0x68] sm:$0xff] %vm594_vm6, %v3871_v44 }
 0x4a1 PF: > { %s19_s13 = sadd.s32 1, %s4850_s13   ;;  %s6161_s30 = smov %s4842_s11 }
 0x4a2   : > { %p16_p0 = scmp.ge.s32.totalorder %s19_s13, 6   ;;  %s6162_s10 = smov %s4846_s12 }
 0x4a3   : > { %s6163_s11 = smov %s6166_s14  ;;  %s6164_s12 = smov %s6170_s15 }
 0x4a4   :  { %18 = sbr.rel (!%p16_p0) target bundleno = 3 (0x3), region = 120 }

</bundles_post_ra>
